<compile_context>
chip_gen: v7x
topology: tpu7x:2x2x1
jax: 0.10.0
libtpu: 0.0.40
codegen_flags: <defaults>
</compile_context>

<pallas_src>
import functools
import math

import numpy as np

import jax
import jax.numpy as jnp
from jax.experimental import pallas as pl
from jax.experimental.pallas import tpu as pltpu


# --------------------------------------------------------------------------- #
# Fused CycleBlock kernel (one batch element per grid step)
# --------------------------------------------------------------------------- #
def _cycle_block_kernel(x_ref,
                        g1_ref, b1_ref,
                        whp_ref, whm_ref, wh0_ref, bh_ref,
                        wwp_ref, wwm_ref, ww0_ref, bw_ref,
                        wc_ref,
                        wr1_ref, br1_ref,
                        wr2a_ref, wr2b_ref, wr2c_ref,
                        br2a_ref, br2b_ref, br2c_ref,
                        wp_ref, bp_ref,
                        g2_ref, b2_ref,
                        wm1_ref, bm1_ref, wm2_ref, bm2_ref,
                        o_ref,
                        *, H, W, C, eps, inv_skip):
    HW = H * W
    inv_c = 1.0 / C
    inv_hw = 1.0 / HW
    f32 = jnp.float32
    bf16 = jnp.bfloat16
    dotf = functools.partial(jnp.dot, preferred_element_type=f32)

    x2 = x_ref[0].reshape(HW, C).astype(f32)

    # ---- LayerNorm 1 (centered two-pass statistics, f32) ----
    mu = jnp.sum(x2, axis=-1, keepdims=True) * inv_c
    xc = x2 - mu
    var = jnp.sum(xc * xc, axis=-1, keepdims=True) * inv_c
    y2 = xc * jax.lax.rsqrt(var + eps) * g1_ref[...] + b1_ref[...]

    # ---- zero-padded +/-1 shifts along W and H (all channels; selection is in the weights) ----
    y3 = y2.reshape(H, W, C)
    zw = jnp.zeros((H, 1, C), f32)
    zh = jnp.zeros((1, W, C), f32)
    y_wp = jnp.concatenate([y3[:, 1:, :], zw], axis=1).reshape(HW, C)   # y[h, w+1]
    y_wm = jnp.concatenate([zw, y3[:, :-1, :]], axis=1).reshape(HW, C)  # y[h, w-1]
    y_hp = jnp.concatenate([y3[1:, :, :], zh], axis=0).reshape(HW, C)   # y[h+1, w]
    y_hm = jnp.concatenate([zh, y3[:-1, :, :]], axis=0).reshape(HW, C)  # y[h-1, w]

    # ---- spatial means (f32) ----
    m0 = jnp.sum(y2, axis=0, keepdims=True) * inv_hw
    mwp = jnp.sum(y_wp, axis=0, keepdims=True) * inv_hw
    mwm = jnp.sum(y_wm, axis=0, keepdims=True) * inv_hw
    mhp = jnp.sum(y_hp, axis=0, keepdims=True) * inv_hw
    mhm = jnp.sum(y_hm, axis=0, keepdims=True) * inv_hw

    # bf16 operands for the MXU
    y0b, ywpb, ywmb, yhpb, yhmb = (a.astype(bf16) for a in (y2, y_wp, y_wm, y_hp, y_hm))
    m0b, mwpb, mwmb, mhpb, mhmb = (a.astype(bf16) for a in (m0, mwp, mwm, mhp, mhm))

    # ---- reweight branch: mean(h + w + c) via mean-commutes-with-matmul ----
    a_vec = (dotf(mwpb, whp_ref[...]) + dotf(mwmb, whm_ref[...])
             + dotf(mhpb, wwp_ref[...]) + dotf(mhmb, wwm_ref[...])
             + dotf(m0b, wh0_ref[...]) + dotf(m0b, ww0_ref[...]) + dotf(m0b, wc_ref[...])
             + bh_ref[...] + bw_ref[...])                              # (1, C) f32

    r = dotf(a_vec.astype(bf16), wr1_ref[...]) + br1_ref[...]
    r = jax.nn.gelu(r, approximate=True).astype(bf16)
    l0 = dotf(r, wr2a_ref[...]) + br2a_ref[...]
    l1 = dotf(r, wr2b_ref[...]) + br2b_ref[...]
    l2 = dotf(r, wr2c_ref[...]) + br2c_ref[...]
    lmax = jnp.maximum(jnp.maximum(l0, l1), l2)
    e0 = jnp.exp(l0 - lmax)
    e1 = jnp.exp(l1 - lmax)
    e2 = jnp.exp(l2 - lmax)
    inv_den = pl.reciprocal(e0 + e1 + e2, approx=True)
    a0 = e0 * inv_den
    a1 = e1 * inv_den
    a2 = e2 * inv_den
    a0b, a1b, a2b = a0.astype(bf16), a1.astype(bf16), a2.astype(bf16)

    # ---- fold the softmax gates into the (tiny) channel-mix weights, accumulate attn ----
    sa = whp_ref[...] * a0b
    sb = whm_ref[...] * a0b
    sc = wwp_ref[...] * a1b
    sd = wwm_ref[...] * a1b
    se = wh0_ref[...] * a0b + ww0_ref[...] * a1b + wc_ref[...] * a2b
    attn = (dotf(ywpb, sa) + dotf(ywmb, sb) + dotf(yhpb, sc) + dotf(yhmb, sd)
            + dotf(y0b, se) + bh_ref[...] * a0 + bw_ref[...] * a1)     # (HW, C) f32

    attn = dotf(attn.astype(bf16), wp_ref[...]) + bp_ref[...]
    xr = x2 + attn * inv_skip                                          # residual 1

    # ---- LayerNorm 2 + channel MLP ----
    mu2 = jnp.sum(xr, axis=-1, keepdims=True) * inv_c
    xc2 = xr - mu2
    var2 = jnp.sum(xc2 * xc2, axis=-1, keepdims=True) * inv_c
    yn2 = xc2 * jax.lax.rsqrt(var2 + eps) * g2_ref[...] + b2_ref[...]
    hid = jax.nn.gelu(dotf(yn2.astype(bf16), wm1_ref[...]) + bm1_ref[...],
                      approximate=True)
    mo = dotf(hid.astype(bf16), wm2_ref[...]) + bm2_ref[...]
    out = xr + mo * inv_skip                                           # residual 2

    o_ref[0] = out.reshape(H, W, C)


# --------------------------------------------------------------------------- #
# One-time host-side parameter preparation (cache the result!)
# --------------------------------------------------------------------------- #
def prepare_cycle_block_params(params):
    """Transpose to [in,out], split CycleFC weights by shift group (c%3==0/1/2),
    split the reweight head into its three softmax groups, cast matmul weights to
    bfloat16.  Do this once and reuse the returned pytree across forward calls."""
    f32, bf16 = jnp.float32, jnp.bfloat16
    C = int(np.asarray(params["g1"]).shape[0])
    cidx = np.arange(C)
    rm_p = (cidx % 3 == 1).astype(np.float32)[:, None]   # input rows sampling at +1
    rm_m = (cidx % 3 == 2).astype(np.float32)[:, None]   # input rows sampling at -1
    rm_0 = (cidx % 3 == 0).astype(np.float32)[:, None]   # unshifted input rows

    def t(w):                                            # [out, in] -> [in, out]
        return np.asarray(w, np.float32).T

    def vec(v):
        return jnp.asarray(np.asarray(v, np.float32).reshape(1, -1), f32)

    wh_t, ww_t, wc_t = t(params["wh"]), t(params["ww"]), t(params["wc"])
    wr2_t = t(params["wr2"])                             # (Hr, 3C), out index = c*3 + j
    Hr = wr2_t.shape[0]
    wr2_g = wr2_t.reshape(Hr, C, 3)
    br2_g = np.asarray(params["br2"], np.float32).reshape(C, 3)

    return dict(
        g1=vec(params["g1"]), b1=vec(params["b1"]),
        whp=jnp.asarray(wh_t * rm_p, bf16), whm=jnp.asarray(wh_t * rm_m, bf16),
        wh0=jnp.asarray(wh_t * rm_0, bf16), bh=vec(params["bh"]),
        wwp=jnp.asarray(ww_t * rm_p, bf16), wwm=jnp.asarray(ww_t * rm_m, bf16),
        ww0=jnp.asarray(ww_t * rm_0, bf16), bw=vec(params["bw"]),
        wc=jnp.asarray(wc_t, bf16),
        wr1=jnp.asarray(t(params["wr1"]), bf16), br1=vec(params["br1"]),
        wr2a=jnp.asarray(wr2_g[:, :, 0], bf16),
        wr2b=jnp.asarray(wr2_g[:, :, 1], bf16),
        wr2c=jnp.asarray(wr2_g[:, :, 2], bf16),
        br2a=vec(br2_g[:, 0]), br2b=vec(br2_g[:, 1]), br2c=vec(br2_g[:, 2]),
        wp=jnp.asarray(t(params["wp"]), bf16), bp=vec(params["bp"]),
        g2=vec(params["g2"]), b2=vec(params["b2"]),
        wm1=jnp.asarray(t(params["wm1"]), bf16), bm1=vec(params["bm1"]),
        wm2=jnp.asarray(t(params["wm2"]), bf16), bm2=vec(params["bm2"]),
    )


_PARAM_ORDER = ["g1", "b1",
                "whp", "whm", "wh0", "bh",
                "wwp", "wwm", "ww0", "bw",
                "wc",
                "wr1", "br1",
                "wr2a", "wr2b", "wr2c", "br2a", "br2b", "br2c",
                "wp", "bp",
                "g2", "b2",
                "wm1", "bm1", "wm2", "bm2"]


# --------------------------------------------------------------------------- #
# Forward wrapper
# --------------------------------------------------------------------------- #
def cycle_block_forward(x, prep, *, skip_lam=1.0, eps=1e-5):
    """x: [B, H, W, C] (NHWC) f32; prep: output of prepare_cycle_block_params."""
    B, H, W, C = x.shape
    x = x.astype(jnp.float32)
    consts = [prep[n] for n in _PARAM_ORDER]

    def const_spec(a):
        nd = a.ndim
        return pl.BlockSpec(a.shape, lambda b, _nd=nd: (0,) * _nd)

    kernel = functools.partial(_cycle_block_kernel, H=H, W=W, C=C,
                               eps=eps, inv_skip=1.0 / skip_lam)

    return pl.pallas_call(
        kernel,
        out_shape=jax.ShapeDtypeStruct((B, H, W, C), jnp.float32),
        grid=(B,),
        in_specs=[pl.BlockSpec((1, H, W, C), lambda b: (b, 0, 0, 0))]
                 + [const_spec(a) for a in consts],
        out_specs=pl.BlockSpec((1, H, W, C), lambda b: (b, 0, 0, 0)),
        compiler_params=pltpu.CompilerParams(
            dimension_semantics=("parallel",),
            vmem_limit_bytes=48 * 1024 * 1024,
        ),
    )(x, *consts)


# --------------------------------------------------------------------------- #
# Pure-JAX reference (mirrors the PyTorch module)
# --------------------------------------------------------------------------- #
def _shift_cyclic(y, axis, C):
    nd = y.ndim
    sl_hi = [slice(None)] * nd
    sl_hi[axis] = slice(1, None)
    pad_hi = [(0, 0)] * nd
    pad_hi[axis] = (0, 1)
    sl_lo = [slice(None)] * nd
    sl_lo[axis] = slice(0, -1)
    pad_lo = [(0, 0)] * nd
    pad_lo[axis] = (1, 0)
    y_plus = jnp.pad(y[tuple(sl_hi)], pad_hi)
    y_minus = jnp.pad(y[tuple(sl_lo)], pad_lo)
    cm = jnp.arange(C) % 3
    return jnp.where(cm == 1, y_plus, jnp.where(cm == 2, y_minus, y))


def cycle_block_reference(x, p, *, skip_lam=1.0, eps=1e-5):
    B, H, W, C = x.shape

    def ln(t, g, b):
        mu = jnp.mean(t, axis=-1, keepdims=True)
        var = jnp.mean((t - mu) ** 2, axis=-1, keepdims=True)
        return (t - mu) / jnp.sqrt(var + eps) * g + b

    y = ln(x, p["g1"], p["b1"])
    h = _shift_cyclic(y, 2, C) @ p["wh"].T + p["bh"]       # sfc_h: shift along W
    w_ = _shift_cyclic(y, 1, C) @ p["ww"].T + p["bw"]      # sfc_w: shift along H
    c = y @ p["wc"].T
    a = (h + w_ + c).mean(axis=(1, 2))                     # [B, C]
    a = jax.nn.gelu(a @ p["wr1"].T + p["br1"], approximate=True)
    a = a @ p["wr2"].T + p["br2"]                          # [B, 3C]
    a = jax.nn.softmax(a.reshape(B, C, 3), axis=-1)
    a0 = a[..., 0][:, None, None, :]
    a1 = a[..., 1][:, None, None, :]
    a2 = a[..., 2][:, None, None, :]
    attn = h * a0 + w_ * a1 + c * a2
    attn = attn @ p["wp"].T + p["bp"]
    x = x + attn / skip_lam
    y2 = ln(x, p["g2"], p["b2"])
    m = jax.nn.gelu(y2 @ p["wm1"].T + p["bm1"], approximate=True)
    m = m @ p["wm2"].T + p["bm2"]
    return x + m / skip_lam


# --------------------------------------------------------------------------- #
if __name__ == "__main__":
    B, H, W, dim = 2, 16, 16, 32
    mlp_ratio = 4

    key = jax.random.PRNGKey(0)
    keys = jax.random.split(key, 10)

    def lin(k, out_f, in_f, bias=True):
        k1, k2 = jax.random.split(k)
        bound = 1.0 / math.sqrt(in_f)
        w = jax.random.uniform(k1, (out_f, in_f), minval=-bound, maxval=bound,
                               dtype=jnp.float32)
        b = (jax.random.uniform(k2, (out_f,), minval=-bound, maxval=bound,
                                dtype=jnp.float32) if bias else None)
        return w, b

    wc, _ = lin(keys[0], dim, dim, bias=False)
    wh, bh = lin(keys[1], dim, dim)
    ww, bw = lin(keys[2], dim, dim)
    wr1, br1 = lin(keys[3], dim // 4, dim)
    wr2, br2 = lin(keys[4], dim * 3, dim // 4)
    wp, bp = lin(keys[5], dim, dim)
    wm1, bm1 = lin(keys[6], dim * mlp_ratio, dim)
    wm2, bm2 = lin(keys[7], dim, dim * mlp_ratio)

    params = dict(
        g1=jnp.ones((dim,), jnp.float32), b1=jnp.zeros((dim,), jnp.float32),
        g2=jnp.ones((dim,), jnp.float32), b2=jnp.zeros((dim,), jnp.float32),
        wc=wc, wh=wh, bh=bh, ww=ww, bw=bw,
        wr1=wr1, br1=br1, wr2=wr2, br2=br2, wp=wp, bp=bp,
        wm1=wm1, bm1=bm1, wm2=wm2, bm2=bm2,
    )

    x = jax.random.normal(keys[8], (B, H, W, dim), dtype=jnp.float32)

    prep = prepare_cycle_block_params(params)            # hoisted / cached prep
    y = jax.block_until_ready(cycle_block_forward(x, prep, skip_lam=1.0))

    with jax.default_matmul_precision("highest"):
        ref = jax.block_until_ready(cycle_block_reference(x, params, skip_lam=1.0))

    assert y.shape == ref.shape, (y.shape, ref.shape)
    max_diff = float(jnp.max(jnp.abs(y - ref)))
    # bf16 MXU matmuls (f32 accumulation) -> slightly looser tolerance than pure f32.
    assert jnp.allclose(y, ref, atol=3e-2, rtol=3e-2), f"mismatch, max diff {max_diff}"

    print("KERNEL_OK")
</pallas_src>

<mosaic_0001>
module attributes {stable_mosaic.version = 11 : i64} {
  func.func @_cycle_block_kernel(%arg0: i32, %arg1: memref<1x16x16x32xf32, #tpu.memory_space<vmem>>, %arg2: memref<1x32xf32, #tpu.memory_space<vmem>>, %arg3: memref<1x32xf32, #tpu.memory_space<vmem>>, %arg4: memref<32x32xbf16, #tpu.memory_space<vmem>>, %arg5: memref<32x32xbf16, #tpu.memory_space<vmem>>, %arg6: memref<32x32xbf16, #tpu.memory_space<vmem>>, %arg7: memref<1x32xf32, #tpu.memory_space<vmem>>, %arg8: memref<32x32xbf16, #tpu.memory_space<vmem>>, %arg9: memref<32x32xbf16, #tpu.memory_space<vmem>>, %arg10: memref<32x32xbf16, #tpu.memory_space<vmem>>, %arg11: memref<1x32xf32, #tpu.memory_space<vmem>>, %arg12: memref<32x32xbf16, #tpu.memory_space<vmem>>, %arg13: memref<32x8xbf16, #tpu.memory_space<vmem>>, %arg14: memref<1x8xf32, #tpu.memory_space<vmem>>, %arg15: memref<8x32xbf16, #tpu.memory_space<vmem>>, %arg16: memref<8x32xbf16, #tpu.memory_space<vmem>>, %arg17: memref<8x32xbf16, #tpu.memory_space<vmem>>, %arg18: memref<1x32xf32, #tpu.memory_space<vmem>>, %arg19: memref<1x32xf32, #tpu.memory_space<vmem>>, %arg20: memref<1x32xf32, #tpu.memory_space<vmem>>, %arg21: memref<32x32xbf16, #tpu.memory_space<vmem>>, %arg22: memref<1x32xf32, #tpu.memory_space<vmem>>, %arg23: memref<1x32xf32, #tpu.memory_space<vmem>>, %arg24: memref<1x32xf32, #tpu.memory_space<vmem>>, %arg25: memref<32x128xbf16, #tpu.memory_space<vmem>>, %arg26: memref<1x128xf32, #tpu.memory_space<vmem>>, %arg27: memref<128x32xbf16, #tpu.memory_space<vmem>>, %arg28: memref<1x32xf32, #tpu.memory_space<vmem>>, %arg29: memref<1x16x16x32xf32, #tpu.memory_space<vmem>>) attributes {dimension_semantics = [#tpu.dimension_semantics<parallel>], iteration_bounds = array<i64: 2>, scalar_prefetch = 0 : i64, scratch_operands = 0 : i64, tpu.core_type = #tpu.core_type<tc>, window_params = [{transform_indices = @transform_0, window_bounds = array<i64: 1, 16, 16, 32>}, {pipeline_mode = #tpu.pipeline_mode<synchronous>, transform_indices = @transform_1, window_bounds = array<i64: 1, 32>}, {pipeline_mode = #tpu.pipeline_mode<synchronous>, transform_indices = @transform_2, window_bounds = array<i64: 1, 32>}, {pipeline_mode = #tpu.pipeline_mode<synchronous>, transform_indices = @transform_3, window_bounds = array<i64: 32, 32>}, {pipeline_mode = #tpu.pipeline_mode<synchronous>, transform_indices = @transform_4, window_bounds = array<i64: 32, 32>}, {pipeline_mode = #tpu.pipeline_mode<synchronous>, transform_indices = @transform_5, window_bounds = array<i64: 32, 32>}, {pipeline_mode = #tpu.pipeline_mode<synchronous>, transform_indices = @transform_6, window_bounds = array<i64: 1, 32>}, {pipeline_mode = #tpu.pipeline_mode<synchronous>, transform_indices = @transform_7, window_bounds = array<i64: 32, 32>}, {pipeline_mode = #tpu.pipeline_mode<synchronous>, transform_indices = @transform_8, window_bounds = array<i64: 32, 32>}, {pipeline_mode = #tpu.pipeline_mode<synchronous>, transform_indices = @transform_9, window_bounds = array<i64: 32, 32>}, {pipeline_mode = #tpu.pipeline_mode<synchronous>, transform_indices = @transform_10, window_bounds = array<i64: 1, 32>}, {pipeline_mode = #tpu.pipeline_mode<synchronous>, transform_indices = @transform_11, window_bounds = array<i64: 32, 32>}, {pipeline_mode = #tpu.pipeline_mode<synchronous>, transform_indices = @transform_12, window_bounds = array<i64: 32, 8>}, {pipeline_mode = #tpu.pipeline_mode<synchronous>, transform_indices = @transform_13, window_bounds = array<i64: 1, 8>}, {pipeline_mode = #tpu.pipeline_mode<synchronous>, transform_indices = @transform_14, window_bounds = array<i64: 8, 32>}, {pipeline_mode = #tpu.pipeline_mode<synchronous>, transform_indices = @transform_15, window_bounds = array<i64: 8, 32>}, {pipeline_mode = #tpu.pipeline_mode<synchronous>, transform_indices = @transform_16, window_bounds = array<i64: 8, 32>}, {pipeline_mode = #tpu.pipeline_mode<synchronous>, transform_indices = @transform_17, window_bounds = array<i64: 1, 32>}, {pipeline_mode = #tpu.pipeline_mode<synchronous>, transform_indices = @transform_18, window_bounds = array<i64: 1, 32>}, {pipeline_mode = #tpu.pipeline_mode<synchronous>, transform_indices = @transform_19, window_bounds = array<i64: 1, 32>}, {pipeline_mode = #tpu.pipeline_mode<synchronous>, transform_indices = @transform_20, window_bounds = array<i64: 32, 32>}, {pipeline_mode = #tpu.pipeline_mode<synchronous>, transform_indices = @transform_21, window_bounds = array<i64: 1, 32>}, {pipeline_mode = #tpu.pipeline_mode<synchronous>, transform_indices = @transform_22, window_bounds = array<i64: 1, 32>}, {pipeline_mode = #tpu.pipeline_mode<synchronous>, transform_indices = @transform_23, window_bounds = array<i64: 1, 32>}, {pipeline_mode = #tpu.pipeline_mode<synchronous>, transform_indices = @transform_24, window_bounds = array<i64: 32, 128>}, {pipeline_mode = #tpu.pipeline_mode<synchronous>, transform_indices = @transform_25, window_bounds = array<i64: 1, 128>}, {pipeline_mode = #tpu.pipeline_mode<synchronous>, transform_indices = @transform_26, window_bounds = array<i64: 128, 32>}, {pipeline_mode = #tpu.pipeline_mode<synchronous>, transform_indices = @transform_27, window_bounds = array<i64: 1, 32>}, {transform_indices = @transform_28, window_bounds = array<i64: 1, 16, 16, 32>}]} {
    %c0 = arith.constant 0 : index
    %c0_0 = arith.constant 0 : index
    %c0_1 = arith.constant 0 : index
    %c0_2 = arith.constant 0 : index
    %0 = vector.load %arg1[%c0, %c0_0, %c0_1, %c0_2] : memref<1x16x16x32xf32, #tpu.memory_space<vmem>>, vector<1x16x16x32xf32>
    %1 = vector.shape_cast %0 : vector<1x16x16x32xf32> to vector<16x16x32xf32>
    %2 = vector.shape_cast %1 : vector<16x16x32xf32> to vector<256x32xf32>
    %cst = arith.constant dense<0.000000e+00> : vector<256xf32>
    %3 = vector.multi_reduction <add>, %2, %cst [1] : vector<256x32xf32> to vector<256xf32>
    %4 = vector.shape_cast %3 : vector<256xf32> to vector<256x1xf32>
    %cst_3 = arith.constant 3.125000e-02 : f32
    %5 = vector.broadcast %cst_3 : f32 to vector<256x1xf32>
    %6 = arith.mulf %4, %5 : vector<256x1xf32>
    %7 = vector.broadcast %6 : vector<256x1xf32> to vector<256x32xf32>
    %8 = arith.subf %2, %7 : vector<256x32xf32>
    %9 = arith.mulf %8, %8 : vector<256x32xf32>
    %cst_4 = arith.constant dense<0.000000e+00> : vector<256xf32>
    %10 = vector.multi_reduction <add>, %9, %cst_4 [1] : vector<256x32xf32> to vector<256xf32>
    %11 = vector.shape_cast %10 : vector<256xf32> to vector<256x1xf32>
    %cst_5 = arith.constant 3.125000e-02 : f32
    %12 = vector.broadcast %cst_5 : f32 to vector<256x1xf32>
    %13 = arith.mulf %11, %12 : vector<256x1xf32>
    %cst_6 = arith.constant 9.99999974E-6 : f32
    %14 = vector.broadcast %cst_6 : f32 to vector<256x1xf32>
    %15 = arith.addf %13, %14 : vector<256x1xf32>
    %16 = math.rsqrt %15 : vector<256x1xf32>
    %17 = vector.broadcast %16 : vector<256x1xf32> to vector<256x32xf32>
    %18 = arith.mulf %8, %17 : vector<256x32xf32>
    %c0_7 = arith.constant 0 : index
    %c0_8 = arith.constant 0 : index
    %19 = vector.load %arg2[%c0_7, %c0_8] : memref<1x32xf32, #tpu.memory_space<vmem>>, vector<1x32xf32>
    %20 = vector.broadcast %19 : vector<1x32xf32> to vector<256x32xf32>
    %21 = arith.mulf %18, %20 : vector<256x32xf32>
    %c0_9 = arith.constant 0 : index
    %c0_10 = arith.constant 0 : index
    %22 = vector.load %arg3[%c0_9, %c0_10] : memref<1x32xf32, #tpu.memory_space<vmem>>, vector<1x32xf32>
    %23 = vector.broadcast %22 : vector<1x32xf32> to vector<256x32xf32>
    %24 = arith.addf %21, %23 : vector<256x32xf32>
    %25 = vector.shape_cast %24 : vector<256x32xf32> to vector<16x16x32xf32>
    %cst_11 = arith.constant 0.000000e+00 : f32
    %26 = vector.broadcast %cst_11 : f32 to vector<16x1x32xf32>
    %cst_12 = arith.constant 0.000000e+00 : f32
    %27 = vector.broadcast %cst_12 : f32 to vector<1x16x32xf32>
    %28 = vector.extract_strided_slice %25 {offsets = [0, 1, 0], sizes = [16, 15, 32], strides = [1, 1, 1]} : vector<16x16x32xf32> to vector<16x15x32xf32>
    %29 = tpu.concatenate %28, %26 in 1 : vector<16x15x32xf32>, vector<16x1x32xf32> -> vector<16x16x32xf32>
    %30 = vector.shape_cast %29 : vector<16x16x32xf32> to vector<256x32xf32>
    %31 = vector.extract_strided_slice %25 {offsets = [0, 0, 0], sizes = [16, 15, 32], strides = [1, 1, 1]} : vector<16x16x32xf32> to vector<16x15x32xf32>
    %32 = tpu.concatenate %26, %31 in 1 : vector<16x1x32xf32>, vector<16x15x32xf32> -> vector<16x16x32xf32>
    %33 = vector.shape_cast %32 : vector<16x16x32xf32> to vector<256x32xf32>
    %34 = vector.extract_strided_slice %25 {offsets = [1, 0, 0], sizes = [15, 16, 32], strides = [1, 1, 1]} : vector<16x16x32xf32> to vector<15x16x32xf32>
    %35 = tpu.concatenate %34, %27 in 0 : vector<15x16x32xf32>, vector<1x16x32xf32> -> vector<16x16x32xf32>
    %36 = vector.shape_cast %35 : vector<16x16x32xf32> to vector<256x32xf32>
    %37 = vector.extract_strided_slice %25 {offsets = [0, 0, 0], sizes = [15, 16, 32], strides = [1, 1, 1]} : vector<16x16x32xf32> to vector<15x16x32xf32>
    %38 = tpu.concatenate %27, %37 in 0 : vector<1x16x32xf32>, vector<15x16x32xf32> -> vector<16x16x32xf32>
    %39 = vector.shape_cast %38 : vector<16x16x32xf32> to vector<256x32xf32>
    %cst_13 = arith.constant dense<0.000000e+00> : vector<32xf32>
    %40 = vector.multi_reduction <add>, %24, %cst_13 [0] : vector<256x32xf32> to vector<32xf32>
    %41 = vector.shape_cast %40 : vector<32xf32> to vector<1x32xf32>
    %cst_14 = arith.constant 3.906250e-03 : f32
    %42 = vector.broadcast %cst_14 : f32 to vector<1x32xf32>
    %43 = arith.mulf %41, %42 : vector<1x32xf32>
    %cst_15 = arith.constant dense<0.000000e+00> : vector<32xf32>
    %44 = vector.multi_reduction <add>, %30, %cst_15 [0] : vector<256x32xf32> to vector<32xf32>
    %45 = vector.shape_cast %44 : vector<32xf32> to vector<1x32xf32>
    %cst_16 = arith.constant 3.906250e-03 : f32
    %46 = vector.broadcast %cst_16 : f32 to vector<1x32xf32>
    %47 = arith.mulf %45, %46 : vector<1x32xf32>
    %cst_17 = arith.constant dense<0.000000e+00> : vector<32xf32>
    %48 = vector.multi_reduction <add>, %33, %cst_17 [0] : vector<256x32xf32> to vector<32xf32>
    %49 = vector.shape_cast %48 : vector<32xf32> to vector<1x32xf32>
    %cst_18 = arith.constant 3.906250e-03 : f32
    %50 = vector.broadcast %cst_18 : f32 to vector<1x32xf32>
    %51 = arith.mulf %49, %50 : vector<1x32xf32>
    %cst_19 = arith.constant dense<0.000000e+00> : vector<32xf32>
    %52 = vector.multi_reduction <add>, %36, %cst_19 [0] : vector<256x32xf32> to vector<32xf32>
    %53 = vector.shape_cast %52 : vector<32xf32> to vector<1x32xf32>
    %cst_20 = arith.constant 3.906250e-03 : f32
    %54 = vector.broadcast %cst_20 : f32 to vector<1x32xf32>
    %55 = arith.mulf %53, %54 : vector<1x32xf32>
    %cst_21 = arith.constant dense<0.000000e+00> : vector<32xf32>
    %56 = vector.multi_reduction <add>, %39, %cst_21 [0] : vector<256x32xf32> to vector<32xf32>
    %57 = vector.shape_cast %56 : vector<32xf32> to vector<1x32xf32>
    %cst_22 = arith.constant 3.906250e-03 : f32
    %58 = vector.broadcast %cst_22 : f32 to vector<1x32xf32>
    %59 = arith.mulf %57, %58 : vector<1x32xf32>
    %60 = arith.truncf %24 : vector<256x32xf32> to vector<256x32xbf16>
    %61 = arith.truncf %30 : vector<256x32xf32> to vector<256x32xbf16>
    %62 = arith.truncf %33 : vector<256x32xf32> to vector<256x32xbf16>
    %63 = arith.truncf %36 : vector<256x32xf32> to vector<256x32xbf16>
    %64 = arith.truncf %39 : vector<256x32xf32> to vector<256x32xbf16>
    %65 = arith.truncf %43 : vector<1x32xf32> to vector<1x32xbf16>
    %66 = arith.truncf %47 : vector<1x32xf32> to vector<1x32xbf16>
    %67 = arith.truncf %51 : vector<1x32xf32> to vector<1x32xbf16>
    %68 = arith.truncf %55 : vector<1x32xf32> to vector<1x32xbf16>
    %69 = arith.truncf %59 : vector<1x32xf32> to vector<1x32xbf16>
    %c0_23 = arith.constant 0 : index
    %c0_24 = arith.constant 0 : index
    %70 = vector.load %arg4[%c0_23, %c0_24] : memref<32x32xbf16, #tpu.memory_space<vmem>>, vector<32x32xbf16>
    %cst_25 = arith.constant dense<0.000000e+00> : vector<1x32xf32>
    %71 = tpu.matmul %66, %70, %cst_25 {dimension_numbers = #tpu.dot_dimension_numbers<[1], [0], [0], [1], [0, 0, 1, 1], [], []>} : vector<1x32xbf16>, vector<32x32xbf16>, vector<1x32xf32> -> vector<1x32xf32>
    %c0_26 = arith.constant 0 : index
    %c0_27 = arith.constant 0 : index
    %72 = vector.load %arg5[%c0_26, %c0_27] : memref<32x32xbf16, #tpu.memory_space<vmem>>, vector<32x32xbf16>
    %cst_28 = arith.constant dense<0.000000e+00> : vector<1x32xf32>
    %73 = tpu.matmul %67, %72, %cst_28 {dimension_numbers = #tpu.dot_dimension_numbers<[1], [0], [0], [1], [0, 0, 1, 1], [], []>} : vector<1x32xbf16>, vector<32x32xbf16>, vector<1x32xf32> -> vector<1x32xf32>
    %74 = arith.addf %71, %73 : vector<1x32xf32>
    %c0_29 = arith.constant 0 : index
    %c0_30 = arith.constant 0 : index
    %75 = vector.load %arg8[%c0_29, %c0_30] : memref<32x32xbf16, #tpu.memory_space<vmem>>, vector<32x32xbf16>
    %cst_31 = arith.constant dense<0.000000e+00> : vector<1x32xf32>
    %76 = tpu.matmul %68, %75, %cst_31 {dimension_numbers = #tpu.dot_dimension_numbers<[1], [0], [0], [1], [0, 0, 1, 1], [], []>} : vector<1x32xbf16>, vector<32x32xbf16>, vector<1x32xf32> -> vector<1x32xf32>
    %77 = arith.addf %74, %76 : vector<1x32xf32>
    %c0_32 = arith.constant 0 : index
    %c0_33 = arith.constant 0 : index
    %78 = vector.load %arg9[%c0_32, %c0_33] : memref<32x32xbf16, #tpu.memory_space<vmem>>, vector<32x32xbf16>
    %cst_34 = arith.constant dense<0.000000e+00> : vector<1x32xf32>
    %79 = tpu.matmul %69, %78, %cst_34 {dimension_numbers = #tpu.dot_dimension_numbers<[1], [0], [0], [1], [0, 0, 1, 1], [], []>} : vector<1x32xbf16>, vector<32x32xbf16>, vector<1x32xf32> -> vector<1x32xf32>
    %80 = arith.addf %77, %79 : vector<1x32xf32>
    %c0_35 = arith.constant 0 : index
    %c0_36 = arith.constant 0 : index
    %81 = vector.load %arg6[%c0_35, %c0_36] : memref<32x32xbf16, #tpu.memory_space<vmem>>, vector<32x32xbf16>
    %cst_37 = arith.constant dense<0.000000e+00> : vector<1x32xf32>
    %82 = tpu.matmul %65, %81, %cst_37 {dimension_numbers = #tpu.dot_dimension_numbers<[1], [0], [0], [1], [0, 0, 1, 1], [], []>} : vector<1x32xbf16>, vector<32x32xbf16>, vector<1x32xf32> -> vector<1x32xf32>
    %83 = arith.addf %80, %82 : vector<1x32xf32>
    %c0_38 = arith.constant 0 : index
    %c0_39 = arith.constant 0 : index
    %84 = vector.load %arg10[%c0_38, %c0_39] : memref<32x32xbf16, #tpu.memory_space<vmem>>, vector<32x32xbf16>
    %cst_40 = arith.constant dense<0.000000e+00> : vector<1x32xf32>
    %85 = tpu.matmul %65, %84, %cst_40 {dimension_numbers = #tpu.dot_dimension_numbers<[1], [0], [0], [1], [0, 0, 1, 1], [], []>} : vector<1x32xbf16>, vector<32x32xbf16>, vector<1x32xf32> -> vector<1x32xf32>
    %86 = arith.addf %83, %85 : vector<1x32xf32>
    %c0_41 = arith.constant 0 : index
    %c0_42 = arith.constant 0 : index
    %87 = vector.load %arg12[%c0_41, %c0_42] : memref<32x32xbf16, #tpu.memory_space<vmem>>, vector<32x32xbf16>
    %cst_43 = arith.constant dense<0.000000e+00> : vector<1x32xf32>
    %88 = tpu.matmul %65, %87, %cst_43 {dimension_numbers = #tpu.dot_dimension_numbers<[1], [0], [0], [1], [0, 0, 1, 1], [], []>} : vector<1x32xbf16>, vector<32x32xbf16>, vector<1x32xf32> -> vector<1x32xf32>
    %89 = arith.addf %86, %88 : vector<1x32xf32>
    %c0_44 = arith.constant 0 : index
    %c0_45 = arith.constant 0 : index
    %90 = vector.load %arg7[%c0_44, %c0_45] : memref<1x32xf32, #tpu.memory_space<vmem>>, vector<1x32xf32>
    %91 = arith.addf %89, %90 : vector<1x32xf32>
    %c0_46 = arith.constant 0 : index
    %c0_47 = arith.constant 0 : index
    %92 = vector.load %arg11[%c0_46, %c0_47] : memref<1x32xf32, #tpu.memory_space<vmem>>, vector<1x32xf32>
    %93 = arith.addf %91, %92 : vector<1x32xf32>
    %94 = arith.truncf %93 : vector<1x32xf32> to vector<1x32xbf16>
    %c0_48 = arith.constant 0 : index
    %c0_49 = arith.constant 0 : index
    %95 = vector.load %arg13[%c0_48, %c0_49] : memref<32x8xbf16, #tpu.memory_space<vmem>>, vector<32x8xbf16>
    %cst_50 = arith.constant dense<0.000000e+00> : vector<1x8xf32>
    %96 = tpu.matmul %94, %95, %cst_50 {dimension_numbers = #tpu.dot_dimension_numbers<[1], [0], [0], [1], [0, 0, 1, 1], [], []>} : vector<1x32xbf16>, vector<32x8xbf16>, vector<1x8xf32> -> vector<1x8xf32>
    %c0_51 = arith.constant 0 : index
    %c0_52 = arith.constant 0 : index
    %97 = vector.load %arg14[%c0_51, %c0_52] : memref<1x8xf32, #tpu.memory_space<vmem>>, vector<1x8xf32>
    %98 = arith.addf %96, %97 : vector<1x8xf32>
    %99 = arith.mulf %98, %98 : vector<1x8xf32>
    %100 = arith.mulf %98, %99 : vector<1x8xf32>
    %cst_53 = arith.constant 4.471500e-02 : f32
    %101 = vector.broadcast %cst_53 : f32 to vector<1x8xf32>
    %102 = arith.mulf %101, %100 : vector<1x8xf32>
    %103 = arith.addf %98, %102 : vector<1x8xf32>
    %cst_54 = arith.constant 0.797884583 : f32
    %104 = vector.broadcast %cst_54 : f32 to vector<1x8xf32>
    %105 = arith.mulf %104, %103 : vector<1x8xf32>
    %106 = math.tanh %105 : vector<1x8xf32>
    %cst_55 = arith.constant 1.000000e+00 : f32
    %107 = vector.broadcast %cst_55 : f32 to vector<1x8xf32>
    %108 = arith.addf %107, %106 : vector<1x8xf32>
    %cst_56 = arith.constant 5.000000e-01 : f32
    %109 = vector.broadcast %cst_56 : f32 to vector<1x8xf32>
    %110 = arith.mulf %109, %108 : vector<1x8xf32>
    %111 = arith.mulf %98, %110 : vector<1x8xf32>
    %112 = arith.truncf %111 : vector<1x8xf32> to vector<1x8xbf16>
    %c0_57 = arith.constant 0 : index
    %c0_58 = arith.constant 0 : index
    %113 = vector.load %arg15[%c0_57, %c0_58] : memref<8x32xbf16, #tpu.memory_space<vmem>>, vector<8x32xbf16>
    %cst_59 = arith.constant dense<0.000000e+00> : vector<1x32xf32>
    %114 = tpu.matmul %112, %113, %cst_59 {dimension_numbers = #tpu.dot_dimension_numbers<[1], [0], [0], [1], [0, 0, 1, 1], [], []>} : vector<1x8xbf16>, vector<8x32xbf16>, vector<1x32xf32> -> vector<1x32xf32>
    %c0_60 = arith.constant 0 : index
    %c0_61 = arith.constant 0 : index
    %115 = vector.load %arg18[%c0_60, %c0_61] : memref<1x32xf32, #tpu.memory_space<vmem>>, vector<1x32xf32>
    %116 = arith.addf %114, %115 : vector<1x32xf32>
    %c0_62 = arith.constant 0 : index
    %c0_63 = arith.constant 0 : index
    %117 = vector.load %arg16[%c0_62, %c0_63] : memref<8x32xbf16, #tpu.memory_space<vmem>>, vector<8x32xbf16>
    %cst_64 = arith.constant dense<0.000000e+00> : vector<1x32xf32>
    %118 = tpu.matmul %112, %117, %cst_64 {dimension_numbers = #tpu.dot_dimension_numbers<[1], [0], [0], [1], [0, 0, 1, 1], [], []>} : vector<1x8xbf16>, vector<8x32xbf16>, vector<1x32xf32> -> vector<1x32xf32>
    %c0_65 = arith.constant 0 : index
    %c0_66 = arith.constant 0 : index
    %119 = vector.load %arg19[%c0_65, %c0_66] : memref<1x32xf32, #tpu.memory_space<vmem>>, vector<1x32xf32>
    %120 = arith.addf %118, %119 : vector<1x32xf32>
    %c0_67 = arith.constant 0 : index
    %c0_68 = arith.constant 0 : index
    %121 = vector.load %arg17[%c0_67, %c0_68] : memref<8x32xbf16, #tpu.memory_space<vmem>>, vector<8x32xbf16>
    %cst_69 = arith.constant dense<0.000000e+00> : vector<1x32xf32>
    %122 = tpu.matmul %112, %121, %cst_69 {dimension_numbers = #tpu.dot_dimension_numbers<[1], [0], [0], [1], [0, 0, 1, 1], [], []>} : vector<1x8xbf16>, vector<8x32xbf16>, vector<1x32xf32> -> vector<1x32xf32>
    %c0_70 = arith.constant 0 : index
    %c0_71 = arith.constant 0 : index
    %123 = vector.load %arg20[%c0_70, %c0_71] : memref<1x32xf32, #tpu.memory_space<vmem>>, vector<1x32xf32>
    %124 = arith.addf %122, %123 : vector<1x32xf32>
    %125 = arith.maximumf %116, %120 : vector<1x32xf32>
    %126 = arith.maximumf %125, %124 : vector<1x32xf32>
    %127 = arith.subf %116, %126 : vector<1x32xf32>
    %128 = math.exp %127 : vector<1x32xf32>
    %129 = arith.subf %120, %126 : vector<1x32xf32>
    %130 = math.exp %129 : vector<1x32xf32>
    %131 = arith.subf %124, %126 : vector<1x32xf32>
    %132 = math.exp %131 : vector<1x32xf32>
    %133 = arith.addf %128, %130 : vector<1x32xf32>
    %134 = arith.addf %133, %132 : vector<1x32xf32>
    %135 = tpu.reciprocal %134 {approx = true} : vector<1x32xf32> -> vector<1x32xf32>
    %136 = arith.mulf %128, %135 : vector<1x32xf32>
    %137 = arith.mulf %130, %135 : vector<1x32xf32>
    %138 = arith.mulf %132, %135 : vector<1x32xf32>
    %139 = arith.truncf %136 : vector<1x32xf32> to vector<1x32xbf16>
    %140 = arith.truncf %137 : vector<1x32xf32> to vector<1x32xbf16>
    %141 = arith.truncf %138 : vector<1x32xf32> to vector<1x32xbf16>
    %c0_72 = arith.constant 0 : index
    %c0_73 = arith.constant 0 : index
    %142 = vector.load %arg4[%c0_72, %c0_73] : memref<32x32xbf16, #tpu.memory_space<vmem>>, vector<32x32xbf16>
    %143 = vector.broadcast %139 : vector<1x32xbf16> to vector<32x32xbf16>
    %144 = arith.mulf %142, %143 : vector<32x32xbf16>
    %c0_74 = arith.constant 0 : index
    %c0_75 = arith.constant 0 : index
    %145 = vector.load %arg5[%c0_74, %c0_75] : memref<32x32xbf16, #tpu.memory_space<vmem>>, vector<32x32xbf16>
    %146 = vector.broadcast %139 : vector<1x32xbf16> to vector<32x32xbf16>
    %147 = arith.mulf %145, %146 : vector<32x32xbf16>
    %c0_76 = arith.constant 0 : index
    %c0_77 = arith.constant 0 : index
    %148 = vector.load %arg8[%c0_76, %c0_77] : memref<32x32xbf16, #tpu.memory_space<vmem>>, vector<32x32xbf16>
    %149 = vector.broadcast %140 : vector<1x32xbf16> to vector<32x32xbf16>
    %150 = arith.mulf %148, %149 : vector<32x32xbf16>
    %c0_78 = arith.constant 0 : index
    %c0_79 = arith.constant 0 : index
    %151 = vector.load %arg9[%c0_78, %c0_79] : memref<32x32xbf16, #tpu.memory_space<vmem>>, vector<32x32xbf16>
    %152 = vector.broadcast %140 : vector<1x32xbf16> to vector<32x32xbf16>
    %153 = arith.mulf %151, %152 : vector<32x32xbf16>
    %c0_80 = arith.constant 0 : index
    %c0_81 = arith.constant 0 : index
    %154 = vector.load %arg6[%c0_80, %c0_81] : memref<32x32xbf16, #tpu.memory_space<vmem>>, vector<32x32xbf16>
    %155 = vector.broadcast %139 : vector<1x32xbf16> to vector<32x32xbf16>
    %156 = arith.mulf %154, %155 : vector<32x32xbf16>
    %c0_82 = arith.constant 0 : index
    %c0_83 = arith.constant 0 : index
    %157 = vector.load %arg10[%c0_82, %c0_83] : memref<32x32xbf16, #tpu.memory_space<vmem>>, vector<32x32xbf16>
    %158 = vector.broadcast %140 : vector<1x32xbf16> to vector<32x32xbf16>
    %159 = arith.mulf %157, %158 : vector<32x32xbf16>
    %160 = arith.addf %156, %159 : vector<32x32xbf16>
    %c0_84 = arith.constant 0 : index
    %c0_85 = arith.constant 0 : index
    %161 = vector.load %arg12[%c0_84, %c0_85] : memref<32x32xbf16, #tpu.memory_space<vmem>>, vector<32x32xbf16>
    %162 = vector.broadcast %141 : vector<1x32xbf16> to vector<32x32xbf16>
    %163 = arith.mulf %161, %162 : vector<32x32xbf16>
    %164 = arith.addf %160, %163 : vector<32x32xbf16>
    %cst_86 = arith.constant dense<0.000000e+00> : vector<256x32xf32>
    %165 = tpu.matmul %61, %144, %cst_86 {dimension_numbers = #tpu.dot_dimension_numbers<[1], [0], [0], [1], [0, 0, 1, 1], [], []>} : vector<256x32xbf16>, vector<32x32xbf16>, vector<256x32xf32> -> vector<256x32xf32>
    %cst_87 = arith.constant dense<0.000000e+00> : vector<256x32xf32>
    %166 = tpu.matmul %62, %147, %cst_87 {dimension_numbers = #tpu.dot_dimension_numbers<[1], [0], [0], [1], [0, 0, 1, 1], [], []>} : vector<256x32xbf16>, vector<32x32xbf16>, vector<256x32xf32> -> vector<256x32xf32>
    %167 = arith.addf %165, %166 : vector<256x32xf32>
    %cst_88 = arith.constant dense<0.000000e+00> : vector<256x32xf32>
    %168 = tpu.matmul %63, %150, %cst_88 {dimension_numbers = #tpu.dot_dimension_numbers<[1], [0], [0], [1], [0, 0, 1, 1], [], []>} : vector<256x32xbf16>, vector<32x32xbf16>, vector<256x32xf32> -> vector<256x32xf32>
    %169 = arith.addf %167, %168 : vector<256x32xf32>
    %cst_89 = arith.constant dense<0.000000e+00> : vector<256x32xf32>
    %170 = tpu.matmul %64, %153, %cst_89 {dimension_numbers = #tpu.dot_dimension_numbers<[1], [0], [0], [1], [0, 0, 1, 1], [], []>} : vector<256x32xbf16>, vector<32x32xbf16>, vector<256x32xf32> -> vector<256x32xf32>
    %171 = arith.addf %169, %170 : vector<256x32xf32>
    %cst_90 = arith.constant dense<0.000000e+00> : vector<256x32xf32>
    %172 = tpu.matmul %60, %164, %cst_90 {dimension_numbers = #tpu.dot_dimension_numbers<[1], [0], [0], [1], [0, 0, 1, 1], [], []>} : vector<256x32xbf16>, vector<32x32xbf16>, vector<256x32xf32> -> vector<256x32xf32>
    %173 = arith.addf %171, %172 : vector<256x32xf32>
    %c0_91 = arith.constant 0 : index
    %c0_92 = arith.constant 0 : index
    %174 = vector.load %arg7[%c0_91, %c0_92] : memref<1x32xf32, #tpu.memory_space<vmem>>, vector<1x32xf32>
    %175 = arith.mulf %174, %136 : vector<1x32xf32>
    %176 = vector.broadcast %175 : vector<1x32xf32> to vector<256x32xf32>
    %177 = arith.addf %173, %176 : vector<256x32xf32>
    %c0_93 = arith.constant 0 : index
    %c0_94 = arith.constant 0 : index
    %178 = vector.load %arg11[%c0_93, %c0_94] : memref<1x32xf32, #tpu.memory_space<vmem>>, vector<1x32xf32>
    %179 = arith.mulf %178, %137 : vector<1x32xf32>
    %180 = vector.broadcast %179 : vector<1x32xf32> to vector<256x32xf32>
    %181 = arith.addf %177, %180 : vector<256x32xf32>
    %182 = arith.truncf %181 : vector<256x32xf32> to vector<256x32xbf16>
    %c0_95 = arith.constant 0 : index
    %c0_96 = arith.constant 0 : index
    %183 = vector.load %arg21[%c0_95, %c0_96] : memref<32x32xbf16, #tpu.memory_space<vmem>>, vector<32x32xbf16>
    %cst_97 = arith.constant dense<0.000000e+00> : vector<256x32xf32>
    %184 = tpu.matmul %182, %183, %cst_97 {dimension_numbers = #tpu.dot_dimension_numbers<[1], [0], [0], [1], [0, 0, 1, 1], [], []>} : vector<256x32xbf16>, vector<32x32xbf16>, vector<256x32xf32> -> vector<256x32xf32>
    %c0_98 = arith.constant 0 : index
    %c0_99 = arith.constant 0 : index
    %185 = vector.load %arg22[%c0_98, %c0_99] : memref<1x32xf32, #tpu.memory_space<vmem>>, vector<1x32xf32>
    %186 = vector.broadcast %185 : vector<1x32xf32> to vector<256x32xf32>
    %187 = arith.addf %184, %186 : vector<256x32xf32>
    %cst_100 = arith.constant 1.000000e+00 : f32
    %188 = vector.broadcast %cst_100 : f32 to vector<256x32xf32>
    %189 = arith.mulf %187, %188 : vector<256x32xf32>
    %190 = arith.addf %2, %189 : vector<256x32xf32>
    %cst_101 = arith.constant dense<0.000000e+00> : vector<256xf32>
    %191 = vector.multi_reduction <add>, %190, %cst_101 [1] : vector<256x32xf32> to vector<256xf32>
    %192 = vector.shape_cast %191 : vector<256xf32> to vector<256x1xf32>
    %cst_102 = arith.constant 3.125000e-02 : f32
    %193 = vector.broadcast %cst_102 : f32 to vector<256x1xf32>
    %194 = arith.mulf %192, %193 : vector<256x1xf32>
    %195 = vector.broadcast %194 : vector<256x1xf32> to vector<256x32xf32>
    %196 = arith.subf %190, %195 : vector<256x32xf32>
    %197 = arith.mulf %196, %196 : vector<256x32xf32>
    %cst_103 = arith.constant dense<0.000000e+00> : vector<256xf32>
    %198 = vector.multi_reduction <add>, %197, %cst_103 [1] : vector<256x32xf32> to vector<256xf32>
    %199 = vector.shape_cast %198 : vector<256xf32> to vector<256x1xf32>
    %cst_104 = arith.constant 3.125000e-02 : f32
    %200 = vector.broadcast %cst_104 : f32 to vector<256x1xf32>
    %201 = arith.mulf %199, %200 : vector<256x1xf32>
    %cst_105 = arith.constant 9.99999974E-6 : f32
    %202 = vector.broadcast %cst_105 : f32 to vector<256x1xf32>
    %203 = arith.addf %201, %202 : vector<256x1xf32>
    %204 = math.rsqrt %203 : vector<256x1xf32>
    %205 = vector.broadcast %204 : vector<256x1xf32> to vector<256x32xf32>
    %206 = arith.mulf %196, %205 : vector<256x32xf32>
    %c0_106 = arith.constant 0 : index
    %c0_107 = arith.constant 0 : index
    %207 = vector.load %arg23[%c0_106, %c0_107] : memref<1x32xf32, #tpu.memory_space<vmem>>, vector<1x32xf32>
    %208 = vector.broadcast %207 : vector<1x32xf32> to vector<256x32xf32>
    %209 = arith.mulf %206, %208 : vector<256x32xf32>
    %c0_108 = arith.constant 0 : index
    %c0_109 = arith.constant 0 : index
    %210 = vector.load %arg24[%c0_108, %c0_109] : memref<1x32xf32, #tpu.memory_space<vmem>>, vector<1x32xf32>
    %211 = vector.broadcast %210 : vector<1x32xf32> to vector<256x32xf32>
    %212 = arith.addf %209, %211 : vector<256x32xf32>
    %213 = arith.truncf %212 : vector<256x32xf32> to vector<256x32xbf16>
    %c0_110 = arith.constant 0 : index
    %c0_111 = arith.constant 0 : index
    %214 = vector.load %arg25[%c0_110, %c0_111] : memref<32x128xbf16, #tpu.memory_space<vmem>>, vector<32x128xbf16>
    %cst_112 = arith.constant dense<0.000000e+00> : vector<256x128xf32>
    %215 = tpu.matmul %213, %214, %cst_112 {dimension_numbers = #tpu.dot_dimension_numbers<[1], [0], [0], [1], [0, 0, 1, 1], [], []>} : vector<256x32xbf16>, vector<32x128xbf16>, vector<256x128xf32> -> vector<256x128xf32>
    %c0_113 = arith.constant 0 : index
    %c0_114 = arith.constant 0 : index
    %216 = vector.load %arg26[%c0_113, %c0_114] : memref<1x128xf32, #tpu.memory_space<vmem>>, vector<1x128xf32>
    %217 = vector.broadcast %216 : vector<1x128xf32> to vector<256x128xf32>
    %218 = arith.addf %215, %217 : vector<256x128xf32>
    %219 = arith.mulf %218, %218 : vector<256x128xf32>
    %220 = arith.mulf %218, %219 : vector<256x128xf32>
    %cst_115 = arith.constant 4.471500e-02 : f32
    %221 = vector.broadcast %cst_115 : f32 to vector<256x128xf32>
    %222 = arith.mulf %221, %220 : vector<256x128xf32>
    %223 = arith.addf %218, %222 : vector<256x128xf32>
    %cst_116 = arith.constant 0.797884583 : f32
    %224 = vector.broadcast %cst_116 : f32 to vector<256x128xf32>
    %225 = arith.mulf %224, %223 : vector<256x128xf32>
    %226 = math.tanh %225 : vector<256x128xf32>
    %cst_117 = arith.constant 1.000000e+00 : f32
    %227 = vector.broadcast %cst_117 : f32 to vector<256x128xf32>
    %228 = arith.addf %227, %226 : vector<256x128xf32>
    %cst_118 = arith.constant 5.000000e-01 : f32
    %229 = vector.broadcast %cst_118 : f32 to vector<256x128xf32>
    %230 = arith.mulf %229, %228 : vector<256x128xf32>
    %231 = arith.mulf %218, %230 : vector<256x128xf32>
    %232 = arith.truncf %231 : vector<256x128xf32> to vector<256x128xbf16>
    %c0_119 = arith.constant 0 : index
    %c0_120 = arith.constant 0 : index
    %233 = vector.load %arg27[%c0_119, %c0_120] : memref<128x32xbf16, #tpu.memory_space<vmem>>, vector<128x32xbf16>
    %cst_121 = arith.constant dense<0.000000e+00> : vector<256x32xf32>
    %234 = tpu.matmul %232, %233, %cst_121 {dimension_numbers = #tpu.dot_dimension_numbers<[1], [0], [0], [1], [0, 0, 1, 1], [], []>} : vector<256x128xbf16>, vector<128x32xbf16>, vector<256x32xf32> -> vector<256x32xf32>
    %c0_122 = arith.constant 0 : index
    %c0_123 = arith.constant 0 : index
    %235 = vector.load %arg28[%c0_122, %c0_123] : memref<1x32xf32, #tpu.memory_space<vmem>>, vector<1x32xf32>
    %236 = vector.broadcast %235 : vector<1x32xf32> to vector<256x32xf32>
    %237 = arith.addf %234, %236 : vector<256x32xf32>
    %cst_124 = arith.constant 1.000000e+00 : f32
    %238 = vector.broadcast %cst_124 : f32 to vector<256x32xf32>
    %239 = arith.mulf %237, %238 : vector<256x32xf32>
    %240 = arith.addf %190, %239 : vector<256x32xf32>
    %241 = vector.shape_cast %240 : vector<256x32xf32> to vector<16x16x32xf32>
    %c0_125 = arith.constant 0 : index
    %c0_126 = arith.constant 0 : index
    %c0_127 = arith.constant 0 : index
    %c0_128 = arith.constant 0 : index
    %242 = vector.load %arg29[%c0_125, %c0_126, %c0_127, %c0_128] : memref<1x16x16x32xf32, #tpu.memory_space<vmem>>, vector<1x16x16x32xf32>
    %243 = vector.shape_cast %242 : vector<1x16x16x32xf32> to vector<16x16x32xf32>
    %244 = vector.shape_cast %241 : vector<16x16x32xf32> to vector<1x16x16x32xf32>
    tpu.vector_store %arg29[%c0_125, %c0_126, %c0_127, %c0_128], %244 {strides = array<i32>} : memref<1x16x16x32xf32, #tpu.memory_space<vmem>>, vector<1x16x16x32xf32>,
    return
  }
  func.func @transform_0(%arg0: i32) -> (i32, i32, i32, i32) {
    %c0_i32 = arith.constant 0 : i32
    %c0_i32_0 = arith.constant 0 : i32
    %c0_i32_1 = arith.constant 0 : i32
    %c0_i32_2 = arith.constant 0 : i32
    return %arg0, %c0_i32, %c0_i32_0, %c0_i32_1 : i32, i32, i32, i32
  }
  func.func @transform_1(%arg0: i32) -> (i32, i32) {
    %c0_i32 = arith.constant 0 : i32
    %c0_i32_0 = arith.constant 0 : i32
    %c0_i32_1 = arith.constant 0 : i32
    return %c0_i32, %c0_i32_0 : i32, i32
  }
  func.func @transform_2(%arg0: i32) -> (i32, i32) {
    %c0_i32 = arith.constant 0 : i32
    %c0_i32_0 = arith.constant 0 : i32
    %c0_i32_1 = arith.constant 0 : i32
    return %c0_i32, %c0_i32_0 : i32, i32
  }
  func.func @transform_3(%arg0: i32) -> (i32, i32) {
    %c0_i32 = arith.constant 0 : i32
    %c0_i32_0 = arith.constant 0 : i32
    %c0_i32_1 = arith.constant 0 : i32
    return %c0_i32, %c0_i32_0 : i32, i32
  }
  func.func @transform_4(%arg0: i32) -> (i32, i32) {
    %c0_i32 = arith.constant 0 : i32
    %c0_i32_0 = arith.constant 0 : i32
    %c0_i32_1 = arith.constant 0 : i32
    return %c0_i32, %c0_i32_0 : i32, i32
  }
  func.func @transform_5(%arg0: i32) -> (i32, i32) {
    %c0_i32 = arith.constant 0 : i32
    %c0_i32_0 = arith.constant 0 : i32
    %c0_i32_1 = arith.constant 0 : i32
    return %c0_i32, %c0_i32_0 : i32, i32
  }
  func.func @transform_6(%arg0: i32) -> (i32, i32) {
    %c0_i32 = arith.constant 0 : i32
    %c0_i32_0 = arith.constant 0 : i32
    %c0_i32_1 = arith.constant 0 : i32
    return %c0_i32, %c0_i32_0 : i32, i32
  }
  func.func @transform_7(%arg0: i32) -> (i32, i32) {
    %c0_i32 = arith.constant 0 : i32
    %c0_i32_0 = arith.constant 0 : i32
    %c0_i32_1 = arith.constant 0 : i32
    return %c0_i32, %c0_i32_0 : i32, i32
  }
  func.func @transform_8(%arg0: i32) -> (i32, i32) {
    %c0_i32 = arith.constant 0 : i32
    %c0_i32_0 = arith.constant 0 : i32
    %c0_i32_1 = arith.constant 0 : i32
    return %c0_i32, %c0_i32_0 : i32, i32
  }
  func.func @transform_9(%arg0: i32) -> (i32, i32) {
    %c0_i32 = arith.constant 0 : i32
    %c0_i32_0 = arith.constant 0 : i32
    %c0_i32_1 = arith.constant 0 : i32
    return %c0_i32, %c0_i32_0 : i32, i32
  }
  func.func @transform_10(%arg0: i32) -> (i32, i32) {
    %c0_i32 = arith.constant 0 : i32
    %c0_i32_0 = arith.constant 0 : i32
    %c0_i32_1 = arith.constant 0 : i32
    return %c0_i32, %c0_i32_0 : i32, i32
  }
  func.func @transform_11(%arg0: i32) -> (i32, i32) {
    %c0_i32 = arith.constant 0 : i32
    %c0_i32_0 = arith.constant 0 : i32
    %c0_i32_1 = arith.constant 0 : i32
    return %c0_i32, %c0_i32_0 : i32, i32
  }
  func.func @transform_12(%arg0: i32) -> (i32, i32) {
    %c0_i32 = arith.constant 0 : i32
    %c0_i32_0 = arith.constant 0 : i32
    %c0_i32_1 = arith.constant 0 : i32
    return %c0_i32, %c0_i32_0 : i32, i32
  }
  func.func @transform_13(%arg0: i32) -> (i32, i32) {
    %c0_i32 = arith.constant 0 : i32
    %c0_i32_0 = arith.constant 0 : i32
    %c0_i32_1 = arith.constant 0 : i32
    return %c0_i32, %c0_i32_0 : i32, i32
  }
  func.func @transform_14(%arg0: i32) -> (i32, i32) {
    %c0_i32 = arith.constant 0 : i32
    %c0_i32_0 = arith.constant 0 : i32
    %c0_i32_1 = arith.constant 0 : i32
    return %c0_i32, %c0_i32_0 : i32, i32
  }
  func.func @transform_15(%arg0: i32) -> (i32, i32) {
    %c0_i32 = arith.constant 0 : i32
    %c0_i32_0 = arith.constant 0 : i32
    %c0_i32_1 = arith.constant 0 : i32
    return %c0_i32, %c0_i32_0 : i32, i32
  }
  func.func @transform_16(%arg0: i32) -> (i32, i32) {
    %c0_i32 = arith.constant 0 : i32
    %c0_i32_0 = arith.constant 0 : i32
    %c0_i32_1 = arith.constant 0 : i32
    return %c0_i32, %c0_i32_0 : i32, i32
  }
  func.func @transform_17(%arg0: i32) -> (i32, i32) {
    %c0_i32 = arith.constant 0 : i32
    %c0_i32_0 = arith.constant 0 : i32
    %c0_i32_1 = arith.constant 0 : i32
    return %c0_i32, %c0_i32_0 : i32, i32
  }
  func.func @transform_18(%arg0: i32) -> (i32, i32) {
    %c0_i32 = arith.constant 0 : i32
    %c0_i32_0 = arith.constant 0 : i32
    %c0_i32_1 = arith.constant 0 : i32
    return %c0_i32, %c0_i32_0 : i32, i32
  }
  func.func @transform_19(%arg0: i32) -> (i32, i32) {
    %c0_i32 = arith.constant 0 : i32
    %c0_i32_0 = arith.constant 0 : i32
    %c0_i32_1 = arith.constant 0 : i32
    return %c0_i32, %c0_i32_0 : i32, i32
  }
  func.func @transform_20(%arg0: i32) -> (i32, i32) {
    %c0_i32 = arith.constant 0 : i32
    %c0_i32_0 = arith.constant 0 : i32
    %c0_i32_1 = arith.constant 0 : i32
    return %c0_i32, %c0_i32_0 : i32, i32
  }
  func.func @transform_21(%arg0: i32) -> (i32, i32) {
    %c0_i32 = arith.constant 0 : i32
    %c0_i32_0 = arith.constant 0 : i32
    %c0_i32_1 = arith.constant 0 : i32
    return %c0_i32, %c0_i32_0 : i32, i32
  }
  func.func @transform_22(%arg0: i32) -> (i32, i32) {
    %c0_i32 = arith.constant 0 : i32
    %c0_i32_0 = arith.constant 0 : i32
    %c0_i32_1 = arith.constant 0 : i32
    return %c0_i32, %c0_i32_0 : i32, i32
  }
  func.func @transform_23(%arg0: i32) -> (i32, i32) {
    %c0_i32 = arith.constant 0 : i32
    %c0_i32_0 = arith.constant 0 : i32
    %c0_i32_1 = arith.constant 0 : i32
    return %c0_i32, %c0_i32_0 : i32, i32
  }
  func.func @transform_24(%arg0: i32) -> (i32, i32) {
    %c0_i32 = arith.constant 0 : i32
    %c0_i32_0 = arith.constant 0 : i32
    %c0_i32_1 = arith.constant 0 : i32
    return %c0_i32, %c0_i32_0 : i32, i32
  }
  func.func @transform_25(%arg0: i32) -> (i32, i32) {
    %c0_i32 = arith.constant 0 : i32
    %c0_i32_0 = arith.constant 0 : i32
    %c0_i32_1 = arith.constant 0 : i32
    return %c0_i32, %c0_i32_0 : i32, i32
  }
  func.func @transform_26(%arg0: i32) -> (i32, i32) {
    %c0_i32 = arith.constant 0 : i32
    %c0_i32_0 = arith.constant 0 : i32
    %c0_i32_1 = arith.constant 0 : i32
    return %c0_i32, %c0_i32_0 : i32, i32
  }
  func.func @transform_27(%arg0: i32) -> (i32, i32) {
    %c0_i32 = arith.constant 0 : i32
    %c0_i32_0 = arith.constant 0 : i32
    %c0_i32_1 = arith.constant 0 : i32
    return %c0_i32, %c0_i32_0 : i32, i32
  }
  func.func @transform_28(%arg0: i32) -> (i32, i32, i32, i32) {
    %c0_i32 = arith.constant 0 : i32
    %c0_i32_0 = arith.constant 0 : i32
    %c0_i32_1 = arith.constant 0 : i32
    %c0_i32_2 = arith.constant 0 : i32
    return %arg0, %c0_i32, %c0_i32_0, %c0_i32_1 : i32, i32, i32, i32
  }
}

</mosaic_0001>

<bundles_post_ra>
// kernel: tpu_custom_call.1
= control target key start
LH: loop header
LB: loop body
LE: loop exit
PB: predicated region body
PF: predicated region fallthrough
CT: control target
= control target key end

     0   :  { %s10622_s0 = inlined_call_operand.hbm [shape: f32[2,16,16,32], index: 0, kind: input, shape index: {}]   ;;  %s10623_s1 = inlined_call_operand.hbm [shape: f32[1,32], index: 1, kind: input, shape index: {}]   ;;  %s10624_s2 = inlined_call_operand.hbm [shape: f32[1,32], index: 2, kind: input, shape index: {}]   ;;  %s10625_s3 = inlined_call_operand.vmem [shape: bf16[32,32], index: 3, kind: input, shape index: {}]   ;;  %s10626_s4 = inlined_call_operand.vmem [shape: bf16[32,32], index: 4, kind: input, shape index: {}]   ;;  %s10627_s5 = inlined_call_operand.vmem [shape: bf16[32,32], index: 5, kind: input, shape index: {}]   ;;  %s10628_s6 = inlined_call_operand.hbm [shape: f32[1,32], index: 6, kind: input, shape index: {}]   ;;  %s10629_s7 = inlined_call_operand.vmem [shape: bf16[32,32], index: 7, kind: input, shape index: {}]   ;;  %s10630_s8 = inlined_call_operand.vmem [shape: bf16[32,32], index: 8, kind: input, shape index: {}]   ;;  %s10631_s9 = inlined_call_operand.vmem [shape: bf16[32,32], index: 9, kind: input, shape index: {}]   ;;  %s10632_s10 = inlined_call_operand.hbm [shape: f32[1,32], index: 10, kind: input, shape index: {}]   ;;  %s10633_s11 = inlined_call_operand.vmem [shape: bf16[32,32], index: 11, kind: input, shape index: {}]   ;;  %s10634_s12 = inlined_call_operand.vmem [shape: bf16[32,8], index: 12, kind: input, shape index: {}]   ;;  %s10635_s13 = inlined_call_operand.hbm [shape: f32[1,8], index: 13, kind: input, shape index: {}]   ;;  %s10636_s14 = inlined_call_operand.hbm [shape: bf16[8,32], index: 14, kind: input, shape index: {}]   ;;  %s10637_s15 = inlined_call_operand.hbm [shape: bf16[8,32], index: 15, kind: input, shape index: {}]   ;;  %s10638_s16 = inlined_call_operand.hbm [shape: bf16[8,32], index: 16, kind: input, shape index: {}]   ;;  %s10639_s17 = inlined_call_operand.vmem [shape: f32[1,32], index: 17, kind: input, shape index: {}]   ;;  %s10640_s18 = inlined_call_operand.vmem [shape: f32[1,32], index: 18, kind: input, shape index: {}]   ;;  %s10641_s19 = inlined_call_operand.vmem [shape: f32[1,32], index: 19, kind: input, shape index: {}]   ;;  %s10642_s20 = inlined_call_operand.vmem [shape: bf16[32,32], index: 20, kind: input, shape index: {}]   ;;  %s10643_s21 = inlined_call_operand.vmem [shape: f32[1,32], index: 21, kind: input, shape index: {}]   ;;  %s10644_s22 = inlined_call_operand.vmem [shape: f32[1,32], index: 22, kind: input, shape index: {}]   ;;  %s10645_s23 = inlined_call_operand.vmem [shape: f32[1,32], index: 23, kind: input, shape index: {}]   ;;  %s10646_s24 = inlined_call_operand.vmem [shape: bf16[32,128], index: 24, kind: input, shape index: {}]   ;;  %s10647_s25 = inlined_call_operand.vmem [shape: f32[1,128], index: 25, kind: input, shape index: {}]   ;;  %s10648_s26 = inlined_call_operand.vmem [shape: bf16[128,32], index: 26, kind: input, shape index: {}]   ;;  %s10649_s27 = inlined_call_operand.vmem [shape: f32[1,32], index: 27, kind: input, shape index: {}]   ;;  %s10650_s28 = inlined_call_operand.hbm [shape: f32[2,16,16,32], index: 28, kind: output, shape index: {}]  }
   0x1   :  { %10776 = sst [smem:[#allocation94_spill]] %s10622_s0 }
   0x2   :  { %10777 = sst [smem:[#allocation95_spill]] %s10623_s1 }
   0x3   :  { %10778 = sst [smem:[#allocation96_spill]] %s10624_s2 }
   0x4   :  { %10779 = sst [smem:[#allocation97_spill]] %s10625_s3 }
   0x5   :  { %10780 = sst [smem:[#allocation98_spill]] %s10626_s4 }
   0x6   :  { %10781 = sst [smem:[#allocation99_spill]] %s10627_s5 }
   0x7   :  { %10782 = sst [smem:[#allocation100_spill]] %s10628_s6 }
   0x8   :  { %10783 = sst [smem:[#allocation101_spill]] %s10629_s7 }
   0x9   :  { %10784 = sst [smem:[#allocation102_spill]] %s10630_s8 }
   0xa   :  { %10785 = sst [smem:[#allocation103_spill]] %s10631_s9 }
   0xb   :  { %10786 = sst [smem:[#allocation104_spill]] %s10632_s10 }
   0xc   :  { %10787 = sst [smem:[#allocation105_spill]] %s10633_s11 }
   0xd   :  { %10788 = sst [smem:[#allocation106_spill]] %s10634_s12 }
   0xe   :  { %10789 = sst [smem:[#allocation107_spill]] %s10635_s13 }
   0xf   :  { %10790 = sst [smem:[#allocation108_spill]] %s10636_s14 }
  0x10   :  { %10791 = sst [smem:[#allocation109_spill]] %s10637_s15 }
  0x11   :  { %10792 = sst [smem:[#allocation110_spill]] %s10638_s16 }
  0x12   :  { %10793 = sst [smem:[#allocation111_spill]] %s10639_s17 }
  0x13   :  { %10794 = sst [smem:[#allocation112_spill]] %s10643_s21 }
  0x14   :  { %10795 = sst [smem:[#allocation113_spill]] %s10644_s22 }
  0x15   :  { %10796 = sst [smem:[#allocation114_spill]] %s10645_s23 }
  0x16   :  { %10797 = sst [smem:[#allocation115_spill]] %s10646_s24 }
  0x17   :  { %10798 = sst [smem:[#allocation116_spill]] %s10647_s25 }
  0x18   :  { %10799 = sst [smem:[#allocation117_spill]] %s10648_s26 }
  0x19   :  { %10800 = sst [smem:[#allocation118_spill]] %s10649_s27 }
  0x1a   :  { %10801 = sst [smem:[#allocation119_spill]] %s10650_s28 }
  0x1b   :  { %33 = vsyncpa [#allocation3], 0 }
  0x1c   :  { %35 = vsyncpa [#allocation3 + $0x1], 0 }
  0x1d   :  { %36 = vsyncpa [#allocation6], 0 }
  0x1e   :  { %37 = vsyncpa [#allocation9], 0 }
  0x1f   :  { %38 = vsyncpa [#allocation12], 0 }
  0x20   :  { %39 = vsyncpa [#allocation15], 0 }
  0x21   :  { %40 = vsyncpa [#allocation4], 0 }
  0x22   :  { %42 = vsyncpa [#allocation4 + $0x1], 0  ;;  %s7541_s8 = smov 0   ;;  %s7543_s5 = smov 0  }
  0x23   :  { %s7545_s9 = smov 0   ;;  %s7547_s30 = smov 0  }
  0x24 LB: > { %s7379_s3 = smov [#allocation5]   ;;  %s7562_s10 = sadd.s32 4294967295, %s7377_s30   ;;  %s7377_s30 = sphi %s7547_s30, %s11062_s30   ;;  %s7373_s9 = sphi %s7545_s9, %s11061_s9   ;;  %s7369_s5 = sphi %s7543_s5, %s11060_s5   ;;  %s7365_s8 = sphi %s7541_s8, %s11059_s8  }
  0x25   : > { %s685_s6 = sshll.u32 %s7379_s3, 4  ;;  %p5745_p0 = scmp.ge.s32.totalorder %s7377_s30, 1  ;;  %s7567_s6 = int_to_ptr.vmem [resolvable:$true] %s685_s6 }
  0x26   : > { %p10667_p1 = scmp.eq.s32.totalorder %s7562_s10, 0  ;;  %p672_p2 = scmp.lt.s32.totalorder %s7377_s30, 3 }
  0x27   : > { %s7380_s11 = smov [#allocation8]   ;;  %s7381_s2 = smov [#allocation11]  }
  0x28   : > { %p7569_p3 = pnand %p5745_p0, %p672_p2  ;;  %s716_s29 = sshll.u32 %s7380_s11, 4  ;;  %s7576_s29 = int_to_ptr.vmem [resolvable:$true] %s716_s29 }
  0x29   : > { %s753_s7 = sshll.u32 %s7381_s2, 4  ;;  %s7382_s1 = smov [#allocation14]   ;;  %s7584_s7 = int_to_ptr.vmem [resolvable:$true] %s753_s7 }
  0x2a   : > { %s10802_s0 = scalar_select %p7569_p3, 1, 0 }
  0x2b   : > { %p6671_p5 = pneg %p7569_p3  ;;  %s7586_s4 = sshll.u32 %s7382_s1, 4  ;;  %s776_s4 = int_to_ptr.vmem [resolvable:$true] %s7586_s4 }
  0x2c   : > { %s10804_s27 = sld [smem:[#allocation95_spill]] }
  0x2d   : > { %p7580_p6 = pnand %p6671_p5, %p10667_p1 }
  0x2f   : > { %p7596_p8 = pneg %p7580_p6 }
  0x32   : > { %s7041_s25 = scalar_lea.hbm %s10804_s27, 16 }
  0x33   : > { %p7042_p7 = scmp.ne.s32.totalorder %s10804_s27, %s7041_s25  ;;  %p7048_p11 = scmp.lt.u32.totalorder %s7041_s25, %s10804_s27 }
  0x35   : > { %p7044_p9 = pnand %p7596_p8, %p7042_p7 }
  0x37   : > { %p7045_p10 = pneg %p7044_p9 }
  0x39   : > { %p7050_p12 = pnand %p7048_p11, %p7045_p10 }
  0x3b   : > { %7053 = shalt.err (!%p7050_p12)
}
  0x3c   : > { %s7054_s23 = scalar_lea.vmem %s7567_s6, 16  ;;  %s7061_s28 = scalar_lea.vmem %s7567_s6, 32 }
  0x3d   : > { %p7055_p13 = scmp.ne.s32.totalorder %s7567_s6, %s7054_s23  ;;  %p7062_p5 = scmp.lt.s32.totalorder %s7567_s6, %s7567_s6 }
  0x3e   : > { %p7063_p7 = scmp.lt.s32.totalorder %s7061_s28, %s7054_s23 }
  0x3f   : > { %p7057_p0 = pnand %p7055_p13, %p7596_p8 }
  0x40   : > { %p7064_p9 = por %p7063_p7, %p7062_p5 }
  0x41   : > { %p7058_p2 = pneg %p7057_p0 }
  0x43   : > { %p7065_p4 = pnand %p7064_p9, %p7058_p2 }
  0x45   : > { %7068 = shalt.err (!%p7065_p4)
}
  0x46   : > { %6674 = dma.hbm_to_vmem [thread:$0]  (!%p7580_p6), %s10804_s27, 16, %s7567_s6, [#allocation6]  }
  0x47   : > { %s10806_s1 = sld [smem:[#allocation100_spill]] }
  0x4d   : > { %s7069_s26 = scalar_lea.hbm %s10806_s1, 16 }
  0x4e   : > { %p7070_p10 = scmp.ne.s32.totalorder %s10806_s1, %s7069_s26  ;;  %p7076_p4 = scmp.lt.u32.totalorder %s7069_s26, %s10806_s1 }
  0x50   : > { %p7072_p11 = pnand %p7070_p10, %p7596_p8 }
  0x52   : > { %p7073_p12 = pneg %p7072_p11 }
  0x54   : > { %p7078_p13 = pnand %p7076_p4, %p7073_p12 }
  0x56   : > { %7081 = shalt.err (!%p7078_p13)
}
  0x57   : > { %s7082_s6 = scalar_lea.vmem %s7576_s29, 16  ;;  %s7089_s21 = scalar_lea.vmem %s7576_s29, 32 }
  0x58   : > { %p7083_p0 = scmp.ne.s32.totalorder %s7576_s29, %s7082_s6  ;;  %p7090_p7 = scmp.lt.s32.totalorder %s7576_s29, %s7576_s29 }
  0x59   : > { %p7091_p9 = scmp.lt.s32.totalorder %s7089_s21, %s7082_s6 }
  0x5a   : > { %p7085_p2 = pnand %p7083_p0, %p7596_p8 }
  0x5b   : > { %p7092_p10 = por %p7091_p9, %p7090_p7 }
  0x5c   : > { %p7086_p5 = pneg %p7085_p2 }
  0x5e   : > { %p7093_p11 = pnand %p7092_p10, %p7086_p5 }
  0x60   : > { %7096 = shalt.err (!%p7093_p11)
}
  0x61   : > { %6680 = dma.hbm_to_vmem [thread:$0]  (!%p7580_p6), %s10806_s1, 16, %s7576_s29, [#allocation9]  }
  0x62   : > { %s10807_s13 = sld [smem:[#allocation107_spill]] }
  0x68   : > { %s7097_s3 = scalar_lea.hbm %s10807_s13, 16 }
  0x69   : > { %p7098_p12 = scmp.ne.s32.totalorder %s10807_s13, %s7097_s3  ;;  %p7104_p0 = scmp.lt.u32.totalorder %s7097_s3, %s10807_s13 }
  0x6b   : > { %p7100_p4 = pnand %p7098_p12, %p7596_p8 }
  0x6d   : > { %p7101_p13 = pneg %p7100_p4 }
  0x6f   : > { %p7106_p2 = pnand %p7104_p0, %p7101_p13 }
  0x71   : > { %7109 = shalt.err (!%p7106_p2)
}
  0x72   : > { %s7110_s29 = scalar_lea.vmem %s7584_s7, 16  ;;  %s7117_s21 = scalar_lea.vmem %s7584_s7, 32 }
  0x73   : > { %p7111_p5 = scmp.ne.s32.totalorder %s7584_s7, %s7110_s29  ;;  %p7118_p10 = scmp.lt.s32.totalorder %s7584_s7, %s7584_s7 }
  0x74   : > { %p7119_p11 = scmp.lt.s32.totalorder %s7117_s21, %s7110_s29 }
  0x75   : > { %p7113_p7 = pnand %p7111_p5, %p7596_p8 }
  0x76   : > { %p7120_p12 = por %p7119_p11, %p7118_p10 }
  0x77   : > { %p7114_p9 = pneg %p7113_p7 }
  0x79   : > { %p7121_p4 = pnand %p7120_p12, %p7114_p9 }
  0x7b   : > { %7124 = shalt.err (!%p7121_p4)
}
  0x7c   : > { %6686 = dma.hbm_to_vmem [thread:$0]  (!%p7580_p6), %s10807_s13, 16, %s7584_s7, [#allocation12]  }
  0x7d   : > { %s7383_s22 = smov [#allocation7]   ;;  %s10808_s15 = sld [smem:[#allocation109_spill]] }
  0x7e   : > { %s696_s25 = sshll.u32 %s7383_s22, 4  ;;  %s697_s25 = int_to_ptr.vmem [resolvable:$true] %s696_s25 }
  0x83   : > { %s7125_s23 = scalar_lea.hbm %s10808_s15, 64 }
  0x84   : > { %p7126_p13 = scmp.ne.s32.totalorder %s10808_s15, %s7125_s23  ;;  %p7132_p5 = scmp.lt.u32.totalorder %s7125_s23, %s10808_s15 }
  0x86   : > { %p7128_p0 = pnand %p7126_p13, %p7596_p8 }
  0x88   : > { %p7129_p2 = pneg %p7128_p0 }
  0x8a   : > { %p7134_p7 = pnand %p7132_p5, %p7129_p2 }
  0x8c   : > { %7137 = shalt.err (!%p7134_p7)
}
  0x8d   : > { %s7138_s7 = scalar_lea.vmem %s776_s4, 64  ;;  %p7146_p12 = scmp.lt.s32.totalorder %s776_s4, %s776_s4 }
  0x8e   : > { %p7139_p9 = scmp.ne.s32.totalorder %s776_s4, %s7138_s7  ;;  %p7147_p4 = scmp.lt.s32.totalorder %s7138_s7, %s7138_s7 }
  0x90   : > { %p7141_p10 = pnand %p7139_p9, %p7596_p8  ;;  %p7148_p1 = por %p7147_p4, %p7146_p12 }
  0x92   : > { %p7142_p11 = pneg %p7141_p10 }
  0x94   : > { %p7149_p3 = pnand %p7148_p1, %p7142_p11 }
  0x96   : > { %7152 = shalt.err (!%p7149_p3)
}
  0x97   : > { %6692 = dma.hbm_to_vmem [thread:$0]  (!%p7580_p6), %s10808_s15, 64, %s776_s4, [#allocation15]  }
  0x98   : > { %s10809_s11 = sld [smem:[#allocation96_spill]] }
  0x9e   : > { %s7153_s23 = scalar_lea.hbm %s10809_s11, 16 }
  0x9f   : > { %p7154_p13 = scmp.ne.s32.totalorder %s10809_s11, %s7153_s23  ;;  %p7160_p3 = scmp.lt.u32.totalorder %s7153_s23, %s10809_s11 }
  0xa1   : > { %p7156_p0 = pnand %p7154_p13, %p7596_p8 }
  0xa3   : > { %p7157_p1 = pneg %p7156_p0 }
  0xa5   : > { %p7162_p2 = pnand %p7160_p3, %p7157_p1 }
  0xa7   : > { %7165 = shalt.err (!%p7162_p2)
}
  0xa8   : > { %s7166_s7 = scalar_lea.vmem %s697_s25, 16  ;;  %s7173_s4 = scalar_lea.vmem %s697_s25, 32 }
  0xa9   : > { %p7167_p5 = scmp.ne.s32.totalorder %s697_s25, %s7166_s7  ;;  %p7174_p10 = scmp.lt.s32.totalorder %s697_s25, %s697_s25 }
  0xaa   : > { %p7175_p11 = scmp.lt.s32.totalorder %s7173_s4, %s7166_s7 }
  0xab   : > { %p7169_p7 = pnand %p7167_p5, %p7596_p8 }
  0xac   : > { %p7176_p12 = por %p7175_p11, %p7174_p10 }
  0xad   : > { %p7170_p9 = pneg %p7169_p7 }
  0xaf   : > { %p7177_p4 = pnand %p7176_p12, %p7170_p9 }
  0xb1   : > { %7180 = shalt.err (!%p7177_p4)
}
  0xb2   : > { %6677 = dma.hbm_to_vmem [thread:$0]  (!%p7580_p6), %s10809_s11, 16, %s697_s25, [#allocation6]  }
  0xb3   : > { %s7384_s22 = smov [#allocation10]   ;;  %s7385_s23 = smov [#allocation13]  }
  0xb4   : > { %s736_s3 = sshll.u32 %s7384_s22, 4  ;;  %s764_s28 = sshll.u32 %s7385_s23, 4  ;;  %s737_s3 = int_to_ptr.vmem [resolvable:$true] %s736_s3  ;;  %s765_s28 = int_to_ptr.vmem [resolvable:$true] %s764_s28 }
  0xb5   : > { %s10810_s21 = sld [smem:[#allocation104_spill]] }
  0xbb   : > { %s7181_s1 = scalar_lea.hbm %s10810_s21, 16 }
  0xbc   : > { %p7182_p13 = scmp.ne.s32.totalorder %s10810_s21, %s7181_s1  ;;  %p7188_p3 = scmp.lt.u32.totalorder %s7181_s1, %s10810_s21 }
  0xbe   : > { %p7184_p0 = pnand %p7182_p13, %p7596_p8 }
  0xc0   : > { %p7185_p1 = pneg %p7184_p0 }
  0xc2   : > { %p7190_p2 = pnand %p7188_p3, %p7185_p1 }
  0xc4   : > { %7193 = shalt.err (!%p7190_p2)
}
  0xc5   : > { %s7194_s25 = scalar_lea.vmem %s737_s3, 16  ;;  %s7201_s26 = scalar_lea.vmem %s737_s3, 32 }
  0xc6   : > { %p7195_p5 = scmp.ne.s32.totalorder %s737_s3, %s7194_s25  ;;  %p7202_p10 = scmp.lt.s32.totalorder %s737_s3, %s737_s3 }
  0xc7   : > { %p7203_p11 = scmp.lt.s32.totalorder %s7201_s26, %s7194_s25 }
  0xc8   : > { %p7197_p7 = pnand %p7195_p5, %p7596_p8 }
  0xc9   : > { %p7204_p12 = por %p7203_p11, %p7202_p10 }
  0xca   : > { %p7198_p9 = pneg %p7197_p7 }
  0xcc   : > { %p7205_p4 = pnand %p7204_p12, %p7198_p9 }
  0xce   : > { %7208 = shalt.err (!%p7205_p4)
}
  0xcf   : > { %6683 = dma.hbm_to_vmem [thread:$0]  (!%p7580_p6), %s10810_s21, 16, %s737_s3, [#allocation9]  }
  0xd0   : > { %s10811_s14 = sld [smem:[#allocation108_spill]] }
  0xd6   : > { %s7209_s6 = scalar_lea.hbm %s10811_s14, 64 }
  0xd7   : > { %p7210_p13 = scmp.ne.s32.totalorder %s10811_s14, %s7209_s6  ;;  %p7216_p3 = scmp.lt.u32.totalorder %s7209_s6, %s10811_s14 }
  0xd9   : > { %p7212_p0 = pnand %p7210_p13, %p7596_p8 }
  0xdb   : > { %p7213_p1 = pneg %p7212_p0 }
  0xdd   : > { %p7218_p2 = pnand %p7216_p3, %p7213_p1 }
  0xdf   : > { %7221 = shalt.err (!%p7218_p2)
}
  0xe0   : > { %s7222_s25 = scalar_lea.vmem %s765_s28, 64  ;;  %p7230_p10 = scmp.lt.s32.totalorder %s765_s28, %s765_s28 }
  0xe1   : > { %p7223_p5 = scmp.ne.s32.totalorder %s765_s28, %s7222_s25  ;;  %p7231_p11 = scmp.lt.s32.totalorder %s7222_s25, %s7222_s25 }
  0xe3   : > { %p7225_p7 = pnand %p7223_p5, %p7596_p8  ;;  %p7232_p12 = por %p7231_p11, %p7230_p10 }
  0xe5   : > { %p7226_p9 = pneg %p7225_p7 }
  0xe7   : > { %p7233_p4 = pnand %p7232_p12, %p7226_p9 }
  0xe9   : > { %7236 = shalt.err (!%p7233_p4)
}
  0xea   : > { %6689 = dma.hbm_to_vmem [thread:$0]  (!%p7580_p6), %s10811_s14, 64, %s765_s28, [#allocation12]  }
  0xeb   : > { %s7386_s22 = smov [#allocation16]   ;;  %s10812_s16 = sld [smem:[#allocation110_spill]] }
  0xec   : > { %s786_s23 = sshll.u32 %s7386_s22, 4  ;;  %s787_s23 = int_to_ptr.vmem [resolvable:$true] %s786_s23 }
  0xf1   : > { %s7237_s6 = scalar_lea.hbm %s10812_s16, 64 }
  0xf2   : > { %p7238_p13 = scmp.ne.s32.totalorder %s10812_s16, %s7237_s6  ;;  %p7244_p3 = scmp.lt.u32.totalorder %s7237_s6, %s10812_s16 }
  0xf4   : > { %p7240_p0 = pnand %p7238_p13, %p7596_p8 }
  0xf6   : > { %p7241_p1 = pneg %p7240_p0 }
  0xf8   : > { %p7246_p2 = pnand %p7244_p3, %p7241_p1 }
  0xfa   : > { %7249 = shalt.err (!%p7246_p2)
}
  0xfb   : > { %s7250_s28 = scalar_lea.vmem %s787_s23, 64  ;;  %p7258_p10 = scmp.lt.s32.totalorder %s787_s23, %s787_s23 }
  0xfc   : > { %p7251_p5 = scmp.ne.s32.totalorder %s787_s23, %s7250_s28  ;;  %p7259_p11 = scmp.lt.s32.totalorder %s7250_s28, %s7250_s28 }
  0xfe   : > { %p7253_p7 = pnand %p7251_p5, %p7596_p8  ;;  %p7260_p12 = por %p7259_p11, %p7258_p10 }
 0x100   : > { %p7254_p9 = pneg %p7253_p7 }
 0x102   : > { %p7261_p4 = pnand %p7260_p12, %p7254_p9 }
 0x104   : > { %7264 = shalt.err (!%p7261_p4)
}
 0x105   : > { %6695 = dma.hbm_to_vmem [thread:$0]  (!%p7580_p6), %s10812_s16, 64, %s787_s23, [#allocation15]  }
 0x106   : > { %s5744_s2 = sadd.s32 4294967294, %s7377_s30   ;;  %s7759_s12 = sadd.s32 1, %s7377_s30  }
 0x107   : > { %s52_s26 = ssub.s32 %s7377_s30, %s7759_s12  ;;  %s55_s22 = sadd.s32 1, %s7373_s9 }
 0x108   : > { %p53_p8 = scmp.eq.s32.totalorder %s52_s26, 0  ;;  %p62_p13 = scmp.ne.s32.totalorder %s7373_s9, %s7369_s5 }
 0x109   : > { %p63_p0 = scmp.eq.s32.totalorder %s7377_s30, 0  ;;  %p68_p1 = scmp.ne.s32.totalorder %s7369_s5, %s7365_s8 }
 0x10a   : > { %s7770_s13 = scalar_select %p53_p8, %s7373_s9, %s55_s22  }
 0x10b   : > { %p7772_p3 = por %p63_p0, %p62_p13  ;;  %p10814_p2 = scmp.eq.s32.totalorder %s7562_s10, 0 }
 0x10c   : > { %p659_p5 = scmp.eq.s32.totalorder %s7562_s10, 1  ;;  %p665_p7 = scmp.eq.s32.totalorder %s5744_s2, 1 }
 0x10d   : > { %p7778_p6 = por %p10814_p2, %p68_p1  ;;  %p6712_p9 = scmp.lt.s32.totalorder %s7377_s30, 2 }
 0x10e   : > { %s830_s6 = sand.u32 1, %s7373_s9   ;;  %p7785_p10 = por %p659_p5, %p62_p13 }
 0x10f   : > { %p7789_p11 = por %p665_p7, %p68_p1  ;;  %s5755_s4 = sshll.u32 %s830_s6, 8 }
 0x110   : > { %s10816_s29 = scalar_select %p7785_p10, 1, 0 }
 0x111   : > { %s10817_s7 = scalar_select %p7789_p11, 1, 0 }
 0x112   : > { %s5943_s24 = sshll.u32 %s7377_s30, 12  ;;  %s10818_s3 = sld [smem:[#allocation94_spill]] }
 0x113   : > { %s834_s2 = scalar_lea.vmem [#allocation2], %s5755_s4  ;;  %p7803_p12 = pnand %p6712_p9, %p7772_p3 }
 0x114   : > { %s841_s22 = sshll.u32 %s834_s2, 4  ;;  %s7807_s14 = scalar_lea.sflag [#allocation3], %s830_s6  ;;  %s7799_s22 = int_to_ptr.vmem [resolvable:$true] %s841_s22 }
 0x115   : > { %p7267_p8 = pneg %p7803_p12 }
 0x118   : > { %s7797_s26 = scalar_lea.hbm %s10818_s3, %s5943_s24  ;;  %s7270_s1 = scalar_lea.hbm %s10818_s3, 8192 }
 0x119   : > { %s7265_s28 = scalar_lea.hbm %s7797_s26, 4096  ;;  %p7271_p1 = scmp.lt.u32.totalorder %s7797_s26, %s10818_s3 }
 0x11a   : > { %p7266_p4 = scmp.ne.s32.totalorder %s7797_s26, %s7265_s28  ;;  %p7272_p3 = scmp.lt.u32.totalorder %s7270_s1, %s7265_s28 }
 0x11b   : > { %p7274_p5 = scmp.lt.u32.totalorder %s7265_s28, %s7797_s26 }
 0x11c   : > { %p7268_p13 = pnand %p7267_p8, %p7266_p4  ;;  %p7273_p2 = por %p7272_p3, %p7271_p1 }
 0x11e   : > { %p7269_p0 = pneg %p7268_p13  ;;  %p7275_p7 = por %p7274_p5, %p7273_p2 }
 0x120   : > { %p7276_p9 = pnand %p7275_p7, %p7269_p0 }
 0x122   : > { %7279 = shalt.err (!%p7276_p9)
}
 0x123   : > { %s7280_s6 = scalar_lea.vmem %s7799_s22, 4096  ;;  %s7387_s4 = smov [#allocation2]  }
 0x124   : > { %p7281_p4 = scmp.ne.s32.totalorder %s7799_s22, %s7280_s6  ;;  %s7285_s24 = sshll.u32 %s7387_s4, 4  ;;  %s7286_s24 = int_to_ptr.vmem [resolvable:$false] %s7285_s24 }
 0x125   : > { %s7287_s25 = scalar_lea.vmem %s7286_s24, 8192  ;;  %p7288_p10 = scmp.lt.s32.totalorder %s7799_s22, %s7286_s24 }
 0x126   : > { %p7283_p13 = pnand %p7281_p4, %p7267_p8  ;;  %p7289_p1 = scmp.lt.s32.totalorder %s7287_s25, %s7280_s6 }
 0x128   : > { %p7284_p11 = pneg %p7283_p13  ;;  %p7290_p3 = por %p7289_p1, %p7288_p10 }
 0x12a   : > { %p7291_p2 = pnand %p7290_p3, %p7284_p11 }
 0x12c   : > { %7294 = shalt.err (!%p7291_p2)
}
 0x12d   : > { %s7388_s28 = smov 128   ;;  %s7389_s1 = smov 8  }
 0x12e   : > { %6699 = dma.hbm_to_vmem [thread:$0]  (!%p7803_p12), %s7797_s26, 4096, %s7799_s22, %s7807_s14, %s7388_s28, %s7388_s28, %s7389_s1  }
 0x12f   : > { %p10820_p8 = scmp.ne.s32.totalorder %s10802_s0, 0 }
 0x131   : > { %853 = sbr.rel (%p10820_p8) target bundleno = 3061 (0xbf5), region = 132 }
 0x138   : > { %s7838_s2 = sand.u32 1, %s7369_s5  }
 0x139   : > { %s10729_s6 = sshll.u32 %s7838_s2, 8  ;;  %s856_s4 = scalar_lea.sflag [#allocation3], %s7838_s2 }
 0x13a   : > { %s7844_s24 = scalar_lea.vmem [#allocation2], %s10729_s6 }
 0x13b   : > { %7340 = dma.done.wait (%p7778_p6), %s856_s4, 4096  }
 0x13c   : > { %7342 = vsyncadd (%p7778_p6), %s856_s4, 4294963200  ;;  %p10821_p10 = scmp.eq.s32.totalorder %s7562_s10, 0 }
 0x13e   : > { %7344 = dma.done.wait (%p10821_p10), [#allocation6], 32   ;;  %p10822_p11 = pmov %p10821_p10 }
 0x13f   : > { %p10823_p12 = pmov %p10821_p10 }
 0x140   : > { %7346 = vsyncadd (%p10822_p11), [#allocation6], 4294967264 }
 0x141   : > { %7348 = dma.done.wait (%p10823_p12), [#allocation9], 32   ;;  %p10824_p0 = pmov %p10821_p10 }
 0x143   : > { %7350 = vsyncadd (%p10824_p0), [#allocation9], 4294967264  ;;  %p10825_p5 = pmov %p10824_p0 }
 0x144   : > { %p10826_p7 = pmov %p10824_p0 }
 0x145   : > { %7352 = dma.done.wait (%p10825_p5), [#allocation12], 80  }
 0x146   : > { %7354 = vsyncadd (%p10826_p7), [#allocation12], 4294967216  ;;  %p10827_p6 = pmov %p10824_p0 }
 0x147   : > { %p10828_p9 = pmov %p10824_p0 }
 0x148   : > { %7356 = dma.done.wait (%p10827_p6), [#allocation15], 128  }
 0x149   : > { %7358 = vsyncadd (%p10828_p9), [#allocation15], 4294967168  ;;  %vm997_vm0 = vcmask 261120   ;;  %v7867_v0 = vld [vmem:[%s7844_s24] sm:$0xff]  ;;  %v7870_v1 = vld [vmem:[%s7844_s24 + $0x10] sm:$0xff]  ;;  %s10829_s11 = sld [smem:[#allocation98_spill]] }
 0x14a   : > { %v7873_v2 = vld [vmem:[%s7844_s24 + $0x8] sm:$0xff]  ;;  %v998_v3 = vsel %vm997_vm0, %v7867_v0, 0.0  ;;  %v1004_v4 = vsel %vm997_vm0, %v7870_v1, 0.0  ;;  %v7880_v5 = vld [vmem:[%s7844_s24 + $0x18] sm:$0xff]  ;;  %v7887_v8 = vld [vmem:[%s7844_s24 + $0x20] sm:$0xff]  ;;  %s10830_s28 = sld [smem:[#allocation97_spill]] }
 0x14b   : > { %999 = vadd.xlane.f32.xlu0 %v998_v3  ;;  %1005 = vadd.xlane.f32.xlu1 %v1004_v4  ;;  %v1001_v6 = vsel %vm997_vm0, %v7873_v2, 0.0  ;;  %v1007_v7 = vsel %vm997_vm0, %v7880_v5, 0.0  ;;  %v7890_v9 = vld [vmem:[%s7844_s24 + $0x28] sm:$0xff]  ;;  %v7893_v10 = vld [vmem:[%s7844_s24 + $0x30] sm:$0xff]  ;;  %v1010_v11 = vsel %vm997_vm0, %v7887_v8, 0.0  ;;  %v7900_v13 = vld [vmem:[%s7844_s24 + $0x38] sm:$0xff] }
 0x14c   : > { %v1013_v12 = vsel %vm997_vm0, %v7890_v9, 0.0  ;;  %v7903_v14 = vld [vmem:[%s7844_s24 + $0x40] sm:$0xff]  ;;  %v7906_v15 = vld [vmem:[%s7844_s24 + $0x48] sm:$0xff]  ;;  %v7909_v16 = vld [vmem:[%s7844_s24 + $0x50] sm:$0xff]  ;;  %v1016_v18 = vsel %vm997_vm0, %v7893_v10, 0.0  ;;  %v1019_v19 = vsel %vm997_vm0, %v7900_v13, 0.0 }
 0x14d   : > { %v7912_v17 = vld [vmem:[%s7844_s24 + $0x58] sm:$0xff]  ;;  %v1022_v20 = vsel %vm997_vm0, %v7903_v14, 0.0  ;;  %v1025_v21 = vsel %vm997_vm0, %v7906_v15, 0.0  ;;  %v1028_v22 = vsel %vm997_vm0, %v7909_v16, 0.0  ;;  %v7927_v24 = vld [vmem:[%s7844_s24 + $0x60] sm:$0xff]  ;;  %v7930_v25 = vld [vmem:[%s7844_s24 + $0x68] sm:$0xff] }
 0x14e   : > { %v1031_v23 = vsel %vm997_vm0, %v7912_v17, 0.0  ;;  %v1034_v26 = vsel %vm997_vm0, %v7927_v24, 0.0  ;;  %v1037_v27 = vsel %vm997_vm0, %v7930_v25, 0.0  ;;  %v7937_v28 = vld [vmem:[%s7844_s24 + $0x70] sm:$0xff]  ;;  %v7940_v29 = vld [vmem:[%s7844_s24 + $0x78] sm:$0xff]  ;;  %v7947_v32 = vld [vmem:[%s7844_s24 + $0x80] sm:$0xff] }
 0x14f   : > { %1002 = vadd.xlane.f32.xlu0 %v1001_v6  ;;  %1008 = vadd.xlane.f32.xlu1 %v1007_v7  ;;  %v1040_v30 = vsel %vm997_vm0, %v7937_v28, 0.0  ;;  %v1043_v31 = vsel %vm997_vm0, %v7940_v29, 0.0  ;;  %v7950_v33 = vld [vmem:[%s7844_s24 + $0x88] sm:$0xff]  ;;  %v1046_v34 = vsel %vm997_vm0, %v7947_v32, 0.0  ;;  %v7957_v36 = vld [vmem:[%s7844_s24 + $0x90] sm:$0xff]  ;;  %v7960_v37 = vld [vmem:[%s7844_s24 + $0x98] sm:$0xff] }
 0x150   : > { %v1049_v35 = vsel %vm997_vm0, %v7950_v33, 0.0  ;;  %v1052_v38 = vsel %vm997_vm0, %v7957_v36, 0.0  ;;  %v1055_v39 = vsel %vm997_vm0, %v7960_v37, 0.0  ;;  %v7967_v40 = vld [vmem:[%s7844_s24 + $0xa0] sm:$0xff]  ;;  %v7970_v41 = vld [vmem:[%s7844_s24 + $0xa8] sm:$0xff]  ;;  %v7977_v44 = vld [vmem:[%s7844_s24 + $0xb0] sm:$0xff] }
 0x151   : > { %v1058_v42 = vsel %vm997_vm0, %v7967_v40, 0.0  ;;  %v1061_v43 = vsel %vm997_vm0, %v7970_v41, 0.0  ;;  %v7980_v45 = vld [vmem:[%s7844_s24 + $0xb8] sm:$0xff]  ;;  %v1064_v46 = vsel %vm997_vm0, %v7977_v44, 0.0  ;;  %v7987_v48 = vld [vmem:[%s7844_s24 + $0xc0] sm:$0xff]  ;;  %v7990_v49 = vld [vmem:[%s7844_s24 + $0xc8] sm:$0xff] }
 0x152   : > { %v1067_v47 = vsel %vm997_vm0, %v7980_v45, 0.0  ;;  %v1070_v50 = vsel %vm997_vm0, %v7987_v48, 0.0  ;;  %v1073_v51 = vsel %vm997_vm0, %v7990_v49, 0.0  ;;  %v7997_v52 = vld [vmem:[%s7844_s24 + $0xd0] sm:$0xff]  ;;  %v8000_v53 = vld [vmem:[%s7844_s24 + $0xd8] sm:$0xff]  ;;  %v8007_v56 = vld [vmem:[%s7844_s24 + $0xe0] sm:$0xff] }
 0x153   : > { %1011 = vadd.xlane.f32.xlu0 %v1010_v11  ;;  %1014 = vadd.xlane.f32.xlu1 %v1013_v12  ;;  %v1076_v54 = vsel %vm997_vm0, %v7997_v52, 0.0  ;;  %v1079_v55 = vsel %vm997_vm0, %v8000_v53, 0.0  ;;  %v8010_v57 = vld [vmem:[%s7844_s24 + $0xe8] sm:$0xff]  ;;  %v1082_v58 = vsel %vm997_vm0, %v8007_v56, 0.0  ;;  %v8017_v60 = vld [vmem:[%s7844_s24 + $0xf0] sm:$0xff]  ;;  %v8020_v61 = vld [vmem:[%s7844_s24 + $0xf8] sm:$0xff] }
 0x154   : > { %v1085_v59 = vsel %vm997_vm0, %v8010_v57, 0.0  ;;  %v1088_v62 = vsel %vm997_vm0, %v8017_v60, 0.0  ;;  %v1091_v63 = vsel %vm997_vm0, %v8020_v61, 0.0  ;;  %vm7391_vm1 = vmmov 0   ;;  %s10895_s23 = sld [smem:[#allocation101_spill]]  ;;  %s10896_s22 = sld [smem:[#allocation102_spill]] }
 0x155   : > { %vm1621_vm2 = vcmask 1040384   ;;  %vm1524_vm3 = vcmask 1046528   ;;  %s10898_s25 = sld [smem:[#allocation99_spill]]  ;;  %s10907_s0 = sld [smem:[#allocation103_spill]]  ;;  %vm2550_vm4 = vcmask 1043456   ;;  %vm2546_vm5 = vcmask 64512  }
 0x156   : > { %s10908_s1 = sld [smem:[#allocation105_spill]]  ;;  %s10909_s26 = sld [smem:[#allocation106_spill]] }
 0x157   : > { %1017 = vadd.xlane.f32.xlu0 %v1016_v18  ;;  %1020 = vadd.xlane.f32.xlu1 %v1019_v19  ;;  %s10914_s17 = sld [smem:[#allocation111_spill]]  ;;  %s11002_s16 = sld [smem:[#allocation112_spill]] }
 0x158   : > { %s11025_s14 = sld [smem:[#allocation115_spill]]  ;;  %s11026_s15 = sld [smem:[#allocation117_spill]] }
 0x159   : > { %s11029_s4 = sld [smem:[#allocation116_spill]]  ;;  %s5944_s6 = sshll.u32 %s7562_s10, 12 }
 0x15a   : > { %p11055_p13 = scmp.ne.s32.totalorder %s10816_s29, 0 }
 0x15b   : > { %1023 = vadd.xlane.f32.xlu0 %v1022_v20  ;;  %1026 = vadd.xlane.f32.xlu1 %v1025_v21 }
 0x15f   : > { %1029 = vadd.xlane.f32.xlu0 %v1028_v22  ;;  %1032 = vadd.xlane.f32.xlu1 %v1031_v23 }
 0x163   : > { %1035 = vadd.xlane.f32.xlu0 %v1034_v26  ;;  %1038 = vadd.xlane.f32.xlu1 %v1037_v27 }
 0x167   : > { %1041 = vadd.xlane.f32.xlu0 %v1040_v30  ;;  %1044 = vadd.xlane.f32.xlu1 %v1043_v31 }
 0x16b   : > { %1047 = vadd.xlane.f32.xlu0 %v1046_v34  ;;  %1050 = vadd.xlane.f32.xlu1 %v1049_v35 }
 0x16f   : > { %1053 = vadd.xlane.f32.xlu0 %v1052_v38  ;;  %1056 = vadd.xlane.f32.xlu1 %v1055_v39 }
 0x173   : > { %1059 = vadd.xlane.f32.xlu0 %v1058_v42  ;;  %1062 = vadd.xlane.f32.xlu1 %v1061_v43 }
 0x177   : > { %1065 = vadd.xlane.f32.xlu0 %v1064_v46  ;;  %1068 = vadd.xlane.f32.xlu1 %v1067_v47 }
 0x17b   : > { %1071 = vadd.xlane.f32.xlu0 %v1070_v50  ;;  %1074 = vadd.xlane.f32.xlu1 %v1073_v51 }
 0x17f   : > { %1077 = vadd.xlane.f32.xlu0 %v1076_v54  ;;  %1080 = vadd.xlane.f32.xlu1 %v1079_v55 }
 0x183   : > { %1083 = vadd.xlane.f32.xlu0 %v1082_v58  ;;  %1086 = vadd.xlane.f32.xlu1 %v1085_v59 }
 0x187   : > { %1089 = vadd.xlane.f32.xlu0 %v1088_v62  ;;  %1092 = vadd.xlane.f32.xlu1 %v1091_v63 }
 0x1d8   : > { %v1000_v3 = vpop.xlane.xlu0 %999  ;;  %v1006_v4 = vpop.xlane.xlu1 %1005 }
 0x1d9   : > { %v1094_v6 = vmul.f32 0.03125, %v1000_v3  ;;  %v1096_v7 = vmul.f32 0.03125, %v1006_v4 }
 0x1db   : > { %v8027_v11 = vsub.f32 %v7867_v0, %v1094_v6  ;;  %v8030_v12 = vsub.f32 %v7870_v1, %v1096_v7 }
 0x1dc   : > { %v1003_v18 = vpop.xlane.xlu0 %1002  ;;  %v1009_v19 = vpop.xlane.xlu1 %1008 }
 0x1dd   : > { %v1095_v20 = vmul.f32 0.03125, %v1003_v18  ;;  %v1097_v21 = vmul.f32 0.03125, %v1009_v19  ;;  %v1158_v22 = vmul.f32 %v8027_v11, %v8027_v11  ;;  %v1160_v23 = vmul.f32 %v8030_v12, %v8030_v12 }
 0x1df   : > { %v8037_v26 = vsub.f32 %v7873_v2, %v1095_v20  ;;  %v8040_v27 = vsub.f32 %v7880_v5, %v1097_v21  ;;  %v1190_v0 = vsel %vm997_vm0, %v1158_v22, 0.0  ;;  %v1196_v31 = vsel %vm997_vm0, %v1160_v23, 0.0 }
 0x1e0   : > { %1191 = vadd.xlane.f32.xlu0 %v1190_v0  ;;  %v1012_v1 = vpop.xlane.xlu0 %1011  ;;  %v1015_v30 = vpop.xlane.xlu1 %1014 }
 0x1e1   : > { %v1098_v34 = vmul.f32 0.03125, %v1012_v1  ;;  %v1099_v35 = vmul.f32 0.03125, %v1015_v30  ;;  %v1159_v38 = vmul.f32 %v8037_v26, %v8037_v26  ;;  %v1161_v39 = vmul.f32 %v8040_v27, %v8040_v27 }
 0x1e3   : > { %v8049_v2 = vsub.f32 %v7887_v8, %v1098_v34  ;;  %v8052_v5 = vsub.f32 %v7890_v9, %v1099_v35  ;;  %v1193_v42 = vsel %vm997_vm0, %v1159_v38, 0.0  ;;  %v1199_v47 = vsel %vm997_vm0, %v1161_v39, 0.0 }
 0x1e4   : > { %1197 = vadd.xlane.f32.xlu0 %v1196_v31  ;;  %1194 = vadd.xlane.f32.xlu1 %v1193_v42  ;;  %v1018_v43 = vpop.xlane.xlu0 %1017  ;;  %v1021_v46 = vpop.xlane.xlu1 %1020 }
 0x1e5   : > { %v1100_v50 = vmul.f32 0.03125, %v1018_v43  ;;  %v1101_v51 = vmul.f32 0.03125, %v1021_v46  ;;  %v1162_v54 = vmul.f32 %v8049_v2, %v8049_v2  ;;  %v1163_v8 = vmul.f32 %v8052_v5, %v8052_v5 }
 0x1e7   : > { %v8061_v55 = vsub.f32 %v7893_v10, %v1100_v50  ;;  %v8064_v9 = vsub.f32 %v7900_v13, %v1101_v51  ;;  %v1202_v58 = vsel %vm997_vm0, %v1162_v54, 0.0  ;;  %v1205_v63 = vsel %vm997_vm0, %v1163_v8, 0.0 }
 0x1e8   : > { %1200 = vadd.xlane.f32.xlu1 %v1199_v47  ;;  %1203 = vadd.xlane.f32.xlu0 %v1202_v58  ;;  %v1024_v59 = vpop.xlane.xlu0 %1023  ;;  %v1027_v62 = vpop.xlane.xlu1 %1026 }
 0x1e9   : > { %v1102_v3 = vmul.f32 0.03125, %v1024_v59  ;;  %v1103_v4 = vmul.f32 0.03125, %v1027_v62  ;;  %v1164_v6 = vmul.f32 %v8061_v55, %v8061_v55  ;;  %v1165_v10 = vmul.f32 %v8064_v9, %v8064_v9 }
 0x1eb   : > { %v8073_v7 = vsub.f32 %v7903_v14, %v1102_v3  ;;  %v8076_v13 = vsub.f32 %v7906_v15, %v1103_v4  ;;  %v1208_v18 = vsel %vm997_vm0, %v1164_v6, 0.0  ;;  %v1211_v21 = vsel %vm997_vm0, %v1165_v10, 0.0 }
 0x1ec   : > { %1206 = vadd.xlane.f32.xlu1 %v1205_v63  ;;  %1209 = vadd.xlane.f32.xlu0 %v1208_v18  ;;  %v1030_v19 = vpop.xlane.xlu0 %1029  ;;  %v1033_v20 = vpop.xlane.xlu1 %1032 }
 0x1ed   : > { %v1104_v22 = vmul.f32 0.03125, %v1030_v19  ;;  %v1105_v23 = vmul.f32 0.03125, %v1033_v20  ;;  %v1166_v0 = vmul.f32 %v8073_v7, %v8073_v7  ;;  %v1167_v14 = vmul.f32 %v8076_v13, %v8076_v13 }
 0x1ef   : > { %v8085_v1 = vsub.f32 %v7909_v16, %v1104_v22  ;;  %v8088_v15 = vsub.f32 %v7912_v17, %v1105_v23  ;;  %v1214_v30 = vsel %vm997_vm0, %v1166_v0, 0.0  ;;  %v1217_v35 = vsel %vm997_vm0, %v1167_v14, 0.0 }
 0x1f0   : > { %1212 = vadd.xlane.f32.xlu1 %v1211_v21  ;;  %1215 = vadd.xlane.f32.xlu0 %v1214_v30  ;;  %v1036_v31 = vpop.xlane.xlu0 %1035  ;;  %v1039_v34 = vpop.xlane.xlu1 %1038 }
 0x1f1   : > { %v1106_v38 = vmul.f32 0.03125, %v1036_v31  ;;  %v1107_v39 = vmul.f32 0.03125, %v1039_v34  ;;  %v1168_v42 = vmul.f32 %v8085_v1, %v8085_v1  ;;  %v1169_v16 = vmul.f32 %v8088_v15, %v8088_v15 }
 0x1f3   : > { %v8097_v43 = vsub.f32 %v7927_v24, %v1106_v38  ;;  %v8100_v17 = vsub.f32 %v7930_v25, %v1107_v39  ;;  %v1220_v46 = vsel %vm997_vm0, %v1168_v42, 0.0  ;;  %v1223_v51 = vsel %vm997_vm0, %v1169_v16, 0.0 }
 0x1f4   : > { %1218 = vadd.xlane.f32.xlu1 %v1217_v35  ;;  %1221 = vadd.xlane.f32.xlu0 %v1220_v46  ;;  %v1042_v47 = vpop.xlane.xlu0 %1041  ;;  %v1045_v50 = vpop.xlane.xlu1 %1044 }
 0x1f5   : > { %v1108_v54 = vmul.f32 0.03125, %v1042_v47  ;;  %v1109_v8 = vmul.f32 0.03125, %v1045_v50  ;;  %v1170_v58 = vmul.f32 %v8097_v43, %v8097_v43  ;;  %v1171_v24 = vmul.f32 %v8100_v17, %v8100_v17 }
 0x1f7   : > { %v8109_v59 = vsub.f32 %v7937_v28, %v1108_v54  ;;  %v8112_v25 = vsub.f32 %v7940_v29, %v1109_v8  ;;  %v1226_v62 = vsel %vm997_vm0, %v1170_v58, 0.0  ;;  %v1229_v4 = vsel %vm997_vm0, %v1171_v24, 0.0 }
 0x1f8   : > { %1224 = vadd.xlane.f32.xlu1 %v1223_v51  ;;  %1227 = vadd.xlane.f32.xlu0 %v1226_v62  ;;  %v1048_v63 = vpop.xlane.xlu0 %1047  ;;  %v1051_v3 = vpop.xlane.xlu1 %1050 }
 0x1f9   : > { %v1110_v6 = vmul.f32 0.03125, %v1048_v63  ;;  %v1111_v10 = vmul.f32 0.03125, %v1051_v3  ;;  %v1172_v18 = vmul.f32 %v8109_v59, %v8109_v59  ;;  %v1173_v28 = vmul.f32 %v8112_v25, %v8112_v25 }
 0x1fb   : > { %v8121_v19 = vsub.f32 %v7947_v32, %v1110_v6  ;;  %v8124_v29 = vsub.f32 %v7950_v33, %v1111_v10  ;;  %v1232_v20 = vsel %vm997_vm0, %v1172_v18, 0.0  ;;  %v1235_v23 = vsel %vm997_vm0, %v1173_v28, 0.0 }
 0x1fc   : > { %1230 = vadd.xlane.f32.xlu1 %v1229_v4  ;;  %1233 = vadd.xlane.f32.xlu0 %v1232_v20  ;;  %v1054_v21 = vpop.xlane.xlu0 %1053  ;;  %v1057_v22 = vpop.xlane.xlu1 %1056 }
 0x1fd   : > { %v1112_v0 = vmul.f32 0.03125, %v1054_v21  ;;  %v1113_v14 = vmul.f32 0.03125, %v1057_v22  ;;  %v1174_v30 = vmul.f32 %v8121_v19, %v8121_v19  ;;  %v1175_v32 = vmul.f32 %v8124_v29, %v8124_v29 }
 0x1ff   : > { %v8133_v31 = vsub.f32 %v7957_v36, %v1112_v0  ;;  %v8136_v33 = vsub.f32 %v7960_v37, %v1113_v14  ;;  %v1238_v34 = vsel %vm997_vm0, %v1174_v30, 0.0  ;;  %v1241_v39 = vsel %vm997_vm0, %v1175_v32, 0.0 }
 0x200   : > { %1236 = vadd.xlane.f32.xlu1 %v1235_v23  ;;  %1239 = vadd.xlane.f32.xlu0 %v1238_v34  ;;  %v1060_v35 = vpop.xlane.xlu0 %1059  ;;  %v1063_v38 = vpop.xlane.xlu1 %1062 }
 0x201   : > { %v1114_v42 = vmul.f32 0.03125, %v1060_v35  ;;  %v1115_v16 = vmul.f32 0.03125, %v1063_v38  ;;  %v1176_v46 = vmul.f32 %v8133_v31, %v8133_v31  ;;  %v1177_v36 = vmul.f32 %v8136_v33, %v8136_v33 }
 0x203   : > { %v8145_v47 = vsub.f32 %v7967_v40, %v1114_v42  ;;  %v8148_v37 = vsub.f32 %v7970_v41, %v1115_v16  ;;  %v1244_v50 = vsel %vm997_vm0, %v1176_v46, 0.0  ;;  %v1247_v8 = vsel %vm997_vm0, %v1177_v36, 0.0 }
 0x204   : > { %1242 = vadd.xlane.f32.xlu1 %v1241_v39  ;;  %1245 = vadd.xlane.f32.xlu0 %v1244_v50  ;;  %v1066_v51 = vpop.xlane.xlu0 %1065  ;;  %v1069_v54 = vpop.xlane.xlu1 %1068 }
 0x205   : > { %v1116_v58 = vmul.f32 0.03125, %v1066_v51  ;;  %v1117_v24 = vmul.f32 0.03125, %v1069_v54  ;;  %v1178_v62 = vmul.f32 %v8145_v47, %v8145_v47  ;;  %v1179_v40 = vmul.f32 %v8148_v37, %v8148_v37 }
 0x207   : > { %v8157_v63 = vsub.f32 %v7977_v44, %v1116_v58  ;;  %v8160_v41 = vsub.f32 %v7980_v45, %v1117_v24  ;;  %v1250_v3 = vsel %vm997_vm0, %v1178_v62, 0.0  ;;  %v1253_v10 = vsel %vm997_vm0, %v1179_v40, 0.0 }
 0x208   : > { %1248 = vadd.xlane.f32.xlu1 %v1247_v8  ;;  %1251 = vadd.xlane.f32.xlu0 %v1250_v3  ;;  %v1072_v4 = vpop.xlane.xlu0 %1071  ;;  %v1075_v6 = vpop.xlane.xlu1 %1074 }
 0x209   : > { %v1118_v18 = vmul.f32 0.03125, %v1072_v4  ;;  %v1119_v28 = vmul.f32 0.03125, %v1075_v6  ;;  %v1180_v20 = vmul.f32 %v8157_v63, %v8157_v63  ;;  %v1181_v44 = vmul.f32 %v8160_v41, %v8160_v41 }
 0x20b   : > { %v8169_v21 = vsub.f32 %v7987_v48, %v1118_v18  ;;  %v8172_v45 = vsub.f32 %v7990_v49, %v1119_v28  ;;  %v1256_v22 = vsel %vm997_vm0, %v1180_v20, 0.0  ;;  %v1259_v14 = vsel %vm997_vm0, %v1181_v44, 0.0 }
 0x20c   : > { %1254 = vadd.xlane.f32.xlu1 %v1253_v10  ;;  %1257 = vadd.xlane.f32.xlu0 %v1256_v22  ;;  %v1078_v23 = vpop.xlane.xlu0 %1077  ;;  %v1081_v0 = vpop.xlane.xlu1 %1080 }
 0x20d   : > { %v1120_v30 = vmul.f32 0.03125, %v1078_v23  ;;  %v1121_v32 = vmul.f32 0.03125, %v1081_v0  ;;  %v1182_v34 = vmul.f32 %v8169_v21, %v8169_v21  ;;  %v1183_v48 = vmul.f32 %v8172_v45, %v8172_v45 }
 0x20f   : > { %v8181_v35 = vsub.f32 %v7997_v52, %v1120_v30  ;;  %v8184_v49 = vsub.f32 %v8000_v53, %v1121_v32  ;;  %v1262_v38 = vsel %vm997_vm0, %v1182_v34, 0.0  ;;  %v1265_v16 = vsel %vm997_vm0, %v1183_v48, 0.0 }
 0x210   : > { %1260 = vadd.xlane.f32.xlu1 %v1259_v14  ;;  %1263 = vadd.xlane.f32.xlu0 %v1262_v38  ;;  %v1084_v39 = vpop.xlane.xlu0 %1083  ;;  %v1087_v42 = vpop.xlane.xlu1 %1086 }
 0x211   : > { %v1122_v46 = vmul.f32 0.03125, %v1084_v39  ;;  %v1123_v36 = vmul.f32 0.03125, %v1087_v42  ;;  %v1184_v50 = vmul.f32 %v8181_v35, %v8181_v35  ;;  %v1185_v52 = vmul.f32 %v8184_v49, %v8184_v49 }
 0x213   : > { %v8193_v51 = vsub.f32 %v8007_v56, %v1122_v46  ;;  %v8196_v53 = vsub.f32 %v8010_v57, %v1123_v36  ;;  %v1268_v54 = vsel %vm997_vm0, %v1184_v50, 0.0  ;;  %v1271_v24 = vsel %vm997_vm0, %v1185_v52, 0.0  ;;  %v8218_v52 = vld [vmem:[#allocation5] ss:$0 sm:$0xff] }
 0x214   : > { %1266 = vadd.xlane.f32.xlu1 %v1265_v16  ;;  %1269 = vadd.xlane.f32.xlu0 %v1268_v54  ;;  %v1090_v8 = vpop.xlane.xlu0 %1089  ;;  %v1093_v58 = vpop.xlane.xlu1 %1092 }
 0x215   : > { %v1124_v62 = vmul.f32 0.03125, %v1090_v8  ;;  %v1125_v40 = vmul.f32 0.03125, %v1093_v58  ;;  %v1186_v3 = vmul.f32 %v8193_v51, %v8193_v51  ;;  %v1187_v56 = vmul.f32 %v8196_v53, %v8196_v53  ;;  %v2061_v58 = vld [vmem:[%s10829_s11] sm:$0xf] }
 0x217   : > { %v8205_v4 = vsub.f32 %v8017_v60, %v1124_v62  ;;  %v8208_v57 = vsub.f32 %v8020_v61, %v1125_v40  ;;  %v1274_v6 = vsel %vm997_vm0, %v1186_v3, 0.0  ;;  %v1277_v10 = vsel %vm997_vm0, %v1187_v56, 0.0  ;;  %v2062_v62 = vld [vmem:[%s10829_s11 + $0x4] sm:$0xf]  ;;  %v2057_v40 = vld [vmem:[%s10830_s28] sm:$0xf] }
 0x218   : > { %1272 = vadd.xlane.f32.xlu1 %v1271_v24  ;;  %1275 = vadd.xlane.f32.xlu0 %v1274_v6  ;;  %v10672_v24 = vmov 0.0   ;;  %v2058_v3 = vld [vmem:[%s10830_s28 + $0x4] sm:$0xf]  ;;  %v8234_v6 = vld [vmem:[#allocation7] ss:$0 sm:$0xff] }
 0x219   : > { %v1188_v18 = vmul.f32 %v8205_v4, %v8205_v4  ;;  %v1189_v28 = vmul.f32 %v8208_v57, %v8208_v57  ;;  %6125 = vmatprep.subr.bf16.mxu0 %v10672_v24  ;;  %6133 = vmatprep.subr.bf16.mxu1 %v10672_v24 }
 0x21a   : > { %6129 = vmatprep.mubr.msk.bf16.mxu0 %vm7391_vm1, %v10672_v24  ;;  %6137 = vmatprep.mubr.msk.bf16.mxu1 %vm7391_vm1, %v10672_v24 }
 0x21b   : > { %v1280_v20 = vsel %vm997_vm0, %v1188_v18, 0.0  ;;  %v1283_v60 = vsel %vm997_vm0, %v1189_v28, 0.0  ;;  %v5771_v18 = vcombine.low %v2061_v58, %v2062_v62  ;;  %v5774_v28 = vcombine.low %v2057_v40, %v2058_v3 }
 0x21c   : > { %1278 = vadd.xlane.f32.xlu1 %v1277_v10  ;;  %1281 = vadd.xlane.f32.xlu0 %v1280_v20  ;;  %v2063_v20 = vld [vmem:[%s10829_s11 + $0x8] sm:$0xf] }
 0x21d   : > { %6126 = vmatpush3.bf16.msra.mxu0 %v5771_v18  ;;  %6134 = vmatpush3.bf16.msra.mxu1 %v5774_v28 }
 0x21e   : > { %6127 = vmatprep.subr.bf16.mxu0 %v10672_v24  ;;  %6135 = vmatprep.subr.bf16.mxu1 %v10672_v24 }
 0x220   : > { %1284 = vadd.xlane.f32.xlu1 %v1283_v60 }
 0x26d   : > { %v1192_v61 = vpop.xlane.xlu0 %1191 }
 0x26e   : > { %v1286_v44 = vmul.f32 0.03125, %v1192_v61 }
 0x270   : > { %v1318_v22 = vadd.f32 1e-05, %v1286_v44 }
 0x271   : > { %v1195_v23 = vpop.xlane.xlu1 %1194  ;;  %v1198_v0 = vpop.xlane.xlu0 %1197 }
 0x272   : > { %6797 = vrsqrt.f32 %v1318_v22  ;;  %v1287_v14 = vmul.f32 0.03125, %v1195_v23  ;;  %v1288_v30 = vmul.f32 0.03125, %v1198_v0  ;;  %v2064_v22 = vld [vmem:[%s10829_s11 + $0xc] sm:$0xf]  ;;  %v2059_v23 = vld [vmem:[%s10830_s28 + $0x8] sm:$0xf] }
 0x274   : > { %v1319_v32 = vadd.f32 1e-05, %v1287_v14  ;;  %v1320_v34 = vadd.f32 1e-05, %v1288_v30 }
 0x275   : > { %v1201_v48 = vpop.xlane.xlu1 %1200  ;;  %v1204_v38 = vpop.xlane.xlu0 %1203 }
 0x276   : > { %6799 = vrsqrt.f32 %v1319_v32  ;;  %v1289_v39 = vmul.f32 0.03125, %v1201_v48  ;;  %v1290_v42 = vmul.f32 0.03125, %v1204_v38  ;;  %v5772_v32 = vcombine.low %v2063_v20, %v2064_v22 }
 0x277   : > { %6801 = vrsqrt.f32 %v1320_v34 }
 0x278   : > { %v1321_v16 = vadd.f32 1e-05, %v1289_v39  ;;  %v1322_v46 = vadd.f32 1e-05, %v1290_v42  ;;  %6128 = vmatpush3.bf16.msra.mxu0 %v5772_v32 }
 0x279   : > { %v1207_v36 = vpop.xlane.xlu1 %1206  ;;  %v1210_v50 = vpop.xlane.xlu0 %1209  ;;  %6141 = vmatprep.subr.bf16.mxu0 %v10672_v24 }
 0x27a   : > { %6803 = vrsqrt.f32 %v1321_v16  ;;  %v1291_v54 = vmul.f32 0.03125, %v1207_v36  ;;  %v1292_v8 = vmul.f32 0.03125, %v1210_v50 }
 0x27b   : > { %6805 = vrsqrt.f32 %v1322_v46 }
 0x27c   : > { %v6798_v56 = vpop.eup %6797  ;;  %v1323_v10 = vadd.f32 1e-05, %v1291_v54  ;;  %v1324_v0 = vadd.f32 1e-05, %v1292_v8 }
 0x27d   : > { %v1382_v60 = vmul.f32 %v6798_v56, %v8027_v11  ;;  %v1213_v61 = vpop.xlane.xlu1 %1212  ;;  %v1216_v44 = vpop.xlane.xlu0 %1215  ;;  %v2060_v11 = vld [vmem:[%s10830_s28 + $0xc] sm:$0xf] }
 0x27e   : > { %v1293_v14 = vmul.f32 0.03125, %v1213_v61  ;;  %v1294_v30 = vmul.f32 0.03125, %v1216_v44  ;;  %v5775_v48 = vcombine.low %v2059_v23, %v2060_v11  ;;  %6807 = vrsqrt.f32 %v1323_v10 }
 0x27f   : > { %v1421_v34 = vmul.f32 %v8218_v52, %v1382_v60  ;;  %6809 = vrsqrt.f32 %v1324_v0 }
 0x280   : > { %v6800_v38 = vpop.eup %6799  ;;  %v1325_v39 = vadd.f32 1e-05, %v1293_v14  ;;  %v1326_v36 = vadd.f32 1e-05, %v1294_v30  ;;  %6136 = vmatpush3.bf16.msra.mxu1 %v5775_v48 }
 0x281   : > { %v6802_v42 = vpop.eup %6801  ;;  %v8257_v16 = vadd.f32 %v8234_v6, %v1421_v34  ;;  %v1383_v46 = vmul.f32 %v6800_v38, %v8037_v26  ;;  %v1219_v50 = vpop.xlane.xlu1 %1218  ;;  %6149 = vmatprep.subr.bf16.mxu1 %v10672_v24 }
 0x282   : > { %v1222_v54 = vpop.xlane.xlu0 %1221  ;;  %v1384_v8 = vmul.f32 %v6802_v42, %v8030_v12  ;;  %v1295_v58 = vmul.f32 0.03125, %v1219_v50  ;;  %6811 = vrsqrt.f32 %v1325_v39 }
 0x283   : > { %10831 = vst [vmem:[#allocation24_spill] sm:$0xff] %v8257_v16  ;;  %v1622_v62 = vrot.slane %v8257_v16, 7  ;;  %v1422_v40 = vmul.f32 %v8218_v52, %v1383_v46  ;;  %v8263_v3 = vmul.f32 0.03125, %v1222_v54  ;;  %v1525_v56 = vrot.slane %v8257_v16, 1 }
 0x284   : > { %v6804_v26 = vpop.eup %6803  ;;  %v1718_v12 = vsel %vm997_vm0, %v8257_v16, 0.0  ;;  %v1423_v10 = vmul.f32 %v8218_v52, %v1384_v8  ;;  %v1327_v18 = vadd.f32 1e-05, %v1295_v58  ;;  %6813 = vrsqrt.f32 %v1326_v36 }
 0x285   : > { %v6806_v28 = vpop.eup %6805  ;;  %v8272_v20 = vsel %vm1621_vm2, 0.0, %v1622_v62  ;;  %v8275_v60 = vadd.f32 %v8234_v6, %v1422_v40  ;;  %v1385_v61 = vmul.f32 %v6804_v26, %v8040_v27  ;;  %v8278_v44 = vpop.xlane.xlu1 %1224 }
 0x286   : > { %10832 = vst [vmem:[#allocation25_spill] sm:$0xff] %v8272_v20  ;;  %v8280_v22 = vpop.xlane.xlu0 %1227  ;;  %v1858_v23 = vsel %vm997_vm0, %v8272_v20, 0.0  ;;  %v8285_v0 = vadd.f32 %v8234_v6, %v1423_v10  ;;  %v1386_v14 = vmul.f32 %v6806_v28, %v8049_v2  ;;  %6815 = vrsqrt.f32 %v1327_v18 }
 0x287   : > { %10833 = vst [vmem:[#allocation26_spill] sm:$0xff] %v8275_v60  ;;  %v1526_v30 = vrot.slane %v8275_v60, 1  ;;  %v1623_v32 = vrot.slane %v8275_v60, 7  ;;  %v1719_v27 = vsel %vm997_vm0, %v8275_v60, 0.0  ;;  %v1424_v11 = vmul.f32 %v8218_v52, %v1385_v61 }
 0x288   : > { %10834 = vst [vmem:[#allocation27_spill] sm:$0xff] %v8285_v0  ;;  %v1720_v34 = vadd.f32 %v1719_v27, %v1718_v12  ;;  %v1528_v48 = vrot.slane %v8285_v0, 1  ;;  %v1625_v38 = vrot.slane %v8285_v0, 7  ;;  %v1721_v39 = vsel %vm997_vm0, %v8285_v0, 0.0  ;;  %v6808_v50 = vpop.eup %6807 }
 0x289   : > { %v8298_v2 = vsel %vm1524_vm3, %v1525_v56, %v1526_v30  ;;  %v8301_v42 = vsel %vm1524_vm3, %v1526_v30, 0.0  ;;  %v8304_v46 = vsel %vm1621_vm2, %v1622_v62, %v1623_v32  ;;  %v8307_v36 = vadd.f32 %v8234_v6, %v1424_v11  ;;  %v8318_v26 = vpop.xlane.xlu1 %1230  ;;  %v6810_v28 = vpop.eup %6809 }
 0x28a   : > { %10835 = vst [vmem:[#allocation28_spill] sm:$0xff] %v8298_v2  ;;  %10836 = vst [vmem:[#allocation29_spill] sm:$0xff] %v8301_v42  ;;  %v1788_v54 = vsel %vm997_vm0, %v8298_v2, 0.0  ;;  %v1789_v8 = vsel %vm997_vm0, %v8301_v42, 0.0  ;;  %v1859_v58 = vsel %vm997_vm0, %v8304_v46, 0.0  ;;  %v8316_v40 = vsel %vm1621_vm2, 0.0, %v1625_v38  ;;  %v8322_v18 = vpop.xlane.xlu0 %1233 }
 0x28b   : > { %10837 = vst [vmem:[#allocation30_spill] sm:$0xff] %v8304_v46  ;;  %10838 = vst [vmem:[#allocation31_spill] sm:$0xff] %v8307_v36  ;;  %v1790_v62 = vadd.f32 %v1789_v8, %v1788_v54  ;;  %v1860_v56 = vadd.f32 %v1859_v58, %v1858_v23  ;;  %v1722_v12 = vadd.f32 %v1721_v39, %v1720_v34  ;;  %v1861_v10 = vsel %vm997_vm0, %v8316_v40, 0.0 }
 0x28c   : > { %10839 = vst [vmem:[#allocation32_spill] sm:$0xff] %v8316_v40  ;;  %v1529_v61 = vrot.slane %v8307_v36, 1  ;;  %v1626_v30 = vrot.slane %v8307_v36, 7  ;;  %v1723_v32 = vsel %vm997_vm0, %v8307_v36, 0.0  ;;  %v1425_v27 = vmul.f32 %v8218_v52, %v1386_v14  ;;  %v6812_v11 = vpop.eup %6811 }
 0x28d   : > { %v1862_v24 = vadd.f32 %v1861_v10, %v1860_v56  ;;  %v1724_v54 = vadd.f32 %v1723_v32, %v1722_v12  ;;  %v1928_v23 = vadd.f32 %v1723_v32, %v1721_v39  ;;  %v1387_v34 = vmul.f32 %v6808_v50, %v8052_v5 }
 0x28e   : > { %v8331_v8 = vsel %vm1524_vm3, %v1528_v48, %v1529_v61  ;;  %v8334_v58 = vsel %vm1524_vm3, %v1529_v61, 0.0  ;;  %v8337_v60 = vsel %vm1621_vm2, %v1625_v38, %v1626_v30  ;;  %v8340_v16 = vadd.f32 %v8234_v6, %v1425_v27  ;;  %v6814_v36 = vpop.eup %6813  ;;  %v8351_v61 = vpop.xlane.xlu1 %1236 }
 0x28f   : > { %10840 = vst [vmem:[#allocation33_spill] sm:$0xff] %v8331_v8  ;;  %10841 = vst [vmem:[#allocation34_spill] sm:$0xff] %v8334_v58  ;;  %v1791_v14 = vsel %vm997_vm0, %v8331_v8, 0.0  ;;  %v1793_v39 = vsel %vm997_vm0, %v8334_v58, 0.0  ;;  %v1863_v5 = vsel %vm997_vm0, %v8337_v60, 0.0  ;;  %v1426_v48 = vmul.f32 %v8218_v52, %v1387_v34  ;;  %v8360_v34 = vpop.xlane.xlu0 %1239 }
 0x290   : > { %10842 = vst [vmem:[#allocation35_spill] sm:$0xff] %v8337_v60  ;;  %10843 = vst [vmem:[#allocation36_spill] sm:$0xff] %v8340_v16  ;;  %v6816_v50 = vpop.eup %6815  ;;  %v1792_v56 = vadd.f32 %v1791_v14, %v1790_v62  ;;  %v1864_v12 = vadd.f32 %v1863_v5, %v1862_v24  ;;  %v1531_v38 = vrot.slane %v8340_v16, 1  ;;  %v1628_v10 = vrot.slane %v8340_v16, 7 }
 0x291   : > { %v1725_v30 = vsel %vm997_vm0, %v8340_v16, 0.0  ;;  %v8356_v32 = vadd.f32 %v8234_v6, %v1426_v48  ;;  %v1388_v27 = vmul.f32 %v6810_v28, %v8061_v55  ;;  %v1389_v0 = vmul.f32 %v6812_v11, %v8064_v9 }
 0x292   : > { %v1794_v62 = vadd.f32 %v1793_v39, %v1792_v56  ;;  %v8363_v24 = vsel %vm1621_vm2, 0.0, %v1628_v10  ;;  %v1726_v14 = vadd.f32 %v1725_v30, %v1724_v54  ;;  %v1929_v5 = vadd.f32 %v1928_v23, %v1725_v30 }
 0x293   : > { %10844 = vst [vmem:[#allocation37_spill] sm:$0xff] %v8356_v32  ;;  %10845 = vst [vmem:[#allocation38_spill] sm:$0xff] %v8363_v24  ;;  %v1865_v58 = vsel %vm997_vm0, %v8363_v24, 0.0  ;;  %v1532_v16 = vrot.slane %v8356_v32, 1  ;;  %v1629_v48 = vrot.slane %v8356_v32, 7  ;;  %v1727_v55 = vsel %vm997_vm0, %v8356_v32, 0.0 }
 0x294   : > { %v1866_v28 = vadd.f32 %v1865_v58, %v1864_v12  ;;  %v1728_v9 = vadd.f32 %v1727_v55, %v1726_v14  ;;  %v1930_v11 = vadd.f32 %v1929_v5, %v1727_v55  ;;  %v1427_v39 = vmul.f32 %v8218_v52, %v1388_v27  ;;  %v8390_v27 = vpop.xlane.xlu1 %1242  ;;  %v8398_v5 = vpop.xlane.xlu0 %1245 }
 0x295   : > { %v8373_v56 = vsel %vm1524_vm3, %v1531_v38, %v1532_v16  ;;  %v8376_v54 = vsel %vm1524_vm3, %v1532_v16, 0.0  ;;  %v8379_v23 = vsel %vm1621_vm2, %v1628_v10, %v1629_v48  ;;  %v1428_v30 = vmul.f32 %v8218_v52, %v1389_v0 }
 0x296   : > { %10846 = vst [vmem:[#allocation39_spill] sm:$0xff] %v8373_v56  ;;  %10847 = vst [vmem:[#allocation40_spill] sm:$0xff] %v8376_v54  ;;  %v1795_v24 = vsel %vm997_vm0, %v8373_v56, 0.0  ;;  %v1867_v58 = vsel %vm997_vm0, %v8379_v23, 0.0  ;;  %v8387_v12 = vadd.f32 %v8234_v6, %v1427_v39  ;;  %v1328_v38 = vadd.f32 1e-05, %v8263_v3 }
 0x297   : > { %10848 = vst [vmem:[#allocation41_spill] sm:$0xff] %v8379_v23  ;;  %v1796_v16 = vadd.f32 %v1795_v24, %v1794_v62  ;;  %v1797_v10 = vsel %vm997_vm0, %v8376_v54, 0.0  ;;  %v8395_v14 = vadd.f32 %v8234_v6, %v1428_v30  ;;  %v1390_v0 = vmul.f32 %v6814_v36, %v8073_v7 }
 0x298   : > { %10849 = vst [vmem:[#allocation42_spill] sm:$0xff] %v8387_v12  ;;  %v1868_v48 = vadd.f32 %v1867_v58, %v1866_v28  ;;  %v1534_v55 = vrot.slane %v8387_v12, 1  ;;  %v1631_v39 = vrot.slane %v8387_v12, 7  ;;  %v1729_v3 = vsel %vm997_vm0, %v8387_v12, 0.0  ;;  %v1249_v56 = vpop.xlane.xlu1 %1248 }
 0x299   : > { %10850 = vst [vmem:[#allocation43_spill] sm:$0xff] %v8395_v14  ;;  %v1730_v32 = vadd.f32 %v1729_v3, %v1728_v9  ;;  %v1931_v62 = vadd.f32 %v1930_v11, %v1729_v3  ;;  %v1535_v24 = vrot.slane %v8395_v14, 1  ;;  %v1391_v54 = vmul.f32 %v6816_v50, %v8076_v13 }
 0x29a   : > { %v8407_v30 = vsel %vm1621_vm2, 0.0, %v1631_v39  ;;  %v1632_v7 = vrot.slane %v8395_v14, 7  ;;  %v1731_v36 = vsel %vm997_vm0, %v8395_v14, 0.0  ;;  %v1429_v28 = vmul.f32 %v8218_v52, %v1390_v0 }
 0x29b   : > { %10851 = vst [vmem:[#allocation44_spill] sm:$0xff] %v8407_v30  ;;  %v1798_v58 = vadd.f32 %v1797_v10, %v1796_v16  ;;  %v1869_v12 = vsel %vm997_vm0, %v8407_v30, 0.0  ;;  %v8416_v9 = vsel %vm1524_vm3, %v1534_v55, %v1535_v24  ;;  %v8419_v11 = vsel %vm1524_vm3, %v1535_v24, 0.0  ;;  %v1252_v55 = vpop.xlane.xlu0 %1251 }
 0x29c   : > { %10852 = vst [vmem:[#allocation45_spill] sm:$0xff] %v8416_v9  ;;  %10853 = vst [vmem:[#allocation46_spill] sm:$0xff] %v8419_v11  ;;  %v1870_v13 = vadd.f32 %v1869_v12, %v1868_v48  ;;  %v8422_v50 = vsel %vm1621_vm2, %v1631_v39, %v1632_v7  ;;  %v1732_v3 = vadd.f32 %v1731_v36, %v1730_v32  ;;  %v1799_v14 = vsel %vm997_vm0, %v8416_v9, 0.0 }
 0x29d   : > { %10854 = vst [vmem:[#allocation47_spill] sm:$0xff] %v8422_v50  ;;  %v1871_v16 = vsel %vm997_vm0, %v8422_v50, 0.0  ;;  %v1932_v10 = vadd.f32 %v1931_v62, %v1731_v36  ;;  %v8429_v0 = vadd.f32 %v8234_v6, %v1429_v28  ;;  %v1801_v24 = vsel %vm997_vm0, %v8419_v11, 0.0 }
 0x29e   : > { %v1430_v12 = vmul.f32 %v8218_v52, %v1391_v54  ;;  %6817 = vrsqrt.f32 %v1328_v38  ;;  %v1297_v32 = vmul.f32 0.03125, %v8278_v44  ;;  %v1800_v48 = vadd.f32 %v1799_v14, %v1798_v58 }
 0x29f   : > { %10855 = vst [vmem:[#allocation48_spill] sm:$0xff] %v8429_v0  ;;  %v1872_v39 = vadd.f32 %v1871_v16, %v1870_v13  ;;  %v1634_v7 = vrot.slane %v8429_v0, 7  ;;  %v1733_v9 = vsel %vm997_vm0, %v8429_v0, 0.0  ;;  %v1537_v62 = vrot.slane %v8429_v0, 1  ;;  %v1255_v16 = vpop.xlane.xlu1 %1254 }
 0x2a0   : > { %v1734_v36 = vadd.f32 %v1733_v9, %v1732_v3  ;;  %v8440_v28 = vadd.f32 %v8234_v6, %v1430_v12  ;;  %v1329_v50 = vadd.f32 1e-05, %v1297_v32  ;;  %v1933_v54 = vadd.f32 %v1932_v10, %v1733_v9  ;;  %v1258_v9 = vpop.xlane.xlu0 %1257 }
 0x2a1   : > { %v8443_v11 = vsel %vm1621_vm2, 0.0, %v1634_v7  ;;  %v1298_v44 = vmul.f32 0.03125, %v8280_v22  ;;  %v1299_v38 = vmul.f32 0.03125, %v8318_v26  ;;  %v1300_v3 = vmul.f32 0.03125, %v8322_v18 }
 0x2a2   : > { %10856 = vst [vmem:[#allocation49_spill] sm:$0xff] %v8440_v28  ;;  %10857 = vst [vmem:[#allocation50_spill] sm:$0xff] %v8443_v11  ;;  %v1538_v14 = vrot.slane %v8440_v28, 1  ;;  %v1635_v58 = vrot.slane %v8440_v28, 7  ;;  %v1735_v13 = vsel %vm997_vm0, %v8440_v28, 0.0  ;;  %v1802_v12 = vadd.f32 %v1801_v24, %v1800_v48 }
 0x2a3   : > { %v1873_v32 = vsel %vm997_vm0, %v8443_v11, 0.0  ;;  %6819 = vrsqrt.f32 %v1329_v50  ;;  %v1330_v0 = vadd.f32 1e-05, %v1298_v44  ;;  %v1736_v30 = vadd.f32 %v1735_v13, %v1734_v36 }
 0x2a4   : > { %v1874_v10 = vadd.f32 %v1873_v32, %v1872_v39  ;;  %v8455_v22 = vsel %vm1524_vm3, %v1537_v62, %v1538_v14  ;;  %v8458_v26 = vsel %vm1621_vm2, %v1634_v7, %v1635_v58  ;;  %v1934_v18 = vadd.f32 %v1933_v54, %v1735_v13 }
 0x2a5   : > { %10858 = vst [vmem:[#allocation51_spill] sm:$0xff] %v8455_v22  ;;  %10859 = vst [vmem:[#allocation52_spill] sm:$0xff] %v8458_v26  ;;  %v1803_v28 = vsel %vm997_vm0, %v8455_v22, 0.0  ;;  %v1331_v23 = vadd.f32 1e-05, %v1299_v38  ;;  %v8463_v24 = vsel %vm1524_vm3, %v1538_v14, 0.0  ;;  %6821 = vrsqrt.f32 %v1330_v0  ;;  %v1261_v14 = vpop.xlane.xlu1 %1260 }
 0x2a6   : > { %10860 = vst [vmem:[#allocation53_spill] sm:$0xff] %v8463_v24  ;;  %v1875_v50 = vsel %vm997_vm0, %v8458_v26, 0.0  ;;  %v1332_v48 = vadd.f32 1e-05, %v1300_v3  ;;  %v1301_v39 = vmul.f32 0.03125, %v8351_v61  ;;  %v1302_v7 = vmul.f32 0.03125, %v8360_v34  ;;  %v1264_v3 = vpop.xlane.xlu0 %1263 }
 0x2a7   : > { %6823 = vrsqrt.f32 %v1331_v23  ;;  %v1303_v62 = vmul.f32 0.03125, %v8390_v27  ;;  %v1804_v44 = vadd.f32 %v1803_v28, %v1802_v12  ;;  %v1304_v54 = vmul.f32 0.03125, %v8398_v5 }
 0x2a8   : > { %v6818_v36 = vpop.eup %6817  ;;  %6825 = vrsqrt.f32 %v1332_v48  ;;  %v1305_v38 = vmul.f32 0.03125, %v1249_v56  ;;  %v1805_v58 = vsel %vm997_vm0, %v8463_v24, 0.0  ;;  %v1333_v13 = vadd.f32 1e-05, %v1301_v39 }
 0x2a9   : > { %v1392_v0 = vmul.f32 %v6818_v36, %v8085_v1  ;;  %v1334_v23 = vadd.f32 1e-05, %v1302_v7  ;;  %v1876_v61 = vadd.f32 %v1875_v50, %v1874_v10  ;;  %v1335_v32 = vadd.f32 1e-05, %v1303_v62 }
 0x2aa   : > { %v1306_v34 = vmul.f32 0.03125, %v1252_v55  ;;  %v1307_v22 = vmul.f32 0.03125, %v1255_v16  ;;  %v1336_v28 = vadd.f32 1e-05, %v1304_v54  ;;  %v1308_v12 = vmul.f32 0.03125, %v1258_v9 }
 0x2ab   : > { %v1431_v27 = vmul.f32 %v8218_v52, %v1392_v0  ;;  %v1309_v48 = vmul.f32 0.03125, %v1261_v14  ;;  %v1806_v5 = vadd.f32 %v1805_v58, %v1804_v44  ;;  %6827 = vrsqrt.f32 %v1333_v13 }
 0x2ac   : > { %v1337_v56 = vadd.f32 1e-05, %v1305_v38  ;;  %v1310_v26 = vmul.f32 0.03125, %v1264_v3  ;;  %6829 = vrsqrt.f32 %v1334_v23  ;;  %v1338_v1 = vadd.f32 1e-05, %v1306_v34 }
 0x2ad   : > { %v6820_v11 = vpop.eup %6819  ;;  %v8476_v24 = vadd.f32 %v8234_v6, %v1431_v27  ;;  %v1339_v39 = vadd.f32 1e-05, %v1307_v22  ;;  %6831 = vrsqrt.f32 %v1335_v32  ;;  %v1340_v55 = vadd.f32 1e-05, %v1308_v12 }
 0x2ae   : > { %v1393_v10 = vmul.f32 %v6820_v11, %v8088_v15  ;;  %v8479_v16 = vadd.f32 1e-05, %v1309_v48  ;;  %6833 = vrsqrt.f32 %v1336_v28  ;;  %v8484_v7 = vadd.f32 1e-05, %v1310_v26 }
 0x2af   : > { %10861 = vst [vmem:[#allocation54_spill] sm:$0xff] %v8476_v24  ;;  %v1637_v9 = vrot.slane %v8476_v24, 7  ;;  %v1737_v50 = vsel %vm997_vm0, %v8476_v24, 0.0  ;;  %v6822_v62 = vpop.eup %6821  ;;  %v1540_v36 = vrot.slane %v8476_v24, 1  ;;  %6835 = vrsqrt.f32 %v1337_v56 }
 0x2b0   : > { %v1738_v44 = vadd.f32 %v1737_v50, %v1736_v30  ;;  %v1432_v22 = vmul.f32 %v8218_v52, %v1393_v10  ;;  %v1935_v54 = vadd.f32 %v1934_v18, %v1737_v50  ;;  %v1394_v38 = vmul.f32 %v6822_v62, %v8097_v43 }
 0x2b1   : > { %v6824_v15 = vpop.eup %6823  ;;  %v8489_v11 = vsel %vm1621_vm2, 0.0, %v1637_v9  ;;  %6837 = vrsqrt.f32 %v1338_v1 }
 0x2b2   : > { %10862 = vst [vmem:[#allocation55_spill] sm:$0xff] %v8489_v11  ;;  %v6826_v14 = vpop.eup %6825  ;;  %v1877_v26 = vsel %vm997_vm0, %v8489_v11, 0.0  ;;  %v8495_v58 = vadd.f32 %v8234_v6, %v1432_v22  ;;  %v1395_v30 = vmul.f32 %v6824_v15, %v8100_v17  ;;  %6839 = vrsqrt.f32 %v1339_v39 }
 0x2b3   : > { %v1878_v0 = vadd.f32 %v1877_v26, %v1876_v61  ;;  %v1433_v13 = vmul.f32 %v8218_v52, %v1394_v38  ;;  %v1396_v23 = vmul.f32 %v6826_v14, %v8109_v59  ;;  %6841 = vrsqrt.f32 %v1340_v55 }
 0x2b4   : > { %10863 = vst [vmem:[#allocation56_spill] sm:$0xff] %v8495_v58  ;;  %v1541_v18 = vrot.slane %v8495_v58, 1  ;;  %v1638_v43 = vrot.slane %v8495_v58, 7  ;;  %v1739_v3 = vsel %vm997_vm0, %v8495_v58, 0.0  ;;  %v1434_v32 = vmul.f32 %v8218_v52, %v1395_v30 }
 0x2b5   : > { %v1740_v34 = vadd.f32 %v1739_v3, %v1738_v44  ;;  %v1936_v27 = vadd.f32 %v1935_v54, %v1739_v3  ;;  %v8506_v17 = vadd.f32 %v8234_v6, %v1433_v13  ;;  %v1435_v61 = vmul.f32 %v8218_v52, %v1396_v23  ;;  %v6828_v28 = vpop.eup %6827 }
 0x2b6   : > { %v8510_v59 = vsel %vm1524_vm3, %v1540_v36, %v1541_v18  ;;  %v8513_v12 = vsel %vm1524_vm3, %v1541_v18, 0.0  ;;  %v8516_v48 = vsel %vm1621_vm2, %v1637_v9, %v1638_v43  ;;  %v8519_v56 = vadd.f32 %v8234_v6, %v1434_v32  ;;  %v6830_v1 = vpop.eup %6829 }
 0x2b7   : > { %10864 = vst [vmem:[#allocation57_spill] sm:$0xff] %v8506_v17  ;;  %10865 = vst [vmem:[#allocation58_spill] sm:$0xff] %v8510_v59  ;;  %v1807_v39 = vsel %vm997_vm0, %v8510_v59, 0.0  ;;  %v1809_v10 = vsel %vm997_vm0, %v8513_v12, 0.0  ;;  %v1879_v55 = vsel %vm997_vm0, %v8516_v48, 0.0  ;;  %v1543_v50 = vrot.slane %v8506_v17, 1  ;;  %v6832_v62 = vpop.eup %6831 }
 0x2b8   : > { %10866 = vst [vmem:[#allocation59_spill] sm:$0xff] %v8513_v12  ;;  %10867 = vst [vmem:[#allocation60_spill] sm:$0xff] %v8516_v48  ;;  %v1808_v36 = vadd.f32 %v1807_v39, %v1806_v5  ;;  %v1880_v44 = vadd.f32 %v1879_v55, %v1878_v0  ;;  %v1640_v9 = vrot.slane %v8506_v17, 7  ;;  %v1741_v22 = vsel %vm997_vm0, %v8506_v17, 0.0  ;;  %v6834_v15 = vpop.eup %6833 }
 0x2b9   : > { %10868 = vst [vmem:[#allocation61_spill] sm:$0xff] %v8519_v56  ;;  %v1742_v54 = vadd.f32 %v1741_v22, %v1740_v34  ;;  %v1937_v38 = vadd.f32 %v1936_v27, %v1741_v22  ;;  %v1544_v14 = vrot.slane %v8519_v56, 1  ;;  %v1641_v26 = vrot.slane %v8519_v56, 7  ;;  %v6836_v30 = vpop.eup %6835 }
 0x2ba   : > { %v1810_v13 = vadd.f32 %v1809_v10, %v1808_v36  ;;  %v8534_v23 = vsel %vm1621_vm2, 0.0, %v1640_v9  ;;  %v1743_v5 = vsel %vm997_vm0, %v8519_v56, 0.0  ;;  %v8539_v0 = vadd.f32 %v8234_v6, %v1435_v61 }
 0x2bb   : > { %10869 = vst [vmem:[#allocation62_spill] sm:$0xff] %v8534_v23  ;;  %v6838_v18 = vpop.eup %6837  ;;  %v1881_v43 = vsel %vm997_vm0, %v8534_v23, 0.0  ;;  %v8544_v3 = vsel %vm1524_vm3, %v1543_v50, %v1544_v14  ;;  %v8547_v32 = vsel %vm1524_vm3, %v1544_v14, 0.0  ;;  %v8550_v34 = vsel %vm1621_vm2, %v1640_v9, %v1641_v26 }
 0x2bc   : > { %10870 = vst [vmem:[#allocation63_spill] sm:$0xff] %v8539_v0  ;;  %10871 = vst [vmem:[#allocation64_spill] sm:$0xff] %v8544_v3  ;;  %v8552_v27 = vpop.eup %6839  ;;  %v1882_v39 = vadd.f32 %v1881_v43, %v1880_v44  ;;  %v1744_v10 = vadd.f32 %v1743_v5, %v1742_v54  ;;  %v1811_v61 = vsel %vm997_vm0, %v8544_v3, 0.0  ;;  %6843 = vrsqrt.f32 %v8479_v16 }
 0x2bd   : > { %10872 = vst [vmem:[#allocation65_spill] sm:$0xff] %v8547_v32  ;;  %10873 = vst [vmem:[#allocation66_spill] sm:$0xff] %v8550_v34  ;;  %v8557_v55 = vpop.eup %6841  ;;  %v1812_v36 = vadd.f32 %v1811_v61, %v1810_v13  ;;  %v1813_v50 = vsel %vm997_vm0, %v8547_v32, 0.0  ;;  %v1883_v22 = vsel %vm997_vm0, %v8550_v34, 0.0  ;;  %v1938_v9 = vadd.f32 %v1937_v38, %v1743_v5 }
 0x2be   : > { %v1884_v14 = vadd.f32 %v1883_v22, %v1882_v39  ;;  %v1643_v26 = vrot.slane %v8539_v0, 7  ;;  %v1745_v44 = vsel %vm997_vm0, %v8539_v0, 0.0  ;;  %v1397_v54 = vmul.f32 %v6828_v28, %v8112_v25 }
 0x2bf   : > { %v1546_v16 = vrot.slane %v8539_v0, 1  ;;  %v1746_v43 = vadd.f32 %v1745_v44, %v1744_v10  ;;  %v1939_v56 = vadd.f32 %v1938_v9, %v1745_v44  ;;  %v1398_v13 = vmul.f32 %v6830_v1, %v8121_v19 }
 0x2c0   : > { %v8570_v61 = vsel %vm1621_vm2, 0.0, %v1643_v26  ;;  %v1436_v17 = vmul.f32 %v8218_v52, %v1397_v54  ;;  %v1399_v38 = vmul.f32 %v6832_v62, %v8124_v29  ;;  %v1400_v5 = vmul.f32 %v6834_v15, %v8133_v31 }
 0x2c1   : > { %10874 = vst [vmem:[#allocation67_spill] sm:$0xff] %v8570_v61  ;;  %v1885_v39 = vsel %vm997_vm0, %v8570_v61, 0.0  ;;  %v1437_v25 = vmul.f32 %v8218_v52, %v1398_v13  ;;  %v1401_v28 = vmul.f32 %v6836_v30, %v8136_v33  ;;  %v1402_v10 = vmul.f32 %v6838_v18, %v8145_v47 }
 0x2c2   : > { %v1814_v22 = vadd.f32 %v1813_v50, %v1812_v36  ;;  %v1886_v19 = vadd.f32 %v1885_v39, %v1884_v14  ;;  %v8581_v1 = vadd.f32 %v8234_v6, %v1436_v17  ;;  %v1438_v9 = vmul.f32 %v8218_v52, %v1399_v38 }
 0x2c3   : > { %v8585_v29 = vadd.f32 %v8234_v6, %v1437_v25  ;;  %v1439_v31 = vmul.f32 %v8218_v52, %v1400_v5  ;;  %v1440_v62 = vmul.f32 %v8218_v52, %v1401_v28  ;;  %v1441_v15 = vmul.f32 %v8218_v52, %v1402_v10 }
 0x2c4   : > { %10875 = vst [vmem:[#allocation68_spill] sm:$0xff] %v8581_v1  ;;  %v1547_v33 = vrot.slane %v8581_v1, 1  ;;  %v1644_v47 = vrot.slane %v8581_v1, 7  ;;  %v1747_v30 = vsel %vm997_vm0, %v8581_v1, 0.0  ;;  %v8595_v17 = vadd.f32 %v8234_v6, %v1438_v9 }
 0x2c5   : > { %10876 = vst [vmem:[#allocation69_spill] sm:$0xff] %v8585_v29  ;;  %v1748_v18 = vadd.f32 %v1747_v30, %v1746_v43  ;;  %v1940_v36 = vadd.f32 %v1939_v56, %v1747_v30  ;;  %v1549_v50 = vrot.slane %v8585_v29, 1  ;;  %v1646_v14 = vrot.slane %v8585_v29, 7 }
 0x2c6   : > { %10877 = vst [vmem:[#allocation70_spill] sm:$0xff] %v8595_v17  ;;  %v8599_v44 = vpop.eup %6843  ;;  %v8602_v54 = vsel %vm1524_vm3, %v1546_v16, %v1547_v33  ;;  %v8605_v13 = vsel %vm1524_vm3, %v1547_v33, 0.0  ;;  %v8608_v38 = vsel %vm1621_vm2, %v1643_v26, %v1644_v47  ;;  %v1749_v5 = vsel %vm997_vm0, %v8585_v29, 0.0  ;;  %v1267_v29 = vpop.xlane.xlu1 %1266 }
 0x2c7   : > { %10878 = vst [vmem:[#allocation71_spill] sm:$0xff] %v8608_v38  ;;  %v1815_v56 = vsel %vm997_vm0, %v8602_v54, 0.0  ;;  %v1817_v43 = vsel %vm997_vm0, %v8605_v13, 0.0  ;;  %v1887_v39 = vsel %vm997_vm0, %v8608_v38, 0.0  ;;  %v8619_v16 = vsel %vm1621_vm2, 0.0, %v1646_v14 }
 0x2c8   : > { %v1816_v25 = vadd.f32 %v1815_v56, %v1814_v22  ;;  %v1888_v28 = vadd.f32 %v1887_v39, %v1886_v19  ;;  %v1750_v10 = vadd.f32 %v1749_v5, %v1748_v18  ;;  %v1889_v26 = vsel %vm997_vm0, %v8619_v16, 0.0 }
 0x2c9   : > { %v1941_v9 = vadd.f32 %v1940_v36, %v1749_v5  ;;  %v1550_v33 = vrot.slane %v8595_v17, 1  ;;  %v1647_v47 = vrot.slane %v8595_v17, 7  ;;  %v1751_v30 = vsel %vm997_vm0, %v8595_v17, 0.0 }
 0x2ca   : > { %v1818_v1 = vadd.f32 %v1817_v43, %v1816_v25  ;;  %v1890_v0 = vadd.f32 %v1889_v26, %v1888_v28  ;;  %v1752_v58 = vadd.f32 %v1751_v30, %v1750_v10  ;;  %v8628_v24 = vadd.f32 %v8234_v6, %v1439_v31 }
 0x2cb   : > { %v8631_v22 = vsel %vm1524_vm3, %v1549_v50, %v1550_v33  ;;  %v8634_v19 = vsel %vm1524_vm3, %v1550_v33, 0.0  ;;  %v8637_v18 = vsel %vm1621_vm2, %v1646_v14, %v1647_v47  ;;  %v1942_v36 = vadd.f32 %v1941_v9, %v1751_v30 }
 0x2cc   : > { %10879 = vst [vmem:[#allocation72_spill] sm:$0xff] %v8628_v24  ;;  %v1819_v5 = vsel %vm997_vm0, %v8631_v22, 0.0  ;;  %v1891_v56 = vsel %vm997_vm0, %v8637_v18, 0.0  ;;  %v1403_v31 = vmul.f32 %v8552_v27, %v8148_v37  ;;  %v1311_v43 = vmul.f32 0.03125, %v1267_v29 }
 0x2cd   : > { %v1820_v39 = vadd.f32 %v1819_v5, %v1818_v1  ;;  %v1892_v50 = vadd.f32 %v1891_v56, %v1890_v0  ;;  %v1649_v25 = vrot.slane %v8628_v24, 7  ;;  %v1753_v28 = vsel %vm997_vm0, %v8628_v24, 0.0 }
 0x2ce   : > { %v1821_v14 = vsel %vm997_vm0, %v8634_v19, 0.0  ;;  %v1754_v10 = vadd.f32 %v1753_v28, %v1752_v58  ;;  %v8651_v26 = vadd.f32 %v8234_v6, %v1440_v62  ;;  %v8654_v9 = vadd.f32 %v8234_v6, %v1441_v15 }
 0x2cf   : > { %v1822_v33 = vadd.f32 %v1821_v14, %v1820_v39  ;;  %v1552_v37 = vrot.slane %v8628_v24, 1  ;;  %v8658_v0 = vsel %vm1621_vm2, 0.0, %v1649_v25  ;;  %v1943_v27 = vadd.f32 %v1942_v36, %v1753_v28 }
 0x2d0   : > { %10880 = vst [vmem:[#allocation73_spill] sm:$0xff] %v8651_v26  ;;  %10881 = vst [vmem:[#allocation74_spill] sm:$0xff] %v8654_v9  ;;  %v1893_v1 = vsel %vm997_vm0, %v8658_v0, 0.0  ;;  %v1553_v29 = vrot.slane %v8651_v26, 1  ;;  %v1650_v58 = vrot.slane %v8651_v26, 7  ;;  %v1755_v62 = vsel %vm997_vm0, %v8651_v26, 0.0 }
 0x2d1   : > { %10882 = vst [vmem:[#allocation75_spill] sm:$0xff] %v8658_v0  ;;  %v1894_v47 = vadd.f32 %v1893_v1, %v1892_v50  ;;  %v1756_v15 = vadd.f32 %v1755_v62, %v1754_v10  ;;  %v1442_v30 = vmul.f32 %v8218_v52, %v1403_v31  ;;  %v1404_v5 = vmul.f32 %v8557_v55, %v8157_v63  ;;  %v1270_v10 = vpop.xlane.xlu0 %1269 }
 0x2d2   : > { %v8670_v56 = vsel %vm1524_vm3, %v1552_v37, %v1553_v29  ;;  %v8673_v36 = vsel %vm1524_vm3, %v1553_v29, 0.0  ;;  %v8676_v39 = vsel %vm1621_vm2, %v1649_v25, %v1650_v58  ;;  %v1652_v28 = vrot.slane %v8654_v9, 7  ;;  %v1273_v29 = vpop.xlane.xlu1 %1272 }
 0x2d3   : > { %v1823_v50 = vsel %vm997_vm0, %v8670_v56, 0.0  ;;  %v1895_v31 = vsel %vm997_vm0, %v8676_v39, 0.0  ;;  %v1944_v14 = vadd.f32 %v1943_v27, %v1755_v62  ;;  %v1825_v55 = vsel %vm997_vm0, %v8673_v36, 0.0 }
 0x2d4   : > { %v1824_v63 = vadd.f32 %v1823_v50, %v1822_v33  ;;  %v1555_v37 = vrot.slane %v8654_v9, 1  ;;  %v1343_v1 = vadd.f32 1e-05, %v1311_v43  ;;  %v1896_v25 = vadd.f32 %v1895_v31, %v1894_v47 }
 0x2d5   : > { %v1757_v58 = vsel %vm997_vm0, %v8654_v9, 0.0  ;;  %v8689_v26 = vadd.f32 %v8234_v6, %v1442_v30  ;;  %v1443_v24 = vmul.f32 %v8218_v52, %v1404_v5  ;;  %v8693_v27 = vsel %vm1621_vm2, 0.0, %v1652_v28 }
 0x2d6   : > { %v1758_v33 = vadd.f32 %v1757_v58, %v1756_v15  ;;  %v1405_v62 = vmul.f32 %v8599_v44, %v8160_v41  ;;  %6845 = vrsqrt.f32 %v8484_v7  ;;  %v1945_v43 = vadd.f32 %v1944_v14, %v1757_v58  ;;  %v1276_v15 = vpop.xlane.xlu0 %1275 }
 0x2d7   : > { %10883 = vst [vmem:[#allocation76_spill] sm:$0xff] %v8689_v26  ;;  %v1556_v47 = vrot.slane %v8689_v26, 1  ;;  %v1653_v50 = vrot.slane %v8689_v26, 7  ;;  %v8701_v31 = vadd.f32 %v8234_v6, %v1443_v24  ;;  %v1826_v30 = vadd.f32 %v1825_v55, %v1824_v63  ;;  %v1279_v63 = vpop.xlane.xlu1 %1278 }
 0x2d8   : > { %v1759_v5 = vsel %vm997_vm0, %v8689_v26, 0.0  ;;  %v1444_v9 = vmul.f32 %v8218_v52, %v1405_v62  ;;  %6847 = vrsqrt.f32 %v1343_v1  ;;  %v1897_v41 = vsel %vm997_vm0, %v8693_v27, 0.0 }
 0x2d9   : > { %v8709_v7 = vsel %vm1524_vm3, %v1555_v37, %v1556_v47  ;;  %v8712_v44 = vsel %vm1621_vm2, %v1652_v28, %v1653_v50  ;;  %v1898_v14 = vadd.f32 %v1897_v41, %v1896_v25  ;;  %v1760_v55 = vadd.f32 %v1759_v5, %v1758_v33 }
 0x2da   : > { %v1827_v24 = vsel %vm997_vm0, %v8709_v7, 0.0  ;;  %v1946_v58 = vadd.f32 %v1945_v43, %v1759_v5  ;;  %v1655_v62 = vrot.slane %v8701_v31, 7  ;;  %v8718_v1 = vadd.f32 %v8234_v6, %v1444_v9 }
 0x2db   : > { %v8721_v26 = vsel %vm1524_vm3, %v1556_v47, 0.0  ;;  %v1828_v37 = vadd.f32 %v1827_v24, %v1826_v30  ;;  %v1899_v28 = vsel %vm997_vm0, %v8712_v44, 0.0  ;;  %v1312_v50 = vmul.f32 0.03125, %v1270_v10  ;;  %v1282_v24 = vpop.xlane.xlu0 %1281 }
 0x2dc   : > { %v1559_v25 = vrot.slane %v8718_v1, 1  ;;  %v1558_v41 = vrot.slane %v8701_v31, 1  ;;  %v1656_v33 = vrot.slane %v8718_v1, 7  ;;  %v1313_v5 = vmul.f32 0.03125, %v1273_v29 }
 0x2dd   : > { %v1344_v43 = vadd.f32 1e-05, %v1312_v50  ;;  %v1829_v9 = vsel %vm997_vm0, %v8721_v26, 0.0  ;;  %v1900_v17 = vadd.f32 %v1899_v28, %v1898_v14  ;;  %v8731_v47 = vsel %vm1621_vm2, 0.0, %v1655_v62  ;;  %v1285_v50 = vpop.xlane.xlu1 %1284 }
 0x2de   : > { %v1761_v30 = vsel %vm997_vm0, %v8701_v31, 0.0  ;;  %v1830_v38 = vadd.f32 %v1829_v9, %v1828_v37  ;;  %v1763_v3 = vsel %vm997_vm0, %v8718_v1, 0.0  ;;  %v8738_v29 = vsel %vm1524_vm3, %v1558_v41, %v1559_v25 }
 0x2df   : > { %v1762_v61 = vadd.f32 %v1761_v30, %v1760_v55  ;;  %v1947_v32 = vadd.f32 %v1946_v58, %v1761_v30  ;;  %6849 = vrsqrt.f32 %v1344_v43  ;;  %v1345_v28 = vadd.f32 1e-05, %v1313_v5 }
 0x2e0   : > { %v6846_v10 = vpop.eup %6845  ;;  %v8742_v23 = vsel %vm1621_vm2, %v1655_v62, %v1656_v33  ;;  %v1314_v12 = vmul.f32 0.03125, %v1276_v15  ;;  %v1315_v59 = vmul.f32 0.03125, %v1279_v63  ;;  %v1316_v37 = vmul.f32 0.03125, %v1282_v24 }
 0x2e1   : > { %v1406_v14 = vmul.f32 %v6846_v10, %v8169_v21  ;;  %6851 = vrsqrt.f32 %v1345_v28  ;;  %v1317_v9 = vmul.f32 0.03125, %v1285_v50  ;;  %v1901_v41 = vsel %vm997_vm0, %v8731_v47, 0.0 }
 0x2e2   : > { %v6848_v34 = vpop.eup %6847  ;;  %v1831_v21 = vsel %vm997_vm0, %v8738_v29, 0.0  ;;  %v1346_v43 = vadd.f32 1e-05, %v1314_v12  ;;  %v1347_v5 = vadd.f32 1e-05, %v1315_v59  ;;  %v1902_v30 = vadd.f32 %v1901_v41, %v1900_v17 }
 0x2e3   : > { %v1445_v55 = vmul.f32 %v8218_v52, %v1406_v14  ;;  %v1407_v58 = vmul.f32 %v6848_v34, %v8172_v45  ;;  %v8751_v62 = vsel %vm1524_vm3, %v1559_v25, 0.0  ;;  %v1903_v45 = vsel %vm997_vm0, %v8742_v23, 0.0 }
 0x2e4   : > { %v1948_v34 = vadd.f32 %v1947_v32, %v1763_v3  ;;  %6853 = vrsqrt.f32 %v1346_v43  ;;  %v1348_v33 = vadd.f32 1e-05, %v1316_v37  ;;  %v1832_v24 = vadd.f32 %v1831_v21, %v1830_v38 }
 0x2e5   : > { %v8754_v15 = vadd.f32 %v8234_v6, %v1445_v55  ;;  %v1446_v63 = vmul.f32 %v8218_v52, %v1407_v58  ;;  %v1349_v12 = vadd.f32 1e-05, %v1317_v9  ;;  %v1764_v17 = vadd.f32 %v1763_v3, %v1762_v61 }
 0x2e6   : > { %6855 = vrsqrt.f32 %v1347_v5  ;;  %v1833_v25 = vsel %vm997_vm0, %v8751_v62, 0.0  ;;  %v1904_v28 = vadd.f32 %v1903_v45, %v1902_v30  ;;  %v6999_v45 = vld [vmem:[#allocation5] ss:$0 sm:$0xff] }
 0x2e7   : > { %v1658_v10 = vrot.slane %v8754_v15, 7  ;;  %v8761_v59 = vadd.f32 %v8234_v6, %v1446_v63  ;;  %v1561_v52 = vrot.slane %v8754_v15, 1  ;;  %v1765_v38 = vsel %vm997_vm0, %v8754_v15, 0.0 }
 0x2e8   : > { %6857 = vrsqrt.f32 %v1348_v33  ;;  %v1834_v3 = vadd.f32 %v1833_v25, %v1832_v24  ;;  %v1949_v61 = vadd.f32 %v1948_v34, %v1765_v38  ;;  %v1766_v5 = vadd.f32 %v1765_v38, %v1764_v17 }
 0x2e9   : > { %v1562_v50 = vrot.slane %v8761_v59, 1  ;;  %v1659_v32 = vrot.slane %v8761_v59, 7  ;;  %v8769_v14 = vsel %vm1621_vm2, 0.0, %v1658_v10  ;;  %v6850_v37 = vpop.eup %6849  ;;  %6859 = vrsqrt.f32 %v1349_v12 }
 0x2ea   : > { %10884 = vst [vmem:[#allocation77_spill] sm:$0xff] %v8769_v14  ;;  %v1767_v58 = vsel %vm997_vm0, %v8761_v59, 0.0  ;;  %v1408_v9 = vmul.f32 %v6850_v37, %v8181_v35  ;;  %v1905_v30 = vsel %vm997_vm0, %v8769_v14, 0.0 }
 0x2eb   : > { %v8774_v55 = vsel %vm1524_vm3, %v1561_v52, %v1562_v50  ;;  %v8780_v41 = vsel %vm1621_vm2, %v1658_v10, %v1659_v32  ;;  %v6852_v43 = vpop.eup %6851  ;;  %v8787_v63 = vsel %vm1524_vm3, %v1562_v50, 0.0  ;;  %v1906_v24 = vadd.f32 %v1905_v30, %v1904_v28 }
 0x2ec   : > { %v1835_v21 = vsel %vm997_vm0, %v8774_v55, 0.0  ;;  %v1447_v34 = vmul.f32 %v6999_v45, %v1408_v9  ;;  %v1409_v33 = vmul.f32 %v6852_v43, %v8184_v49  ;;  %v1950_v35 = vadd.f32 %v1949_v61, %v1767_v58  ;;  %v7000_v61 = vld [vmem:[#allocation7] ss:$0 sm:$0xff] }
 0x2ed   : > { %v1907_v10 = vsel %vm997_vm0, %v8780_v41, 0.0  ;;  %v1836_v12 = vadd.f32 %v1835_v21, %v1834_v3  ;;  %v1768_v32 = vadd.f32 %v1767_v58, %v1766_v5  ;;  %v1837_v50 = vsel %vm997_vm0, %v8787_v63, 0.0 }
 0x2ee   : > { %v6854_v25 = vpop.eup %6853  ;;  %v8793_v52 = vadd.f32 %v8234_v6, %v1447_v34  ;;  %v1448_v17 = vmul.f32 %v6999_v45, %v1409_v33  ;;  %v1908_v3 = vadd.f32 %v1907_v10, %v1906_v24 }
 0x2ef   : > { %v1410_v38 = vmul.f32 %v6854_v25, %v8193_v51  ;;  %v1838_v58 = vadd.f32 %v1837_v50, %v1836_v12 }
 0x2f0   : > { %v6856_v37 = vpop.eup %6855  ;;  %v1661_v49 = vrot.slane %v8793_v52, 7  ;;  %v1769_v28 = vsel %vm997_vm0, %v8793_v52, 0.0  ;;  %v8801_v9 = vadd.f32 %v7000_v61, %v1448_v17  ;;  %v1564_v17 = vrot.slane %v8793_v52, 1 }
 0x2f1   : > { %v1951_v21 = vadd.f32 %v1950_v35, %v1769_v28  ;;  %v1449_v6 = vmul.f32 %v6999_v45, %v1410_v38  ;;  %v1411_v43 = vmul.f32 %v6856_v37, %v8196_v53  ;;  %v1770_v10 = vadd.f32 %v1769_v28, %v1768_v32 }
 0x2f2   : > { %v6858_v5 = vpop.eup %6857  ;;  %v1565_v51 = vrot.slane %v8801_v9, 1  ;;  %v1662_v30 = vrot.slane %v8801_v9, 7  ;;  %v1771_v34 = vsel %vm997_vm0, %v8801_v9, 0.0  ;;  %v8809_v33 = vsel %vm1621_vm2, 0.0, %v1661_v49 }
 0x2f3   : > { %v6860_v25 = vpop.eup %6859  ;;  %v8812_v24 = vadd.f32 %v7000_v61, %v1449_v6  ;;  %v1450_v35 = vmul.f32 %v6999_v45, %v1411_v43  ;;  %v1412_v53 = vmul.f32 %v6858_v5, %v8205_v4  ;;  %v1952_v12 = vadd.f32 %v1951_v21, %v1771_v34 }
 0x2f4   : > { %v1413_v38 = vmul.f32 %v6860_v25, %v8208_v57  ;;  %v8817_v50 = vsel %vm1621_vm2, %v1661_v49, %v1662_v30  ;;  %v1909_v11 = vsel %vm997_vm0, %v8809_v33, 0.0  ;;  %v8824_v8 = vsel %vm1524_vm3, %v1564_v17, %v1565_v51 }
 0x2f5   : > { %v8819_v37 = vadd.f32 %v7000_v61, %v1450_v35  ;;  %v1451_v48 = vmul.f32 %v6999_v45, %v1412_v53  ;;  %10886 = vst [vmem:[#allocation79_spill] sm:$0xff] %v8824_v8  ;;  %v1664_v43 = vrot.slane %v8812_v24, 7  ;;  %v1910_v4 = vadd.f32 %v1909_v11, %v1908_v3 }
 0x2f6   : > { %v1452_v6 = vmul.f32 %v6999_v45, %v1413_v38  ;;  %v1911_v32 = vsel %vm997_vm0, %v8817_v50, 0.0  ;;  %v1567_v57 = vrot.slane %v8812_v24, 1  ;;  %v1839_v11 = vsel %vm997_vm0, %v8824_v8, 0.0 }
 0x2f7   : > { %10885 = vst [vmem:[#allocation78_spill] sm:$0xff] %v8819_v37  ;;  %v1665_v49 = vrot.slane %v8819_v37, 7  ;;  %v8831_v28 = vadd.f32 %v7000_v61, %v1451_v48  ;;  %v1568_v21 = vrot.slane %v8819_v37, 1  ;;  %v8837_v30 = vsel %vm1621_vm2, 0.0, %v1664_v43 }
 0x2f8   : > { %v8834_v5 = vadd.f32 %v7000_v61, %v1452_v6  ;;  %10887 = vst [vmem:[#allocation80_spill] sm:$0xff] %v8837_v30  ;;  %v1912_v45 = vadd.f32 %v1911_v32, %v1910_v4  ;;  %v1913_v48 = vsel %vm997_vm0, %v8837_v30, 0.0  ;;  %v8848_v17 = vsel %vm1524_vm3, %v1565_v51, 0.0 }
 0x2f9   : > { %v8842_v3 = vsel %vm1621_vm2, %v1664_v43, %v1665_v49  ;;  %v1667_v25 = vrot.slane %v8831_v28, 7  ;;  %v8854_v38 = vsel %vm1524_vm3, %v1567_v57, %v1568_v21  ;;  %v1570_v43 = vrot.slane %v8831_v28, 1 }
 0x2fa   : > { %10888 = vst [vmem:[#allocation81_spill] sm:$0xff] %v8842_v3  ;;  %v1668_v61 = vrot.slane %v8834_v5, 7  ;;  %v1914_v35 = vadd.f32 %v1913_v48, %v1912_v45  ;;  %v1915_v53 = vsel %vm997_vm0, %v8842_v3, 0.0  ;;  %10889 = vst [vmem:[#allocation82_spill] sm:$0xff] %v8854_v38  ;;  %v1571_v4 = vrot.slane %v8834_v5, 1 }
 0x2fb   : > { %v8857_v6 = vsel %vm1621_vm2, 0.0, %v1667_v25  ;;  %v1840_v32 = vadd.f32 %v1839_v11, %v1838_v58  ;;  %v8865_v45 = vsel %vm1524_vm3, %v1568_v21, 0.0  ;;  %v1841_v48 = vsel %vm997_vm0, %v8848_v17, 0.0 }
 0x2fc   : > { %10890 = vst [vmem:[#allocation83_spill] sm:$0xff] %v8857_v6  ;;  %v8862_v51 = vsel %vm1621_vm2, %v1667_v25, %v1668_v61  ;;  %v1916_v49 = vadd.f32 %v1915_v53, %v1914_v35  ;;  %10892 = vst [vmem:[#allocation85_spill] sm:$0xff] %v8865_v45  ;;  %v1917_v57 = vsel %vm997_vm0, %v8857_v6, 0.0  ;;  %v8874_v40 = vsel %vm1524_vm3, %v1570_v43, %v1571_v4 }
 0x2fd   : > { %10891 = vst [vmem:[#allocation84_spill] sm:$0xff] %v8862_v51  ;;  %v1919_v60 = vsel %vm997_vm0, %v8862_v51, 0.0  ;;  %10893 = vst [vmem:[#allocation86_spill] sm:$0xff] %v8874_v40  ;;  %v1842_v58 = vadd.f32 %v1841_v48, %v1840_v32  ;;  %v1843_v25 = vsel %vm997_vm0, %v8854_v38, 0.0  ;;  %v1773_v21 = vsel %vm997_vm0, %v8812_v24, 0.0 }
 0x2fe   : > { %v1918_v11 = vadd.f32 %v1917_v57, %v1916_v49  ;;  %v1845_v35 = vsel %vm997_vm0, %v8865_v45, 0.0  ;;  %v1775_v53 = vsel %vm997_vm0, %v8819_v37, 0.0  ;;  %v1847_v43 = vsel %vm997_vm0, %v8874_v40, 0.0 }
 0x2ff   : > { %v1844_v61 = vadd.f32 %v1843_v25, %v1842_v58  ;;  %v1953_v20 = vadd.f32 %v1952_v12, %v1773_v21  ;;  %v1772_v32 = vadd.f32 %v1771_v34, %v1770_v10  ;;  %v8887_v49 = vsel %vm1524_vm3, %v1571_v4, 0.0 }
 0x300   : > { %v1920_v46 = vadd.f32 %v1919_v60, %v1918_v11  ;;  %10894 = vst [vmem:[#allocation87_spill] sm:$0xff] %v8887_v49  ;;  %v1777_v25 = vsel %vm997_vm0, %v8831_v28, 0.0  ;;  %v1779_v37 = vsel %vm997_vm0, %v8834_v5, 0.0  ;;  %v1849_v11 = vsel %vm997_vm0, %v8887_v49, 0.0 }
 0x301   : > { %v1846_v48 = vadd.f32 %v1845_v35, %v1844_v61  ;;  %v1954_v42 = vadd.f32 %v1953_v20, %v1775_v53  ;;  %v1774_v2 = vadd.f32 %v1773_v21, %v1772_v32 }
 0x302   : > { %v1921_v57 = vrot.slane %v1920_v46, 4 }
 0x303   : > { %v1848_v58 = vadd.f32 %v1847_v43, %v1846_v48  ;;  %v1955_v12 = vadd.f32 %v1954_v42, %v1777_v25  ;;  %v1776_v34 = vadd.f32 %v1775_v53, %v1774_v2 }
 0x304   : > { %v1922_v60 = vadd.f32 %v1921_v57, %v1920_v46 }
 0x305   : > { %v1850_v10 = vadd.f32 %v1849_v11, %v1848_v58  ;;  %v1956_v61 = vadd.f32 %v1955_v12, %v1779_v37  ;;  %v1996_v35 = vrot.slane %v1776_v34, 4  ;;  %v1778_v43 = vadd.f32 %v1777_v25, %v1776_v34 }
 0x306   : > { %v1923_v21 = vrot.slane %v1922_v60, 2  ;;  %v8991_v12 = vpack.c.bf16 %v8718_v1, %v8701_v31  ;;  %v8995_v25 = vpack.c.bf16 %v8761_v59, %v8754_v15  ;;  %v9010_v31 = vpack.c.bf16 %v8834_v5, %v8831_v28  ;;  %v9018_v59 = vld [vmem:[%s10898_s25 + $0x8] sm:$0xf]  ;;  %v9031_v28 = vld [vmem:[%s10907_s0] sm:$0xf] }
 0x307   : > { %v1851_v32 = vrot.slane %v1850_v10, 4  ;;  %v1959_v53 = vrot.slane %v1956_v61, 4  ;;  %v1997_v57 = vadd.f32 %v1996_v35, %v1776_v34  ;;  %v1780_v58 = vadd.f32 %v1779_v37, %v1778_v43  ;;  %v8919_v37 = vld [vmem:[%s10895_s23 + $0x4] sm:$0xf] }
 0x308   : > { %v1924_v42 = vadd.f32 %v1923_v21, %v1922_v60  ;;  %v8914_v60 = vld [vmem:[%s10895_s23] sm:$0xf]  ;;  %10901 = vst [vmem:[#allocation90_spill] sm:$0xff] %v8991_v12  ;;  %10902 = vst [vmem:[#allocation91_spill] sm:$0xff] %v8995_v25  ;;  %v9036_v5 = vld [vmem:[%s10907_s0 + $0x4] sm:$0xf] }
 0x309   : > { %v1852_v11 = vadd.f32 %v1851_v32, %v1850_v10  ;;  %v1960_v4 = vadd.f32 %v1959_v53, %v1956_v61  ;;  %v1998_v48 = vrot.slane %v1997_v57, 2  ;;  %v1781_v0 = vrot.slane %v1780_v58, 4  ;;  %v8972_v10 = vld [vmem:[%s10898_s25] sm:$0xf]  ;;  %10906 = vst [vmem:[#allocation93_spill] sm:$0xff] %v9010_v31 }
 0x30a   : > { %v1925_v20 = vrot.slane %v1924_v42, 1  ;;  %v5777_v21 = vcombine.low %v8914_v60, %v8919_v37 }
 0x30b   : > { %v1853_v34 = vrot.slane %v1852_v11, 2  ;;  %v1961_v43 = vrot.slane %v1960_v4, 2  ;;  %v1999_v32 = vadd.f32 %v1998_v48, %v1997_v57  ;;  %v1782_v53 = vadd.f32 %v1781_v0, %v1780_v58  ;;  %v8944_v58 = vld [vmem:[%s10895_s23 + $0x8] sm:$0xf] }
 0x30c   : > { %v1926_v35 = vadd.f32 %v1925_v20, %v1924_v42 }
 0x30d   : > { %v1854_v46 = vadd.f32 %v1853_v34, %v1852_v11  ;;  %v1962_v14 = vadd.f32 %v1961_v43, %v1960_v4  ;;  %v1783_v61 = vrot.slane %v1782_v53, 2  ;;  %v8949_v4 = vld [vmem:[%s10895_s23 + $0xc] sm:$0xf]  ;;  %v8954_v43 = vld [vmem:[%s10896_s22] sm:$0xf]  ;;  %v2000_v42 = vrot.slane %v1999_v32, 1 }
 0x30e   : > { %v1927_v2 = vmul.f32 0.00390625, %v1926_v35 }
 0x30f   : > { %v1855_v20 = vrot.slane %v1854_v46, 1  ;;  %v1963_v11 = vrot.slane %v1962_v14, 1  ;;  %v1784_v34 = vadd.f32 %v1783_v61, %v1782_v53  ;;  %v5778_v61 = vcombine.low %v8944_v58, %v8949_v4 }
 0x310   : > { %v2054_v57 = vpack.c.bf16 %v1927_v2, %v1927_v2  ;;  %v8959_v2 = vld [vmem:[%s10896_s22 + $0x4] sm:$0xf] }
 0x311   : > { %v1856_v35 = vadd.f32 %v1855_v20, %v1854_v46  ;;  %v1964_v48 = vadd.f32 %v1963_v11, %v1962_v14  ;;  %v10897_v46 = vmov 0.0   ;;  %v5780_v53 = vcombine.low %v8954_v43, %v8959_v2  ;;  %v8977_v14 = vld [vmem:[%s10898_s25 + $0x4] sm:$0xf]  ;;  %v8982_v11 = vld [vmem:[%s10896_s22 + $0x8] sm:$0xf] }
 0x312   : > { %6130 = vmatmul.mubr.msk.bf16.vlgmr.msra.gmra.mrb[0].mxu0 %vm997_vm0, %v2054_v57  ;;  %10899 = vst [vmem:[#allocation88_spill] sm:$0xff] %v8982_v11  ;;  %v5783_v40 = vcombine.low %v8972_v10, %v8977_v14 }
 0x313   : > { %6142 = vmatpush3.bf16.msra.mxu0 %v5777_v21  ;;  %v1857_v0 = vmul.f32 0.00390625, %v1856_v35  ;;  %6145 = vmatprep.mubr.msk.bf16.mxu0 %vm7391_vm1, %v10897_v46  ;;  %v1965_v20 = vmul.f32 0.00390625, %v1964_v48  ;;  %v1785_v21 = vrot.slane %v1784_v34, 1  ;;  %v8987_v48 = vld [vmem:[%s10896_s22 + $0xc] sm:$0xf]  ;;  %v2001_v35 = vadd.f32 %v2000_v42, %v1999_v32 }
 0x314   : > { %6143 = vmatprep.subr.bf16.mxu0 %v10897_v46  ;;  %10900 = vst [vmem:[#allocation89_spill] sm:$0xff] %v8987_v48  ;;  %v10904_v32 = vld [vmem:[#allocation78_spill] sm:$0xff]  ;;  %v5781_v1 = vcombine.low %v8982_v11, %v8987_v48 }
 0x315   : > { %v2053_v57 = vpack.c.bf16 %v1857_v0, %v1857_v0  ;;  %v8999_v0 = vpack.c.bf16 %v8801_v9, %v8793_v52  ;;  %v9006_v42 = vpack.c.bf16 %v10904_v32, %v8812_v24  ;;  %v2055_v15 = vpack.c.bf16 %v1965_v20, %v1965_v20  ;;  %v9023_v52 = vld [vmem:[%s10898_s25 + $0xc] sm:$0xf]  ;;  %v9049_v20 = vld [vmem:[%s10908_s1] sm:$0xf] }
 0x316   : > { %v1786_v9 = vadd.f32 %v1785_v21, %v1784_v34  ;;  %v2002_v24 = vmul.f32 0.00390625, %v2001_v35  ;;  %v5784_v34 = vcombine.low %v9018_v59, %v9023_v52  ;;  %v9065_v35 = vld [vmem:[%s10907_s0 + $0xc] sm:$0xf] }
 0x317   : > { %10903 = vst [vmem:[#allocation92_spill] sm:$0xff] %v8999_v0  ;;  %6138 = vmatmul.mubr.msk.bf16.vlgmr.msra.gmra.mrb[0].mxu1 %vm997_vm0, %v2053_v57  ;;  %6144 = vmatpush3.bf16.msra.mxu0 %v5778_v61  ;;  %10905 = vst [vmem:[#allocation78_spill] sm:$0xff] %v9006_v42  ;;  %v5786_v61 = vcombine.low %v9031_v28, %v9036_v5  ;;  %v9060_v57 = vld [vmem:[%s10907_s0 + $0x8] sm:$0xf]  ;;  %s11030_s0 = sld [smem:[#allocation118_spill]] }
 0x318   : > { %6150 = vmatpush3.bf16.msra.mxu1 %v5780_v53  ;;  %6157 = vmatprep.subr.bf16.mxu0 %v10897_v46  ;;  %v1787_v53 = vmul.f32 0.00390625, %v1786_v9  ;;  %v2056_v21 = vpack.c.bf16 %v2002_v24, %v2002_v24  ;;  %v9076_v9 = vld [vmem:[%s10908_s1 + $0x8] sm:$0xf]  ;;  %v9081_v24 = vld [vmem:[%s10908_s1 + $0xc] sm:$0xf] }
 0x319   : > { %6151 = vmatprep.subr.bf16.mxu1 %v10897_v46  ;;  %6153 = vmatprep.mubr.msk.bf16.mxu1 %vm7391_vm1, %v10897_v46 }
 0x31a   : > { %6146 = vmatmul.mubr.msk.bf16.vlgmr.msra.gmra.mrb[4].mxu0 %vm997_vm0, %v2055_v15  ;;  %v2052_v15 = vpack.c.bf16 %v1787_v53, %v1787_v53  ;;  %v6784_v53 = vld [vmem:[%s10909_s26 + $0x8] sm:$0xff]  }
 0x31b   : > { %6158 = vmatpush3.bf16.msra.mxu0 %v5783_v40  ;;  %6161 = vmatprep.mubr.msk.bf16.mxu0 %vm7391_vm1, %v10897_v46  ;;  %v9054_v40 = vld [vmem:[%s10908_s1 + $0x4] sm:$0xf]  ;;  %s11031_s1 = sshll.u32 %s7838_s2, 8 }
 0x31c   : > { %6152 = vmatpush3.bf16.msra.mxu1 %v5781_v1  ;;  %6159 = vmatprep.subr.bf16.mxu0 %v10897_v46  ;;  %v5789_v32 = vcombine.low %v9049_v20, %v9054_v40  ;;  %v5787_v1 = vcombine.low %v9060_v57, %v9065_v35  ;;  %s10447_s3 = scalar_lea.vmem [#allocation17], %s11031_s1  ;;  %s7393_s1 = smov [#allocation17]  }
 0x31d   : > { %6165 = vmatprep.subr.bf16.mxu1 %v10897_v46 }
 0x31f   : > { %6154 = vmatmul.mubr.msk.bf16.vlgmr.msra.gmra.mrb[4].mxu1 %vm997_vm0, %v2056_v21  ;;  %6160 = vmatpush3.bf16.msra.mxu0 %v5784_v34  ;;  %v5790_v34 = vcombine.low %v9076_v9, %v9081_v24 }
 0x320   : > { %6166 = vmatpush3.bf16.msra.mxu1 %v5786_v61  ;;  %6173 = vmatprep.subr.bf16.mxu0 %v10897_v46  ;;  %v6783_v61 = vld [vmem:[%s10909_s26] sm:$0xff]  }
 0x321   : > { %6167 = vmatprep.subr.bf16.mxu1 %v10897_v46  ;;  %6169 = vmatprep.mubr.msk.bf16.mxu1 %vm7391_vm1, %v10897_v46 }
 0x322   : > { %6162 = vmatmul.mubr.msk.bf16.vlgmr.msra.gmra.mrb[8].mxu0 %vm997_vm0, %v2052_v15 }
 0x323   : > { %6174 = vmatpush3.bf16.msra.mxu0 %v5789_v32  ;;  %6177 = vmatprep.mubr.msk.bf16.mxu0 %vm7391_vm1, %v10897_v46 }
 0x324   : > { %6168 = vmatpush3.bf16.msra.mxu1 %v5787_v1  ;;  %6175 = vmatprep.subr.bf16.mxu0 %v10897_v46 }
 0x325   : > { %6181 = vmatprep.subr.bf16.mxu1 %v10897_v46 }
 0x327   : > { %6170 = vmatmul.mubr.msk.bf16.vlgmr.msra.gmra.mrb[8].mxu1 %vm997_vm0, %v2052_v15  ;;  %6176 = vmatpush3.bf16.msra.mxu0 %v5790_v34 }
 0x328   : > { %6185 = vmatprep.mubr.msk.bf16.mxu1 %vm7391_vm1, %v10897_v46  ;;  %6189 = vmatprep.subr.bf16.mxu0 %v10897_v46 }
 0x329   : > { %6182 = vmatpush3.bf16.msra.mxu1 %v6783_v61 }
 0x32a   : > { %6178 = vmatmul.mubr.msk.bf16.vlgmr.msra.gmra.mrb[12].mxu0 %vm997_vm0, %v2052_v15  ;;  %6183 = vmatprep.subr.bf16.mxu1 %v10897_v46 }
 0x32b   : > { %6191 = vmatprep.mubr.msk.bf16.mxu0 %vm7391_vm1, %v10897_v46 }
 0x32d   : > { %6184 = vmatpush3.bf16.msra.mxu1 %v6784_v53 }
 0x32e   : > { %6195 = vmatprep.subr.bf16.mxu1 %v10897_v46 }
 0x3e5   : > { %v2114_v21 = vpop.f32.mrb[0].mxu0 }
 0x3e6   : > { %v6131_v32 = vpop.f32.mrb[1].mxu0 }
 0x3e7   : > { %v2117_v1 = vpop.f32.mrb[2].mxu0 }
 0x3e8   : > { %v6132_v15 = vpop.f32.mrb[3].mxu0 }
 0x3ea   : > { %v2169_v34 = vpop.f32.mrb[0].mxu1 }
 0x3eb   : > { %v2170_v31 = vadd.f32 %v2169_v34, %v2114_v21  ;;  %v6139_v42 = vpop.f32.mrb[1].mxu1 }
 0x3ec   : > { %v2172_v0 = vpop.f32.mrb[2].mxu1 }
 0x3ed   : > { %v6140_v25 = vpop.f32.mrb[3].mxu1  ;;  %v2228_v12 = vpop.f32.mrb[4].mxu0 }
 0x3ee   : > { %v2234_v61 = vadd.f32 %v2228_v12, %v2170_v31  ;;  %v6147_v48 = vpop.f32.mrb[5].mxu0  ;;  %v9108_v12 = vld [vmem:[#allocation8] sm:$0x1] }
 0x3ef   : > { %v2231_v11 = vpop.f32.mrb[6].mxu0  ;;  %v9110_v48 = vld [vmem:[#allocation10] sm:$0x1] }
 0x3f0   : > { %v6148_v49 = vpop.f32.mrb[7].mxu0 }
 0x3f2   : > { %v2288_v6 = vpop.f32.mrb[4].mxu1 }
 0x3f3   : > { %v2294_v51 = vadd.f32 %v2288_v6, %v2234_v61  ;;  %v6155_v38 = vpop.f32.mrb[5].mxu1 }
 0x3f4   : > { %v2291_v53 = vpop.f32.mrb[6].mxu1 }
 0x3f5   : > { %v6156_v45 = vpop.f32.mrb[7].mxu1  ;;  %v2348_v30 = vpop.f32.mrb[8].mxu0  ;;  %v2478_v53 = vld [vmem:[#allocation11] sm:$0x1] }
 0x3f6   : > { %v2354_v3 = vadd.f32 %v2348_v30, %v2294_v51  ;;  %v6163_v32 = vpop.f32.mrb[9].mxu0 }
 0x3f7   : > { %v2351_v1 = vpop.f32.mrb[10].mxu0 }
 0x3f8   : > { %v6164_v15 = vpop.f32.mrb[11].mxu0 }
 0x3fa   : > { %v2405_v8 = vpop.f32.mrb[8].mxu1 }
 0x3fb   : > { %v2411_v21 = vadd.f32 %v2405_v8, %v2354_v3  ;;  %v6171_v42 = vpop.f32.mrb[9].mxu1  ;;  %v2544_v8 = vld [vmem:[#allocation13] sm:$0xf]  ;;  %v2594_v3 = vld [vmem:[#allocation14] sm:$0xf] }
 0x3fc   : > { %v2408_v0 = vpop.f32.mrb[10].mxu1  ;;  %v2552_v31 = vsel %vm2550_vm4, %v2544_v8, 0  ;;  %v2597_v61 = vsel %vm2550_vm4, %v2594_v3, 0 }
 0x3fd   : > { %v6172_v25 = vpop.f32.mrb[11].mxu1  ;;  %v2462_v34 = vpop.f32.mrb[12].mxu0  ;;  %6190 = vmatpush3.bf16.msra.mxu0 %v2552_v31  ;;  %v10910_v31 = vld [vmem:[#allocation28_spill] sm:$0xff] }
 0x3fe   : > { %v2468_v11 = vadd.f32 %v2462_v34, %v2411_v21  ;;  %v6179_v49 = vpop.f32.mrb[13].mxu0  ;;  %6201 = vmatprep.subr.bf16.mxu0 %v10897_v46 }
 0x3ff   : > { %v2465_v38 = vpop.f32.mrb[14].mxu0 }
 0x400   : > { %v2470_v6 = vadd.f32 %v9108_v12, %v2468_v11  ;;  %v6180_v45 = vpop.f32.mrb[15].mxu0 }
 0x402   : > { %v2472_v30 = vadd.f32 %v9110_v48, %v2470_v6 }
 0x404   : > { %v2473_v51 = vpack.c.bf16 %v2472_v30, %v2472_v30  ;;  %v2639_v30 = vld [vmem:[#allocation16] sm:$0xf] }
 0x405   : > { %v2642_v3 = vsel %vm2550_vm4, %v2639_v30, 0 }
 0x406   : > { %6186 = vmatmul.mubr.msk.bf16.vlgmr.msra.gmra.mrb[12].mxu1 %vm997_vm0, %v2473_v51 }
 0x407   : > { %6197 = vmatprep.mubr.msk.bf16.mxu1 %vm7391_vm1, %v10897_v46  ;;  %6196 = vmatpush3.bf16.msra.mxu1 %v2597_v61  ;;  %v10911_v61 = vld [vmem:[#allocation29_spill] sm:$0xff] }
 0x4d9   : > { %v2528_v32 = vpop.f32.mrb[12].mxu1 }
 0x4da   : > { %v2529_v1 = vadd.f32 %v2528_v32, %v2478_v53  ;;  %v6187_v15 = vpop.f32.mrb[13].mxu1  ;;  %v2019_v53 = vpack.c.bf16 %v10911_v61, %v10910_v31  ;;  %v10912_v32 = vld [vmem:[#allocation25_spill] sm:$0xff] }
 0x4db   : > { %v2531_v21 = vpop.f32.mrb[14].mxu1  ;;  %v10913_v15 = vld [vmem:[#allocation30_spill] sm:$0xff] }
 0x4dc   : > { %v2534_v42 = vmul.f32 %v2529_v1, %v2529_v1  ;;  %v6188_v0 = vpop.f32.mrb[15].mxu1  ;;  %v2035_v21 = vpack.c.bf16 %v10913_v15, %v10912_v32 }
 0x4de   : > { %v2535_v25 = vmul.f32 %v2534_v42, %v2529_v1  ;;  %v2595_v42 = vld [vmem:[%s10640_s18] sm:$0x1] }
 0x4e0   : > { %v2536_v34 = vmul.f32 0.044715, %v2535_v25 }
 0x4e2   : > { %v2537_v11 = vadd.f32 %v2536_v34, %v2529_v1 }
 0x4e4   : > { %v2538_v49 = vmul.f32 0.7978846, %v2537_v11 }
 0x4e6   : > { %6861 = vtanh.f32 %v2538_v49 }
 0x4f0   : > { %v6862_v38 = vpop.eup %6861 }
 0x4f1   : > { %v2540_v6 = vadd.f32 1.0, %v6862_v38 }
 0x4f3   : > { %v2541_v45 = vmul.f32 0.5, %v2540_v6 }
 0x4f5   : > { %v2542_v51 = vmul.f32 %v2541_v45, %v2529_v1  ;;  %v2545_v1 = vld [vmem:[%s10914_s17] sm:$0x1]  ;;  %s11028_s17 = sld [smem:[#allocation114_spill]] }
 0x4f7   : > { %v2543_v8 = vpack.c.bf16 %v2542_v51, %v2542_v51 }
 0x4f9   : > { %6192 = vmatmul.mubr.msk.bf16.vlgmr.msra.gmra.mrb[16].mxu0 %vm2546_vm5, %v2543_v8  ;;  %6198 = vmatmul.mubr.msk.bf16.vlgmr.msra.gmra.mrb[16].mxu1 %vm2546_vm5, %v2543_v8 }
 0x4fa   : > { %6202 = vmatpush3.bf16.msra.mxu0 %v2642_v3  ;;  %6247 = vmatprep.mubr.msk.bf16.mxu1 %vm997_vm0, %v2019_v53 }
 0x4fb   : > { %6203 = vmatprep.mubr.msk.bf16.mxu0 %vm7391_vm1, %v10897_v46 }
 0x501   : > { %6204 = vmatmul.mubr.msk.bf16.vlgmr.msra.gmra.mrb[20].mxu0 %vm2546_vm5, %v2543_v8  ;;  %v2640_v8 = vld [vmem:[%s10641_s19] sm:$0x1] }
 0x502   : > { %6211 = vmatprep.mubr.msk.bf16.mxu0 %vm997_vm0, %v2035_v21 }
 0x5cc   : > { %v2588_v0 = vpop.f32.mrb[16].mxu0  ;;  %v2633_v25 = vpop.f32.mrb[16].mxu1 }
 0x5cd   : > { %v2589_v34 = vadd.f32 %v2588_v0, %v2545_v1  ;;  %v2634_v11 = vadd.f32 %v2633_v25, %v2595_v42  ;;  %v6193_v49 = vpop.f32.mrb[17].mxu0  ;;  %v6199_v46 = vpop.f32.mrb[17].mxu1 }
 0x5ce   : > { %v2591_v38 = vpop.f32.mrb[18].mxu0  ;;  %v2636_v6 = vpop.f32.mrb[18].mxu1 }
 0x5cf   : > { %v2684_v45 = vmax.f32 %v2589_v34, %v2634_v11  ;;  %v6194_v30 = vpop.f32.mrb[19].mxu0  ;;  %v6200_v51 = vpop.f32.mrb[19].mxu1 }
 0x5d4   : > { %v2678_v3 = vpop.f32.mrb[20].mxu0 }
 0x5d5   : > { %v2679_v31 = vadd.f32 %v2678_v3, %v2640_v8  ;;  %v6205_v61 = vpop.f32.mrb[21].mxu0  ;;  %v2707_v8 = vlaneseq }
 0x5d6   : > { %v2681_v53 = vpop.f32.mrb[22].mxu0 }
 0x5d7   : > { %v2685_v32 = vmax.f32 %v2684_v45, %v2679_v31  ;;  %v6206_v15 = vpop.f32.mrb[23].mxu0  ;;  %v2708_v3 = vshrl.u32 %v2707_v8, 7 }
 0x5d9   : > { %v2686_v21 = vsub.f32 %v2589_v34, %v2685_v32  ;;  %v2689_v1 = vsub.f32 %v2634_v11, %v2685_v32  ;;  %v2692_v42 = vsub.f32 %v2679_v31, %v2685_v32  ;;  %v2709_v11 = vsub.s32 0, %v2708_v3  ;;  %v7001_v3 = vld [vmem:[%s10829_s11] sm:$0xf] }
 0x5db   : > { %v2687_v0 = vmul.f32 1.442695, %v2686_v21  ;;  %v2690_v25 = vmul.f32 1.442695, %v2689_v1  ;;  %v2693_v49 = vmul.f32 1.442695, %v2692_v42 }
 0x5dd   : > { %6863 = vpow2.f32 %v2687_v0 }
 0x5de   : > { %6865 = vpow2.f32 %v2690_v25 }
 0x5df   : > { %6867 = vpow2.f32 %v2693_v49 }
 0x5e7   : > { %v6864_v46 = vpop.eup %6863 }
 0x5e8   : > { %v6866_v38 = vpop.eup %6865 }
 0x5e9   : > { %v2695_v6 = vadd.f32 %v6866_v38, %v6864_v46  ;;  %v6868_v30 = vpop.eup %6867 }
 0x5eb   : > { %v2696_v51 = vadd.f32 %v6868_v30, %v2695_v6 }
 0x5ed   : > { %6869 = vrcp.f32 %v2696_v51 }
 0x5f7   : > { %v6870_v61 = vpop.eup %6869 }
 0x5f8   : > { %v2698_v45 = vmul.f32 %v6870_v61, %v6864_v46  ;;  %v2699_v53 = vmul.f32 %v6870_v61, %v6866_v38  ;;  %v2700_v34 = vmul.f32 %v6870_v61, %v6868_v30 }
 0x5fa   : > { %v2701_v31 = vpack.c.bf16 %v2698_v45, %v2698_v45  ;;  %v2702_v32 = vpack.c.bf16 %v2699_v53, %v2699_v53  ;;  %v2703_v15 = vpack.c.bf16 %v2700_v34, %v2700_v34  ;;  %v3881_v21 = vmul.f32 %v2698_v45, %v9108_v12  ;;  %v7003_v45 = vld [vmem:[%s10830_s28] sm:$0xf]  ;;  %v7004_v34 = vld [vmem:[%s10830_s28 + $0x4] sm:$0xf] }
 0x5fb   : > { %v3920_v1 = vmul.f32 %v2699_v53, %v9110_v48  ;;  %v7002_v48 = vld [vmem:[%s10829_s11 + $0x4] sm:$0xf] }
 0x5fc   : > { %v2705_v42 = vpack.i.b16 %v2701_v31, %v2701_v31  ;;  %v2724_v0 = vpack.i.b16 %v2702_v32, %v2702_v32  ;;  %v2755_v25 = vpack.i.b16 %v2703_v15, %v2703_v15  ;;  %v9140_v49 = vrot.slane %v3881_v21, %v2709_v11  ;;  %v7005_v31 = vld [vmem:[%s10829_s11 + $0x8] sm:$0xf]  ;;  %v7006_v15 = vld [vmem:[%s10829_s11 + $0xc] sm:$0xf] }
 0x5fd   : > { %v9142_v6 = vrot.slane %v3920_v1, %v2709_v11  ;;  %v7007_v1 = vld [vmem:[%s10830_s28 + $0x8] sm:$0xf] }
 0x5fe   : > { %10915 = vst [vmem:[#allocation28_spill] sm:$0xff] %v9140_v49  ;;  %v2710_v51 = vrot.slane %v2705_v42, %v2709_v11  ;;  %v2729_v8 = vrot.slane %v2724_v0, %v2709_v11  ;;  %v2760_v46 = vrot.slane %v2755_v25, %v2709_v11  ;;  %v7008_v0 = vld [vmem:[%s10830_s28 + $0xc] sm:$0xf]  ;;  %v10919_v49 = vld [vmem:[#allocation33_spill] sm:$0xff] }
 0x5ff   : > { %10916 = vst [vmem:[#allocation29_spill] sm:$0xff] %v9142_v6 }
 0x600   : > { %v5798_v38 = vcombine.low %v2710_v51, %v2710_v51  ;;  %v9144_v30 = vcombine.low %v2729_v8, %v2729_v8 }
 0x602   : > { %v2719_v12 = vmul.bf16 %v7001_v3, %v5798_v38  ;;  %v2720_v61 = vmul.bf16 %v7002_v48, %v5798_v38  ;;  %v2715_v53 = vmul.bf16 %v7003_v45, %v5798_v38  ;;  %v2716_v11 = vmul.bf16 %v7004_v34, %v5798_v38 }
 0x603   : > { %v2721_v32 = vmul.bf16 %v7005_v31, %v5798_v38  ;;  %v2722_v21 = vmul.bf16 %v7006_v15, %v5798_v38  ;;  %v2717_v42 = vmul.bf16 %v7007_v1, %v5798_v38  ;;  %v2718_v25 = vmul.bf16 %v7008_v0, %v5798_v38  ;;  %v10917_v15 = vld [vmem:[#allocation32_spill] sm:$0xff]  ;;  %v10918_v1 = vld [vmem:[#allocation35_spill] sm:$0xff]  ;;  %v10920_v0 = vld [vmem:[#allocation34_spill] sm:$0xff] }
 0x604   : > { %v5801_v51 = vcombine.low %v2719_v12, %v2720_v61  ;;  %v5819_v8 = vcombine.low %v2715_v53, %v2716_v11  ;;  %v2734_v3 = vmul.bf16 %v9144_v30, %v8914_v60  ;;  %v2735_v48 = vmul.bf16 %v9144_v30, %v8919_v37 }
 0x605   : > { %v5800_v45 = vcombine.low %v2760_v46, %v2760_v46  ;;  %v5802_v34 = vcombine.low %v2721_v32, %v2722_v21  ;;  %v5820_v31 = vcombine.low %v2717_v42, %v2718_v25  ;;  %v2036_v6 = vpack.c.bf16 %v10918_v1, %v10917_v15  ;;  %v10922_v25 = vld [vmem:[#allocation41_spill] sm:$0xff] }
 0x606   : > { %6207 = vmatprep.subr.bf16.mxu0 %v5801_v51  ;;  %6243 = vmatprep.subr.bf16.mxu1 %v5819_v8  ;;  %v2020_v12 = vpack.c.bf16 %v10920_v0, %v10919_v49  ;;  %v2736_v61 = vmul.bf16 %v9144_v30, %v8944_v58  ;;  %v2737_v60 = vmul.bf16 %v9144_v30, %v8949_v4 }
 0x607   : > { %6208 = vmatpush3.bf16.msra.mxu0 %v5801_v51  ;;  %6244 = vmatpush3.bf16.msra.mxu1 %v5819_v8  ;;  %v2742_v37 = vmul.bf16 %v5798_v38, %v8972_v10  ;;  %v2743_v46 = vmul.bf16 %v5798_v38, %v8977_v14  ;;  %v5837_v53 = vcombine.low %v2734_v3, %v2735_v48  ;;  %v10923_v51 = vld [vmem:[#allocation39_spill] sm:$0xff] }
 0x608   : > { %6209 = vmatprep.subr.bf16.mxu0 %v5802_v34  ;;  %6245 = vmatprep.subr.bf16.mxu1 %v5820_v31  ;;  %v2746_v11 = vmul.bf16 %v9144_v30, %v9031_v28  ;;  %v2747_v32 = vmul.bf16 %v9144_v30, %v9036_v5  ;;  %v2765_v49 = vmul.bf16 %v5800_v45, %v9049_v20  ;;  %v10921_v5 = vld [vmem:[#allocation38_spill] sm:$0xff] }
 0x609   : > { %v2766_v58 = vmul.bf16 %v5800_v45, %v9054_v40  ;;  %v2744_v21 = vmul.bf16 %v5798_v38, %v9018_v59  ;;  %v2745_v42 = vmul.bf16 %v5798_v38, %v9023_v52  ;;  %v2748_v10 = vmul.bf16 %v9144_v30, %v9060_v57  ;;  %v10924_v40 = vld [vmem:[#allocation40_spill] sm:$0xff] }
 0x60a   : > { %v2750_v4 = vadd.bf16 %v2746_v11, %v2742_v37  ;;  %v2751_v14 = vadd.bf16 %v2747_v32, %v2743_v46  ;;  %v2749_v28 = vmul.bf16 %v9144_v30, %v9065_v35  ;;  %v2037_v20 = vpack.c.bf16 %v10922_v25, %v10921_v5  ;;  %v10929_v46 = vld [vmem:[#allocation50_spill] sm:$0xff]  ;;  %v10930_v11 = vld [vmem:[#allocation52_spill] sm:$0xff] }
 0x60b   : > { %6210 = vmatpush3.bf16.msra.mxu0 %v5802_v34  ;;  %6246 = vmatpush3.bf16.msra.mxu1 %v5820_v31  ;;  %v2021_v8 = vpack.c.bf16 %v10924_v40, %v10923_v51  ;;  %v2752_v59 = vadd.bf16 %v2748_v10, %v2744_v21  ;;  %v2767_v52 = vmul.bf16 %v5800_v45, %v9076_v9  ;;  %v10936_v10 = vld [vmem:[#allocation59_spill] sm:$0xff]  ;;  %v10939_v25 = vld [vmem:[#allocation64_spill] sm:$0xff] }
 0x60c   : > { %6279 = vmatprep.subr.bf16.mxu1 %v5837_v53  ;;  %v2769_v38 = vadd.bf16 %v2765_v49, %v2750_v4  ;;  %v2770_v3 = vadd.bf16 %v2766_v58, %v2751_v14  ;;  %v2753_v57 = vadd.bf16 %v2749_v28, %v2745_v42  ;;  %v2768_v48 = vmul.bf16 %v5800_v45, %v9081_v24  ;;  %v10925_v45 = vld [vmem:[#allocation44_spill] sm:$0xff]  ;;  %v10935_v42 = vld [vmem:[#allocation58_spill] sm:$0xff]  ;;  %v10941_v40 = vld [vmem:[#allocation67_spill] sm:$0xff] }
 0x60d   : > { %v2738_v35 = vmul.bf16 %v9144_v30, %v8954_v43  ;;  %v2739_v34 = vmul.bf16 %v9144_v30, %v8959_v2  ;;  %v2771_v31 = vadd.bf16 %v2767_v52, %v2752_v59  ;;  %v5838_v9 = vcombine.low %v2736_v61, %v2737_v60  ;;  %v10926_v43 = vld [vmem:[#allocation47_spill] sm:$0xff]  ;;  %v10928_v2 = vld [vmem:[#allocation46_spill] sm:$0xff]  ;;  %v10932_v60 = vld [vmem:[#allocation53_spill] sm:$0xff] }
 0x60e   : > { %6212 = vmatmul.mubr.msk.bf16.vlgmr.msra.gmra.mrb[24].mxu0 %vm997_vm0, %v2036_v6  ;;  %6248 = vmatmul.mubr.msk.bf16.vlgmr.msra.gmra.mrb[20].mxu1 %vm997_vm0, %v2020_v12  ;;  %v9210_v15 = vcombine.low %v2769_v38, %v2770_v3  ;;  %v2772_v1 = vadd.bf16 %v2768_v48, %v2753_v57  ;;  %v2038_v0 = vpack.c.bf16 %v10926_v43, %v10925_v45  ;;  %v10927_v12 = vld [vmem:[#allocation45_spill] sm:$0xff]  ;;  %v10931_v61 = vld [vmem:[#allocation51_spill] sm:$0xff]  ;;  %v10934_v58 = vld [vmem:[#allocation60_spill] sm:$0xff] }
 0x60f   : > { %6215 = vmatprep.mubr.msk.bf16.mxu0 %vm997_vm0, %v2037_v20  ;;  %6251 = vmatprep.mubr.msk.bf16.mxu1 %vm997_vm0, %v2021_v8  ;;  %v5854_v6 = vcombine.low %v2738_v35, %v2739_v34  ;;  %v2022_v37 = vpack.c.bf16 %v10928_v2, %v10927_v12  ;;  %v2039_v32 = vpack.c.bf16 %v10930_v11, %v10929_v46  ;;  %v10937_v14 = vld [vmem:[#allocation62_spill] sm:$0xff]  ;;  %v10940_v20 = vld [vmem:[#allocation65_spill] sm:$0xff]  ;;  %v10942_v8 = vld [vmem:[#allocation71_spill] sm:$0xff] }
 0x610   : > { %6280 = vmatpush3.bf16.msra.mxu1 %v5837_v53  ;;  %v9212_v24 = vcombine.low %v2771_v31, %v2772_v1  ;;  %v2023_v49 = vpack.c.bf16 %v10932_v60, %v10931_v61  ;;  %v10933_v53 = vld [vmem:[#allocation55_spill] sm:$0xff]  ;;  %v2024_v4 = vpack.c.bf16 %v10936_v10, %v10935_v42  ;;  %v10938_v28 = vld [vmem:[#allocation66_spill] sm:$0xff]  ;;  %v2025_v51 = vpack.c.bf16 %v10940_v20, %v10939_v25  ;;  %v10974_v45 = vld [vmem:[#allocation89_spill] sm:$0xff] }
 0x611   : > { %6281 = vmatprep.subr.bf16.mxu1 %v5838_v9  ;;  %v2040_v21 = vpack.c.bf16 %v10934_v58, %v10933_v53  ;;  %v2041_v5 = vpack.c.bf16 %v10938_v28, %v10937_v14  ;;  %v2042_v59 = vpack.c.bf16 %v10942_v8, %v10941_v40  ;;  %v10943_v52 = vpack.c.bf16 %v8605_v13, %v8602_v54  ;;  %v10946_v57 = vld [vmem:[#allocation75_spill] sm:$0xff]  ;;  %v10971_v34 = vld [vmem:[#allocation86_spill] sm:$0xff]  ;;  %v10976_v12 = vld [vmem:[#allocation37_spill] sm:$0xff] }
 0x612   : > { %v10944_v38 = vpack.c.bf16 %v8637_v18, %v8619_v16  ;;  %v10945_v3 = vpack.c.bf16 %v8634_v19, %v8631_v22  ;;  %v10947_v48 = vpack.c.bf16 %v8676_v39, %v10946_v57  ;;  %v10948_v54 = vpack.c.bf16 %v8673_v36, %v8670_v56  ;;  %v10953_v18 = vld [vmem:[#allocation77_spill] sm:$0xff]  ;;  %v10957_v36 = vld [vmem:[#allocation79_spill] sm:$0xff]  ;;  %v10979_v61 = vld [vmem:[#allocation48_spill] sm:$0xff] }
 0x613   : > { %v10949_v13 = vpack.c.bf16 %v8712_v44, %v8693_v27  ;;  %v10950_v16 = vpack.c.bf16 %v8721_v26, %v8709_v7  ;;  %v10951_v22 = vpack.c.bf16 %v8742_v23, %v8731_v47  ;;  %v10952_v19 = vpack.c.bf16 %v8751_v62, %v8738_v29  ;;  %v10959_v27 = vld [vmem:[#allocation81_spill] sm:$0xff]  ;;  %v10960_v7 = vld [vmem:[#allocation80_spill] sm:$0xff]  ;;  %v10963_v29 = vld [vmem:[#allocation82_spill] sm:$0xff] }
 0x614   : > { %6282 = vmatpush3.bf16.msra.mxu1 %v5838_v9  ;;  %v10954_v56 = vpack.c.bf16 %v8780_v41, %v10953_v18  ;;  %v10955_v26 = vpack.c.bf16 %v8787_v63, %v8774_v55  ;;  %v10956_v23 = vpack.c.bf16 %v8817_v50, %v8809_v33  ;;  %v10958_v39 = vpack.c.bf16 %v8848_v17, %v10957_v36  ;;  %v10962_v47 = vld [vmem:[#allocation85_spill] sm:$0xff]  ;;  %v10965_v55 = vld [vmem:[#allocation27_spill] sm:$0xff]  ;;  %v10967_v33 = vld [vmem:[#allocation84_spill] sm:$0xff] }
 0x615   : > { %6315 = vmatprep.subr.bf16.mxu1 %v5854_v6  ;;  %v10961_v44 = vpack.c.bf16 %v10959_v27, %v10960_v7  ;;  %v10964_v62 = vpack.c.bf16 %v10962_v47, %v10963_v29  ;;  %v10966_v41 = vld [vmem:[#allocation31_spill] sm:$0xff]  ;;  %v10973_v9 = vld [vmem:[#allocation88_spill] sm:$0xff]  ;;  %v2741_v43 = vmul.bf16 %v9144_v30, %v10974_v45  ;;  %v10980_v60 = vld [vmem:[#allocation49_spill] sm:$0xff] }
 0x616   : > { %6216 = vmatmul.mubr.msk.bf16.gmra.mrb[28].mxu0 %vm997_vm0, %v2038_v0  ;;  %6252 = vmatmul.mubr.msk.bf16.gmra.mrb[24].mxu1 %vm997_vm0, %v2022_v37  ;;  %v9303_v63 = vpack.c.bf16 %v10966_v41, %v10965_v55  ;;  %v10968_v50 = vld [vmem:[#allocation83_spill] sm:$0xff]  ;;  %v2740_v1 = vmul.bf16 %v9144_v30, %v10973_v9  ;;  %v10975_v0 = vld [vmem:[#allocation36_spill] sm:$0xff]  ;;  %v10977_v37 = vld [vmem:[#allocation42_spill] sm:$0xff] }
 0x617   : > { %6219 = vmatprep.mubr.msk.bf16.mxu0 %vm997_vm0, %v2039_v32  ;;  %6255 = vmatprep.mubr.msk.bf16.mxu1 %vm997_vm0, %v2023_v49  ;;  %v10969_v35 = vpack.c.bf16 %v10967_v33, %v10968_v50  ;;  %v10970_v17 = vld [vmem:[#allocation87_spill] sm:$0xff]  ;;  %v2005_v2 = vpack.c.bf16 %v10976_v12, %v10975_v0  ;;  %v2007_v49 = vpack.c.bf16 %v10980_v60, %v10979_v61  ;;  %v10981_v30 = vld [vmem:[#allocation54_spill] sm:$0xff]  ;;  %v10982_v53 = vld [vmem:[#allocation56_spill] sm:$0xff] }
 0x618   : > { %v10972_v31 = vpack.c.bf16 %v10970_v17, %v10971_v34  ;;  %v10978_v46 = vld [vmem:[#allocation43_spill] sm:$0xff]  ;;  %v5855_v32 = vcombine.low %v2740_v1, %v2741_v43  ;;  %v2008_v58 = vpack.c.bf16 %v10982_v53, %v10981_v30  ;;  %v10984_v42 = vld [vmem:[#allocation61_spill] sm:$0xff]  ;;  %v10989_v20 = vld [vmem:[#allocation72_spill] sm:$0xff] }
 0x619   : > { %v2006_v11 = vpack.c.bf16 %v10978_v46, %v10977_v37  ;;  %v10987_v28 = vld [vmem:[#allocation69_spill] sm:$0xff]  ;;  %v10991_v8 = vld [vmem:[#allocation74_spill] sm:$0xff]  ;;  %v10995_v57 = vld [vmem:[#allocation92_spill] sm:$0xff] }
 0x61a   : > { %v6785_v18 = vld [vmem:[%s10642_s20] sm:$0xff]  }
 0x61b   : > { %6387 = vmatprep.subr.bf16.mxu0 %v6785_v18 }
 0x61c   : > { %6388 = vmatpush3.bf16.msra.mxu0 %v6785_v18 }
 0x61e   : > { %6220 = vmatmul.mubr.msk.bf16.gmra.mrb[32].mxu0 %vm997_vm0, %v2040_v21  ;;  %6256 = vmatmul.mubr.msk.bf16.gmra.mrb[28].mxu1 %vm997_vm0, %v2024_v4  ;;  %v10983_v21 = vld [vmem:[#allocation57_spill] sm:$0xff]  ;;  %v10986_v4 = vld [vmem:[#allocation68_spill] sm:$0xff] }
 0x61f   : > { %6223 = vmatprep.mubr.msk.bf16.mxu0 %vm997_vm0, %v2041_v5  ;;  %6259 = vmatprep.mubr.msk.bf16.mxu1 %vm997_vm0, %v2025_v51  ;;  %v2009_v10 = vpack.c.bf16 %v10984_v42, %v10983_v21  ;;  %v10988_v5 = vld [vmem:[#allocation70_spill] sm:$0xff]  ;;  %v10990_v51 = vld [vmem:[#allocation73_spill] sm:$0xff] }
 0x620   : > { %v2011_v25 = vpack.c.bf16 %v10988_v5, %v10987_v28  ;;  %v2012_v40 = vpack.c.bf16 %v10990_v51, %v10989_v20 }
 0x626   : > { %6224 = vmatmul.mubr.msk.bf16.gmra.mrb[36].mxu0 %vm997_vm0, %v2042_v59  ;;  %6260 = vmatmul.mubr.msk.bf16.gmra.mrb[32].mxu1 %vm997_vm0, %v10943_v52  ;;  %v10992_v59 = vld [vmem:[#allocation76_spill] sm:$0xff] }
 0x627   : > { %6227 = vmatprep.mubr.msk.bf16.mxu0 %vm997_vm0, %v10944_v38  ;;  %6263 = vmatprep.mubr.msk.bf16.mxu1 %vm997_vm0, %v10945_v3  ;;  %v2013_v52 = vpack.c.bf16 %v10992_v59, %v10991_v8  ;;  %v10993_v38 = vld [vmem:[#allocation90_spill] sm:$0xff]  ;;  %v10994_v3 = vld [vmem:[#allocation91_spill] sm:$0xff] }
 0x62e   : > { %6228 = vmatmul.mubr.msk.bf16.gmra.mrb[40].mxu0 %vm997_vm0, %v10947_v48  ;;  %6264 = vmatmul.mubr.msk.bf16.gmra.mrb[36].mxu1 %vm997_vm0, %v10948_v54  ;;  %v10996_v48 = vld [vmem:[#allocation78_spill] sm:$0xff]  ;;  %v10997_v54 = vld [vmem:[#allocation93_spill] sm:$0xff] }
 0x62f   : > { %6231 = vmatprep.mubr.msk.bf16.mxu0 %vm997_vm0, %v10949_v13  ;;  %6267 = vmatprep.mubr.msk.bf16.mxu1 %vm997_vm0, %v10950_v16  ;;  %v7392_v13 = vmov 0.0|0.0   ;;  %v10998_v16 = vld [vmem:[#allocation24_spill] sm:$0xff] }
 0x636   : > { %6232 = vmatmul.mubr.msk.bf16.gmra.mrb[44].mxu0 %vm997_vm0, %v10951_v22  ;;  %6268 = vmatmul.mubr.msk.bf16.gmra.mrb[40].mxu1 %vm997_vm0, %v10952_v19  ;;  %v10999_v22 = vld [vmem:[#allocation26_spill] sm:$0xff] }
 0x637   : > { %6235 = vmatprep.mubr.msk.bf16.mxu0 %vm997_vm0, %v10954_v56  ;;  %6271 = vmatprep.mubr.msk.bf16.mxu1 %vm997_vm0, %v10955_v26  ;;  %v2003_v19 = vpack.c.bf16 %v10999_v22, %v10998_v16  ;;  %v6786_v56 = vld [vmem:[%s10642_s20 + $0x8] sm:$0xff]  }
 0x638   : > { %6389 = vmatprep.subr.bf16.mxu0 %v6786_v56 }
 0x639   : > { %6390 = vmatpush3.bf16.msra.mxu0 %v6786_v56 }
 0x63e   : > { %6236 = vmatmul.mubr.msk.bf16.gmra.mrb[48].mxu0 %vm997_vm0, %v10956_v23  ;;  %6272 = vmatmul.mubr.msk.bf16.gmra.mrb[44].mxu1 %vm997_vm0, %v10958_v39 }
 0x63f   : > { %6239 = vmatprep.mubr.msk.bf16.mxu0 %vm997_vm0, %v10961_v44  ;;  %6275 = vmatprep.mubr.msk.bf16.mxu1 %vm997_vm0, %v10964_v62 }
 0x646   : > { %6240 = vmatmul.mubr.msk.bf16.gmra.mrb[52].mxu0 %vm997_vm0, %v10969_v35  ;;  %6276 = vmatmul.mubr.msk.bf16.gmra.mrb[48].mxu1 %vm997_vm0, %v10972_v31 }
 0x647   : > { %6283 = vmatprep.mubr.msk.bf16.mxu1 %vm997_vm0, %v9303_v63 }
 0x64e   : > { %6284 = vmatmul.mubr.msk.bf16.vlgmr.msra.gmra.mrb[20].mxu1 %vm997_vm0, %v2005_v2 }
 0x64f   : > { %6316 = vmatpush3.bf16.msra.mxu1 %v5854_v6  ;;  %6287 = vmatprep.mubr.msk.bf16.mxu1 %vm997_vm0, %v2006_v11  ;;  %v10985_v6 = vld [vmem:[#allocation63_spill] sm:$0xff] }
 0x650   : > { %6317 = vmatprep.subr.bf16.mxu1 %v5855_v32  ;;  %v2010_v14 = vpack.c.bf16 %v10986_v4, %v10985_v6 }
 0x653   : > { %6318 = vmatpush3.bf16.msra.mxu1 %v5855_v32 }
 0x654   : > { %6351 = vmatprep.subr.bf16.mxu1 %v9210_v15 }
 0x656   : > { %6288 = vmatmul.mubr.msk.bf16.gmra.mrb[24].mxu1 %vm997_vm0, %v2007_v49 }
 0x657   : > { %6291 = vmatprep.mubr.msk.bf16.mxu1 %vm997_vm0, %v2008_v58 }
 0x65e   : > { %6292 = vmatmul.mubr.msk.bf16.gmra.mrb[28].mxu1 %vm997_vm0, %v2009_v10 }
 0x65f   : > { %6295 = vmatprep.mubr.msk.bf16.mxu1 %vm997_vm0, %v2010_v14 }
 0x666   : > { %6296 = vmatmul.mubr.msk.bf16.gmra.mrb[32].mxu1 %vm997_vm0, %v2011_v25 }
 0x667   : > { %6299 = vmatprep.mubr.msk.bf16.mxu1 %vm997_vm0, %v2012_v40 }
 0x66e   : > { %6300 = vmatmul.mubr.msk.bf16.gmra.mrb[36].mxu1 %vm997_vm0, %v2013_v52 }
 0x66f   : > { %6303 = vmatprep.mubr.msk.bf16.mxu1 %vm997_vm0, %v10993_v38 }
 0x676   : > { %6304 = vmatmul.mubr.msk.bf16.gmra.mrb[40].mxu1 %vm997_vm0, %v10994_v3 }
 0x677   : > { %6307 = vmatprep.mubr.msk.bf16.mxu1 %vm997_vm0, %v10995_v57 }
 0x67e   : > { %6308 = vmatmul.mubr.msk.bf16.gmra.mrb[44].mxu1 %vm997_vm0, %v10996_v48 }
 0x67f   : > { %6311 = vmatprep.mubr.msk.bf16.mxu1 %vm997_vm0, %v10997_v54 }
 0x686   : > { %6312 = vmatmul.mubr.bf16.gmra.mrb[48].mxu1 %v7392_v13 }
 0x687   : > { %6319 = vmatprep.mubr.bf16.mxu1 %v7392_v13 }
 0x68e   : > { %6320 = vmatmul.mubr.msk.bf16.vlgmr.msra.gmra.mrb[20].mxu1 %vm997_vm0, %v2003_v19 }
 0x68f   : > { %6352 = vmatpush3.bf16.msra.mxu1 %v9210_v15  ;;  %6323 = vmatprep.mubr.msk.bf16.mxu1 %vm997_vm0, %v9303_v63 }
 0x690   : > { %6353 = vmatprep.subr.bf16.mxu1 %v9212_v24 }
 0x693   : > { %6354 = vmatpush3.bf16.msra.mxu1 %v9212_v24 }
 0x696   : > { %6324 = vmatmul.mubr.msk.bf16.gmra.mrb[24].mxu1 %vm997_vm0, %v2005_v2 }
 0x697   : > { %6327 = vmatprep.mubr.msk.bf16.mxu1 %vm997_vm0, %v2006_v11 }
 0x69e   : > { %6328 = vmatmul.mubr.msk.bf16.gmra.mrb[28].mxu1 %vm997_vm0, %v2007_v49 }
 0x69f   : > { %6331 = vmatprep.mubr.msk.bf16.mxu1 %vm997_vm0, %v2008_v58 }
 0x6a6   : > { %6332 = vmatmul.mubr.msk.bf16.gmra.mrb[32].mxu1 %vm997_vm0, %v2009_v10 }
 0x6a7   : > { %6335 = vmatprep.mubr.msk.bf16.mxu1 %vm997_vm0, %v2010_v14 }
 0x6ae   : > { %6336 = vmatmul.mubr.msk.bf16.gmra.mrb[36].mxu1 %vm997_vm0, %v2011_v25 }
 0x6af   : > { %6339 = vmatprep.mubr.msk.bf16.mxu1 %vm997_vm0, %v2012_v40 }
 0x6b6   : > { %6340 = vmatmul.mubr.msk.bf16.gmra.mrb[40].mxu1 %vm997_vm0, %v2013_v52 }
 0x6b7   : > { %6343 = vmatprep.mubr.msk.bf16.mxu1 %vm997_vm0, %v10993_v38 }
 0x6be   : > { %6344 = vmatmul.mubr.msk.bf16.gmra.mrb[44].mxu1 %vm997_vm0, %v10994_v3 }
 0x6bf   : > { %6347 = vmatprep.mubr.msk.bf16.mxu1 %vm997_vm0, %v10995_v57 }
 0x6c6   : > { %6348 = vmatmul.mubr.msk.bf16.gmra.mrb[48].mxu1 %vm997_vm0, %v10996_v48 }
 0x6c7   : > { %6355 = vmatprep.mubr.msk.bf16.mxu1 %vm997_vm0, %v2003_v19 }
 0x6ce   : > { %6356 = vmatmul.mubr.msk.bf16.vlgmr.msra.gmra.mrb[20].mxu1 %vm997_vm0, %v9303_v63 }
 0x6cf   : > { %6359 = vmatprep.mubr.msk.bf16.mxu1 %vm997_vm0, %v2005_v2 }
 0x6d6   : > { %6360 = vmatmul.mubr.msk.bf16.gmra.mrb[24].mxu1 %vm997_vm0, %v2006_v11 }
 0x6d7   : > { %6363 = vmatprep.mubr.msk.bf16.mxu1 %vm997_vm0, %v2007_v49 }
 0x6de   : > { %6364 = vmatmul.mubr.msk.bf16.gmra.mrb[28].mxu1 %vm997_vm0, %v2008_v58  ;;  %v11000_v58 = vld [vmem:[#allocation28_spill] sm:$0xff] }
 0x6df   : > { %6367 = vmatprep.mubr.msk.bf16.mxu1 %vm997_vm0, %v2009_v10 }
 0x6e1   : > { %v6213_v15 = vpop.f32.mrb[24].mxu0 }
 0x6e2   : > { %v2867_v24 = vpop.f32.mrb[25].mxu0 }
 0x6e3   : > { %v6214_v26 = vpop.f32.mrb[26].mxu0 }
 0x6e4   : > { %v2870_v23 = vpop.f32.mrb[27].mxu0 }
 0x6e6   : > { %6368 = vmatmul.mubr.msk.bf16.gmra.mrb[32].mxu1 %vm997_vm0, %v2010_v14  ;;  %v11001_v14 = vld [vmem:[#allocation29_spill] sm:$0xff] }
 0x6e7   : > { %6371 = vmatprep.mubr.msk.bf16.mxu1 %vm997_vm0, %v2011_v25 }
 0x6e9   : > { %v6217_v36 = vpop.f32.mrb[28].mxu0 }
 0x6ea   : > { %v2883_v39 = vpop.f32.mrb[29].mxu0 }
 0x6eb   : > { %v6218_v27 = vpop.f32.mrb[30].mxu0 }
 0x6ec   : > { %v2886_v7 = vpop.f32.mrb[31].mxu0 }
 0x6ee   : > { %6372 = vmatmul.mubr.msk.bf16.gmra.mrb[36].mxu1 %vm997_vm0, %v2012_v40 }
 0x6ef   : > { %6375 = vmatprep.mubr.msk.bf16.mxu1 %vm997_vm0, %v2013_v52 }
 0x6f1   : > { %v9400_v44 = vpop.f32.mrb[32].mxu0 }
 0x6f2   : > { %v9402_v47 = vpop.f32.mrb[33].mxu0 }
 0x6f3   : > { %v9404_v29 = vpop.f32.mrb[34].mxu0 }
 0x6f4   : > { %v9406_v62 = vpop.f32.mrb[35].mxu0 }
 0x6f6   : > { %6376 = vmatmul.mubr.msk.bf16.gmra.mrb[40].mxu1 %vm997_vm0, %v10993_v38 }
 0x6f7   : > { %6379 = vmatprep.mubr.msk.bf16.mxu1 %vm997_vm0, %v10994_v3 }
 0x6f9   : > { %v9412_v55 = vpop.f32.mrb[36].mxu0 }
 0x6fa   : > { %v9414_v41 = vpop.f32.mrb[37].mxu0 }
 0x6fb   : > { %v9416_v63 = vpop.f32.mrb[38].mxu0 }
 0x6fc   : > { %v9418_v33 = vpop.f32.mrb[39].mxu0 }
 0x6fe   : > { %6380 = vmatmul.mubr.msk.bf16.gmra.mrb[44].mxu1 %vm997_vm0, %v10995_v57 }
 0x6ff   : > { %6383 = vmatprep.mubr.msk.bf16.mxu1 %vm997_vm0, %v10996_v48 }
 0x701   : > { %v9424_v50 = vpop.f32.mrb[40].mxu0 }
 0x702   : > { %v9426_v35 = vpop.f32.mrb[41].mxu0 }
 0x703   : > { %v9428_v17 = vpop.f32.mrb[42].mxu0 }
 0x704   : > { %v9430_v34 = vpop.f32.mrb[43].mxu0 }
 0x706   : > { %6384 = vmatmul.mubr.msk.bf16.gmra.mrb[48].mxu1 %vm997_vm0, %v10997_v54 }
 0x709   : > { %v9434_v31 = vpop.f32.mrb[44].mxu0 }
 0x70a   : > { %v9436_v9 = vpop.f32.mrb[45].mxu0 }
 0x70b   : > { %v9438_v1 = vpop.f32.mrb[46].mxu0 }
 0x70c   : > { %v9440_v45 = vpop.f32.mrb[47].mxu0 }
 0x711   : > { %v9442_v43 = vpop.f32.mrb[48].mxu0 }
 0x712   : > { %v9444_v0 = vpop.f32.mrb[49].mxu0 }
 0x713   : > { %v9446_v12 = vpop.f32.mrb[50].mxu0 }
 0x714   : > { %v9448_v2 = vpop.f32.mrb[51].mxu0 }
 0x719   : > { %v9450_v37 = vpop.f32.mrb[52].mxu0 }
 0x71a   : > { %v9452_v46 = vpop.f32.mrb[53].mxu0 }
 0x71b   : > { %v9454_v11 = vpop.f32.mrb[54].mxu0 }
 0x71c   : > { %v9456_v32 = vpop.f32.mrb[55].mxu0 }
 0x7a1   : > { %v6357_v61 = vpop.f32.mrb[20].mxu1 }
 0x7a2   : > { %v6507_v60 = vadd.f32 %v6357_v61, %v6213_v15  ;;  %v3722_v49 = vpop.f32.mrb[21].mxu1 }
 0x7a3   : > { %v6508_v30 = vadd.f32 %v3722_v49, %v2867_v24  ;;  %v6358_v53 = vpop.f32.mrb[22].mxu1 }
 0x7a4   : > { %v3890_v21 = vadd.f32 %v6507_v60, %v11000_v58  ;;  %v6509_v42 = vadd.f32 %v6358_v53, %v6214_v26  ;;  %v3725_v10 = vpop.f32.mrb[23].mxu1 }
 0x7a5   : > { %v3888_v6 = vadd.f32 %v6508_v30, %v11000_v58  ;;  %v6510_v4 = vadd.f32 %v3725_v10, %v2870_v23 }
 0x7a6   : > { %v3929_v28 = vadd.f32 %v11001_v14, %v3890_v21  ;;  %v3891_v5 = vadd.f32 %v6509_v42, %v11000_v58 }
 0x7a7   : > { %v3927_v25 = vadd.f32 %v11001_v14, %v3888_v6  ;;  %v3889_v20 = vadd.f32 %v6510_v4, %v11000_v58 }
 0x7a8   : > { %v3930_v51 = vadd.f32 %v11001_v14, %v3891_v5 }
 0x7a9   : > { %v3928_v40 = vadd.f32 %v11001_v14, %v3889_v20  ;;  %v6361_v8 = vpop.f32.mrb[24].mxu1 }
 0x7aa   : > { %v3960_v59 = vpack.c.bf16 %v3930_v51, %v3929_v28  ;;  %v6511_v52 = vadd.f32 %v6361_v8, %v6217_v36  ;;  %v3738_v38 = vpop.f32.mrb[25].mxu1 }
 0x7ab   : > { %v3959_v3 = vpack.c.bf16 %v3928_v40, %v3927_v25  ;;  %v6512_v57 = vadd.f32 %v3738_v38, %v2883_v39  ;;  %v6362_v48 = vpop.f32.mrb[26].mxu1 }
 0x7ac   : > { %v3894_v54 = vadd.f32 %v6511_v52, %v11000_v58  ;;  %v6513_v13 = vadd.f32 %v6362_v48, %v6218_v27  ;;  %v3741_v16 = vpop.f32.mrb[27].mxu1 }
 0x7ad   : > { %v3892_v22 = vadd.f32 %v6512_v57, %v11000_v58  ;;  %v6514_v19 = vadd.f32 %v3741_v16, %v2886_v7  ;;  %6391 = vmatprep.mubr.msk.bf16.mxu0 %vm997_vm0, %v3959_v3 }
 0x7ae   : > { %v3933_v18 = vadd.f32 %v11001_v14, %v3894_v54  ;;  %v3895_v56 = vadd.f32 %v6513_v13, %v11000_v58  ;;  %6392 = vmatmul.mubr.msk.bf16.vlgmr.msra.gmra.mrb[56].mxu0 %vm997_vm0, %v3960_v59 }
 0x7af   : > { %v3931_v15 = vadd.f32 %v11001_v14, %v3892_v22  ;;  %v3893_v24 = vadd.f32 %v6514_v19, %v11000_v58 }
 0x7b0   : > { %v3934_v26 = vadd.f32 %v11001_v14, %v3895_v56 }
 0x7b1   : > { %v3932_v23 = vadd.f32 %v11001_v14, %v3893_v24  ;;  %v6365_v36 = vpop.f32.mrb[28].mxu1 }
 0x7b2   : > { %v3962_v39 = vpack.c.bf16 %v3934_v26, %v3933_v18  ;;  %v6515_v27 = vadd.f32 %v6365_v36, %v9400_v44  ;;  %v3754_v7 = vpop.f32.mrb[29].mxu1 }
 0x7b3   : > { %v3961_v61 = vpack.c.bf16 %v3932_v23, %v3931_v15  ;;  %v6516_v60 = vadd.f32 %v3754_v7, %v9402_v47  ;;  %v6366_v49 = vpop.f32.mrb[30].mxu1 }
 0x7b4   : > { %v3898_v30 = vadd.f32 %v6515_v27, %v11000_v58  ;;  %v6517_v53 = vadd.f32 %v6366_v49, %v9404_v29  ;;  %v3757_v21 = vpop.f32.mrb[31].mxu1 }
 0x7b5   : > { %v3896_v42 = vadd.f32 %v6516_v60, %v11000_v58  ;;  %v6518_v10 = vadd.f32 %v3757_v21, %v9406_v62  ;;  %6395 = vmatprep.mubr.msk.bf16.mxu0 %vm997_vm0, %v3961_v61 }
 0x7b6   : > { %v3937_v6 = vadd.f32 %v11001_v14, %v3898_v30  ;;  %v3899_v44 = vadd.f32 %v6517_v53, %v11000_v58  ;;  %6396 = vmatmul.mubr.msk.bf16.gmra.mrb[60].mxu0 %vm997_vm0, %v3962_v39 }
 0x7b7   : > { %v3935_v47 = vadd.f32 %v11001_v14, %v3896_v42  ;;  %v3897_v4 = vadd.f32 %v6518_v10, %v11000_v58 }
 0x7b8   : > { %v3938_v28 = vadd.f32 %v11001_v14, %v3899_v44 }
 0x7b9   : > { %v3936_v29 = vadd.f32 %v11001_v14, %v3897_v4  ;;  %v6369_v5 = vpop.f32.mrb[32].mxu1 }
 0x7ba   : > { %v3964_v25 = vpack.c.bf16 %v3938_v28, %v3937_v6  ;;  %v6519_v62 = vadd.f32 %v6369_v5, %v9412_v55  ;;  %v3770_v20 = vpop.f32.mrb[33].mxu1 }
 0x7bb   : > { %v3963_v51 = vpack.c.bf16 %v3936_v29, %v3935_v47  ;;  %v6520_v40 = vadd.f32 %v3770_v20, %v9414_v41  ;;  %v6370_v8 = vpop.f32.mrb[34].mxu1 }
 0x7bc   : > { %v3902_v59 = vadd.f32 %v6519_v62, %v11000_v58  ;;  %v6521_v52 = vadd.f32 %v6370_v8, %v9416_v63  ;;  %v3773_v38 = vpop.f32.mrb[35].mxu1 }
 0x7bd   : > { %v3900_v3 = vadd.f32 %v6520_v40, %v11000_v58  ;;  %v6522_v57 = vadd.f32 %v3773_v38, %v9418_v33  ;;  %6399 = vmatprep.mubr.msk.bf16.mxu0 %vm997_vm0, %v3963_v51 }
 0x7be   : > { %v3941_v48 = vadd.f32 %v11001_v14, %v3902_v59  ;;  %v3903_v55 = vadd.f32 %v6521_v52, %v11000_v58  ;;  %6400 = vmatmul.mubr.msk.bf16.gmra.mrb[64].mxu0 %vm997_vm0, %v3964_v25 }
 0x7bf   : > { %v3939_v41 = vadd.f32 %v11001_v14, %v3900_v3  ;;  %v3901_v54 = vadd.f32 %v6522_v57, %v11000_v58 }
 0x7c0   : > { %v3942_v13 = vadd.f32 %v11001_v14, %v3903_v55 }
 0x7c1   : > { %v3940_v63 = vadd.f32 %v11001_v14, %v3901_v54  ;;  %v6373_v16 = vpop.f32.mrb[36].mxu1 }
 0x7c2   : > { %v3966_v22 = vpack.c.bf16 %v3942_v13, %v3941_v48  ;;  %v6523_v33 = vadd.f32 %v6373_v16, %v9424_v50  ;;  %v3786_v19 = vpop.f32.mrb[37].mxu1 }
 0x7c3   : > { %v3965_v18 = vpack.c.bf16 %v3940_v63, %v3939_v41  ;;  %v6524_v56 = vadd.f32 %v3786_v19, %v9426_v35  ;;  %v6374_v15 = vpop.f32.mrb[38].mxu1 }
 0x7c4   : > { %v3906_v24 = vadd.f32 %v6523_v33, %v11000_v58  ;;  %v6525_v26 = vadd.f32 %v6374_v15, %v9428_v17  ;;  %v3789_v23 = vpop.f32.mrb[39].mxu1 }
 0x7c5   : > { %v3904_v36 = vadd.f32 %v6524_v56, %v11000_v58  ;;  %v6526_v39 = vadd.f32 %v3789_v23, %v9430_v34  ;;  %6403 = vmatprep.mubr.msk.bf16.mxu0 %vm997_vm0, %v3965_v18 }
 0x7c6   : > { %v3945_v27 = vadd.f32 %v11001_v14, %v3906_v24  ;;  %v3907_v50 = vadd.f32 %v6525_v26, %v11000_v58  ;;  %6404 = vmatmul.mubr.msk.bf16.gmra.mrb[68].mxu0 %vm997_vm0, %v3966_v22 }
 0x7c7   : > { %v3943_v35 = vadd.f32 %v11001_v14, %v3904_v36  ;;  %v3905_v7 = vadd.f32 %v6526_v39, %v11000_v58 }
 0x7c8   : > { %v3946_v61 = vadd.f32 %v11001_v14, %v3907_v50 }
 0x7c9   : > { %v3944_v17 = vadd.f32 %v11001_v14, %v3905_v7  ;;  %v6377_v60 = vpop.f32.mrb[40].mxu1 }
 0x7ca   : > { %v3968_v49 = vpack.c.bf16 %v3946_v61, %v3945_v27  ;;  %v6527_v34 = vadd.f32 %v6377_v60, %v9434_v31  ;;  %v3802_v30 = vpop.f32.mrb[41].mxu1  ;;  %v9565_v27 = vld [vmem:[%s11002_s16] ss:$0 sm:$0xff]  ;;  %s11027_s16 = sld [smem:[#allocation113_spill]] }
 0x7cb   : > { %v3967_v53 = vpack.c.bf16 %v3944_v17, %v3943_v35  ;;  %v6528_v21 = vadd.f32 %v3802_v30, %v9436_v9  ;;  %v6378_v42 = vpop.f32.mrb[42].mxu1  ;;  %v7009_v17 = vld [vmem:[%s7844_s24] sm:$0xff]  ;;  %v7010_v30 = vld [vmem:[%s7844_s24 + $0x10] sm:$0xff] }
 0x7cc   : > { %v3910_v10 = vadd.f32 %v6527_v34, %v11000_v58  ;;  %v6529_v6 = vadd.f32 %v6378_v42, %v9438_v1  ;;  %v3805_v44 = vpop.f32.mrb[43].mxu1 }
 0x7cd   : > { %v3908_v47 = vadd.f32 %v6528_v21, %v11000_v58  ;;  %v6530_v4 = vadd.f32 %v3805_v44, %v9440_v45  ;;  %6407 = vmatprep.mubr.msk.bf16.mxu0 %vm997_vm0, %v3967_v53  ;;  %v7011_v21 = vld [vmem:[%s7844_s24 + $0x8] sm:$0xff] }
 0x7ce   : > { %v3949_v28 = vadd.f32 %v11001_v14, %v3910_v10  ;;  %v3911_v31 = vadd.f32 %v6529_v6, %v11000_v58  ;;  %6408 = vmatmul.mubr.msk.bf16.gmra.mrb[72].mxu0 %vm997_vm0, %v3968_v49  ;;  %v7012_v6 = vld [vmem:[%s7844_s24 + $0x18] sm:$0xff] }
 0x7cf   : > { %v3947_v9 = vadd.f32 %v11001_v14, %v3908_v47  ;;  %v3909_v29 = vadd.f32 %v6530_v4, %v11000_v58 }
 0x7d0   : > { %v3950_v5 = vadd.f32 %v11001_v14, %v3911_v31 }
 0x7d1   : > { %v3948_v1 = vadd.f32 %v11001_v14, %v3909_v29  ;;  %v6381_v25 = vpop.f32.mrb[44].mxu1 }
 0x7d2   : > { %v3970_v62 = vpack.c.bf16 %v3950_v5, %v3949_v28  ;;  %v6531_v45 = vadd.f32 %v6381_v25, %v9442_v43  ;;  %v3818_v20 = vpop.f32.mrb[45].mxu1  ;;  %v7013_v25 = vld [vmem:[%s7844_s24 + $0x20] sm:$0xff] }
 0x7d3   : > { %v3969_v51 = vpack.c.bf16 %v3948_v1, %v3947_v9  ;;  %v6532_v40 = vadd.f32 %v3818_v20, %v9444_v0  ;;  %v6382_v8 = vpop.f32.mrb[46].mxu1 }
 0x7d4   : > { %v3914_v59 = vadd.f32 %v6531_v45, %v11000_v58  ;;  %v6533_v52 = vadd.f32 %v6382_v8, %v9446_v12  ;;  %v3821_v38 = vpop.f32.mrb[47].mxu1 }
 0x7d5   : > { %v3912_v3 = vadd.f32 %v6532_v40, %v11000_v58  ;;  %v6534_v57 = vadd.f32 %v3821_v38, %v9448_v2  ;;  %6411 = vmatprep.mubr.msk.bf16.mxu0 %vm997_vm0, %v3969_v51  ;;  %v7014_v40 = vld [vmem:[%s7844_s24 + $0x30] sm:$0xff] }
 0x7d6   : > { %v3953_v48 = vadd.f32 %v11001_v14, %v3914_v59  ;;  %v3915_v43 = vadd.f32 %v6533_v52, %v11000_v58  ;;  %6412 = vmatmul.mubr.msk.bf16.gmra.mrb[76].mxu0 %vm997_vm0, %v3970_v62  ;;  %v7015_v59 = vld [vmem:[%s7844_s24 + $0x28] sm:$0xff] }
 0x7d7   : > { %v3951_v0 = vadd.f32 %v11001_v14, %v3912_v3  ;;  %v3913_v55 = vadd.f32 %v6534_v57, %v11000_v58  ;;  %v7016_v3 = vld [vmem:[%s7844_s24 + $0x38] sm:$0xff] }
 0x7d8   : > { %v3954_v41 = vadd.f32 %v11001_v14, %v3915_v43 }
 0x7d9   : > { %v3952_v12 = vadd.f32 %v11001_v14, %v3913_v55  ;;  %v6385_v54 = vpop.f32.mrb[48].mxu1 }
 0x7da   : > { %v3972_v13 = vpack.c.bf16 %v3954_v41, %v3953_v48  ;;  %v6535_v2 = vadd.f32 %v6385_v54, %v9450_v37  ;;  %v3834_v63 = vpop.f32.mrb[49].mxu1 }
 0x7db   : > { %v3971_v16 = vpack.c.bf16 %v3952_v12, %v3951_v0  ;;  %v6536_v22 = vadd.f32 %v3834_v63, %v9452_v46  ;;  %v6386_v33 = vpop.f32.mrb[50].mxu1 }
 0x7dc   : > { %v3918_v19 = vadd.f32 %v6535_v2, %v11000_v58  ;;  %v6537_v18 = vadd.f32 %v6386_v33, %v9454_v11  ;;  %v3837_v56 = vpop.f32.mrb[51].mxu1  ;;  %v7017_v2 = vld [vmem:[%s7844_s24 + $0x40] sm:$0xff] }
 0x7dd   : > { %v3916_v15 = vadd.f32 %v6536_v22, %v11000_v58  ;;  %v6538_v24 = vadd.f32 %v3837_v56, %v9456_v32  ;;  %6415 = vmatprep.mubr.msk.bf16.mxu0 %vm997_vm0, %v3971_v16  ;;  %v7019_v56 = vld [vmem:[%s7844_s24 + $0x48] sm:$0xff] }
 0x7de   : > { %v3957_v26 = vadd.f32 %v11001_v14, %v3918_v19  ;;  %v3919_v37 = vadd.f32 %v6537_v18, %v11000_v58  ;;  %6416 = vmatmul.mubr.msk.bf16.gmra.mrb[80].mxu0 %vm997_vm0, %v3972_v13  ;;  %v7018_v19 = vld [vmem:[%s7844_s24 + $0x50] sm:$0xff] }
 0x7df   : > { %v3955_v46 = vadd.f32 %v11001_v14, %v3916_v15  ;;  %v3917_v23 = vadd.f32 %v6538_v24, %v11000_v58 }
 0x7e0   : > { %v3958_v11 = vadd.f32 %v11001_v14, %v3919_v37 }
 0x7e1   : > { %v3956_v36 = vadd.f32 %v11001_v14, %v3917_v23 }
 0x7e2   : > { %v3974_v39 = vpack.c.bf16 %v3958_v11, %v3957_v26  ;;  %v7020_v26 = vld [vmem:[%s7844_s24 + $0x58] sm:$0xff] }
 0x7e3   : > { %v3973_v32 = vpack.c.bf16 %v3956_v36, %v3955_v46 }
 0x7e5   : > { %6419 = vmatprep.mubr.msk.bf16.mxu0 %vm997_vm0, %v3973_v32 }
 0x7e6   : > { %6420 = vmatmul.mubr.msk.bf16.gmra.mrb[84].mxu0 %vm997_vm0, %v3974_v39 }
 0x881   : > { %v6393_v50 = vpop.f32.mrb[56].mxu0 }
 0x882   : > { %v4080_v58 = vpop.f32.mrb[57].mxu0  ;;  %v4089_v35 = vadd.f32 %v6393_v50, %v9565_v27 }
 0x883   : > { %v4081_v14 = vadd.f32 %v9565_v27, %v4080_v58  ;;  %v6394_v7 = vpop.f32.mrb[58].mxu0 }
 0x884   : > { %v4083_v61 = vpop.f32.mrb[59].mxu0  ;;  %v4092_v49 = vadd.f32 %v6394_v7, %v9565_v27  ;;  %v9575_v53 = vadd.f32 %v7010_v30, %v4089_v35  ;;  %v7021_v35 = vld [vmem:[%s7844_s24 + $0x60] sm:$0xff]  ;;  %v7023_v30 = vld [vmem:[%s7844_s24 + $0x68] sm:$0xff] }
 0x885   : > { %v9570_v60 = vadd.f32 %v7009_v17, %v4081_v14  ;;  %v4084_v34 = vadd.f32 %v9565_v27, %v4083_v61 }
 0x886   : > { %v9583_v44 = vadd.f32 %v7012_v6, %v4092_v49  ;;  %v4245_v5 = vsel %vm997_vm0, %v9575_v53, 0.0  ;;  %v7022_v49 = vld [vmem:[%s7844_s24 + $0x70] sm:$0xff]  ;;  %v7024_v6 = vld [vmem:[%s7844_s24 + $0x78] sm:$0xff] }
 0x887   : > { %v9578_v42 = vadd.f32 %v7011_v21, %v4084_v34  ;;  %v4239_v10 = vsel %vm997_vm0, %v9570_v60, 0.0 }
 0x888   : > { %4240 = vadd.xlane.f32.xlu0 %v4239_v10  ;;  %v4248_v51 = vsel %vm997_vm0, %v9583_v44, 0.0 }
 0x889   : > { %v6397_v47 = vpop.f32.mrb[60].mxu0  ;;  %v4242_v4 = vsel %vm997_vm0, %v9578_v42, 0.0 }
 0x88a   : > { %4243 = vadd.xlane.f32.xlu1 %v4242_v4  ;;  %v4096_v28 = vpop.f32.mrb[61].mxu0  ;;  %v4105_v31 = vadd.f32 %v6397_v47, %v9565_v27 }
 0x88b   : > { %v4097_v9 = vadd.f32 %v9565_v27, %v4096_v28  ;;  %v6398_v29 = vpop.f32.mrb[62].mxu0 }
 0x88c   : > { %4246 = vadd.xlane.f32.xlu0 %v4245_v5  ;;  %v4099_v1 = vpop.f32.mrb[63].mxu0  ;;  %v4108_v45 = vadd.f32 %v6398_v29, %v9565_v27  ;;  %v9599_v8 = vadd.f32 %v7014_v40, %v4105_v31 }
 0x88d   : > { %v9592_v62 = vadd.f32 %v7013_v25, %v4097_v9  ;;  %v4100_v20 = vadd.f32 %v9565_v27, %v4099_v1 }
 0x88e   : > { %4249 = vadd.xlane.f32.xlu1 %v4248_v51  ;;  %v9607_v57 = vadd.f32 %v7016_v3, %v4108_v45  ;;  %v4257_v54 = vsel %vm997_vm0, %v9599_v8, 0.0  ;;  %v7025_v45 = vld [vmem:[%s7844_s24 + $0x80] sm:$0xff] }
 0x88f   : > { %v9602_v52 = vadd.f32 %v7015_v59, %v4100_v20  ;;  %v4251_v38 = vsel %vm997_vm0, %v9592_v62, 0.0 }
 0x890   : > { %4252 = vadd.xlane.f32.xlu0 %v4251_v38  ;;  %v4260_v33 = vsel %vm997_vm0, %v9607_v57, 0.0  ;;  %v7026_v38 = vld [vmem:[%s7844_s24 + $0x90] sm:$0xff] }
 0x891   : > { %v6401_v48 = vpop.f32.mrb[64].mxu0  ;;  %v4254_v43 = vsel %vm997_vm0, %v9602_v52, 0.0 }
 0x892   : > { %4255 = vadd.xlane.f32.xlu1 %v4254_v43  ;;  %v4112_v0 = vpop.f32.mrb[65].mxu0  ;;  %v4121_v55 = vadd.f32 %v6401_v48, %v9565_v27  ;;  %v7027_v48 = vld [vmem:[%s7844_s24 + $0x88] sm:$0xff] }
 0x893   : > { %v4113_v41 = vadd.f32 %v9565_v27, %v4112_v0  ;;  %v6402_v12 = vpop.f32.mrb[66].mxu0 }
 0x894   : > { %4258 = vadd.xlane.f32.xlu0 %v4257_v54  ;;  %v4115_v13 = vpop.f32.mrb[67].mxu0  ;;  %v4124_v16 = vadd.f32 %v6402_v12, %v9565_v27  ;;  %v9623_v18 = vadd.f32 %v7018_v19, %v4121_v55  ;;  %v7028_v55 = vld [vmem:[%s7844_s24 + $0x98] sm:$0xff] }
 0x895   : > { %v9616_v63 = vadd.f32 %v7017_v2, %v4113_v41  ;;  %v4116_v22 = vadd.f32 %v9565_v27, %v4115_v13 }
 0x896   : > { %4261 = vadd.xlane.f32.xlu1 %v4260_v33  ;;  %v9631_v37 = vadd.f32 %v7020_v26, %v4124_v16  ;;  %v4269_v50 = vsel %vm997_vm0, %v9623_v18, 0.0 }
 0x897   : > { %v9626_v15 = vadd.f32 %v7019_v56, %v4116_v22  ;;  %v4263_v24 = vsel %vm997_vm0, %v9616_v63, 0.0  ;;  %v7029_v56 = vld [vmem:[%s7844_s24 + $0xa0] sm:$0xff] }
 0x898   : > { %4264 = vadd.xlane.f32.xlu0 %v4263_v24  ;;  %11004 = vst [vmem:[#allocation30_spill] sm:$0xff] %v9631_v37  ;;  %v4272_v17 = vsel %vm997_vm0, %v9631_v37, 0.0 }
 0x899   : > { %11003 = vst [vmem:[#allocation25_spill] sm:$0xff] %v9626_v15  ;;  %v6405_v46 = vpop.f32.mrb[68].mxu0  ;;  %v4266_v23 = vsel %vm997_vm0, %v9626_v15, 0.0 }
 0x89a   : > { %4267 = vadd.xlane.f32.xlu1 %v4266_v23  ;;  %v4128_v11 = vpop.f32.mrb[69].mxu0  ;;  %v4137_v36 = vadd.f32 %v6405_v46, %v9565_v27 }
 0x89b   : > { %v4129_v39 = vadd.f32 %v9565_v27, %v4128_v11  ;;  %v6406_v32 = vpop.f32.mrb[70].mxu0  ;;  %v7030_v11 = vld [vmem:[%s7844_s24 + $0xb0] sm:$0xff] }
 0x89c   : > { %4270 = vadd.xlane.f32.xlu0 %v4269_v50  ;;  %v4131_v58 = vpop.f32.mrb[71].mxu0  ;;  %v4140_v7 = vadd.f32 %v6406_v32, %v9565_v27  ;;  %v9647_v34 = vadd.f32 %v7022_v49, %v4137_v36 }
 0x89d   : > { %v9640_v14 = vadd.f32 %v7021_v35, %v4129_v39  ;;  %v4132_v61 = vadd.f32 %v9565_v27, %v4131_v58  ;;  %v7031_v39 = vld [vmem:[%s7844_s24 + $0xa8] sm:$0xff]  ;;  %v7032_v58 = vld [vmem:[%s7844_s24 + $0xb8] sm:$0xff] }
 0x89e   : > { %4273 = vadd.xlane.f32.xlu1 %v4272_v17  ;;  %11006 = vst [vmem:[#allocation35_spill] sm:$0xff] %v9647_v34  ;;  %v9655_v47 = vadd.f32 %v7024_v6, %v4140_v7  ;;  %v4281_v1 = vsel %vm997_vm0, %v9647_v34, 0.0 }
 0x89f   : > { %11005 = vst [vmem:[#allocation32_spill] sm:$0xff] %v9640_v14  ;;  %v9650_v21 = vadd.f32 %v7023_v30, %v4132_v61  ;;  %v4275_v10 = vsel %vm997_vm0, %v9640_v14, 0.0 }
 0x8a0   : > { %4276 = vadd.xlane.f32.xlu0 %v4275_v10  ;;  %11008 = vst [vmem:[#allocation34_spill] sm:$0xff] %v9655_v47  ;;  %v4284_v59 = vsel %vm997_vm0, %v9655_v47, 0.0 }
 0x8a1   : > { %11007 = vst [vmem:[#allocation33_spill] sm:$0xff] %v9650_v21  ;;  %v6409_v4 = vpop.f32.mrb[72].mxu0  ;;  %v4278_v28 = vsel %vm997_vm0, %v9650_v21, 0.0 }
 0x8a2   : > { %4279 = vadd.xlane.f32.xlu1 %v4278_v28  ;;  %v4144_v31 = vpop.f32.mrb[73].mxu0  ;;  %v4153_v9 = vadd.f32 %v6409_v4, %v9565_v27  ;;  %v7033_v28 = vld [vmem:[%s7844_s24 + $0xc0] sm:$0xff] }
 0x8a3   : > { %v4145_v29 = vadd.f32 %v9565_v27, %v4144_v31  ;;  %v6410_v5 = vpop.f32.mrb[74].mxu0 }
 0x8a4   : > { %4282 = vadd.xlane.f32.xlu0 %v4281_v1  ;;  %v4147_v25 = vpop.f32.mrb[75].mxu0  ;;  %v4156_v51 = vadd.f32 %v6410_v5, %v9565_v27  ;;  %v9671_v3 = vadd.f32 %v7026_v38, %v4153_v9  ;;  %v7034_v1 = vld [vmem:[%s7844_s24 + $0xd0] sm:$0xff] }
 0x8a5   : > { %v9664_v20 = vadd.f32 %v7025_v45, %v4145_v29  ;;  %v4148_v40 = vadd.f32 %v9565_v27, %v4147_v25  ;;  %v7035_v45 = vld [vmem:[%s7844_s24 + $0xc8] sm:$0xff] }
 0x8a6   : > { %4285 = vadd.xlane.f32.xlu1 %v4284_v59  ;;  %11010 = vst [vmem:[#allocation41_spill] sm:$0xff] %v9671_v3  ;;  %v9679_v41 = vadd.f32 %v7028_v55, %v4156_v51  ;;  %v4293_v33 = vsel %vm997_vm0, %v9671_v3, 0.0  ;;  %v7036_v59 = vld [vmem:[%s7844_s24 + $0xd8] sm:$0xff] }
 0x8a7   : > { %11009 = vst [vmem:[#allocation38_spill] sm:$0xff] %v9664_v20  ;;  %v9674_v43 = vadd.f32 %v7027_v48, %v4148_v40  ;;  %v4287_v0 = vsel %vm997_vm0, %v9664_v20, 0.0 }
 0x8a8   : > { %4288 = vadd.xlane.f32.xlu0 %v4287_v0  ;;  %11012 = vst [vmem:[#allocation40_spill] sm:$0xff] %v9679_v41  ;;  %v4296_v23 = vsel %vm997_vm0, %v9679_v41, 0.0 }
 0x8a9   : > { %11011 = vst [vmem:[#allocation39_spill] sm:$0xff] %v9674_v43  ;;  %v6413_v12 = vpop.f32.mrb[76].mxu0  ;;  %v4290_v54 = vsel %vm997_vm0, %v9674_v43, 0.0 }
 0x8aa   : > { %4291 = vadd.xlane.f32.xlu1 %v4290_v54  ;;  %v4160_v13 = vpop.f32.mrb[77].mxu0  ;;  %v4169_v2 = vadd.f32 %v6413_v12, %v9565_v27 }
 0x8ab   : > { %v4161_v16 = vadd.f32 %v9565_v27, %v4160_v13  ;;  %v6414_v22 = vpop.f32.mrb[78].mxu0 }
 0x8ac   : > { %4294 = vadd.xlane.f32.xlu0 %v4293_v33  ;;  %v4163_v19 = vpop.f32.mrb[79].mxu0  ;;  %v4172_v26 = vadd.f32 %v6414_v22, %v9565_v27  ;;  %v9695_v36 = vadd.f32 %v7030_v11, %v4169_v2  ;;  %v7037_v22 = vld [vmem:[%s7844_s24 + $0xe0] sm:$0xff]  ;;  %v7039_v11 = vld [vmem:[%s7844_s24 + $0xe8] sm:$0xff] }
 0x8ad   : > { %v9688_v24 = vadd.f32 %v7029_v56, %v4161_v16  ;;  %v4164_v46 = vadd.f32 %v9565_v27, %v4163_v19 }
 0x8ae   : > { %4297 = vadd.xlane.f32.xlu1 %v4296_v23  ;;  %11014 = vst [vmem:[#allocation47_spill] sm:$0xff] %v9695_v36  ;;  %v9703_v35 = vadd.f32 %v7032_v58, %v4172_v26  ;;  %v4305_v6 = vsel %vm997_vm0, %v9695_v36, 0.0  ;;  %v7040_v58 = vld [vmem:[%s7844_s24 + $0xf8] sm:$0xff] }
 0x8af   : > { %11013 = vst [vmem:[#allocation44_spill] sm:$0xff] %v9688_v24  ;;  %v9698_v32 = vadd.f32 %v7031_v39, %v4164_v46  ;;  %v4299_v50 = vsel %vm997_vm0, %v9688_v24, 0.0  ;;  %v7038_v46 = vld [vmem:[%s7844_s24 + $0xf0] sm:$0xff] }
 0x8b0   : > { %4300 = vadd.xlane.f32.xlu0 %v4299_v50  ;;  %11016 = vst [vmem:[#allocation46_spill] sm:$0xff] %v9703_v35  ;;  %v4308_v5 = vsel %vm997_vm0, %v9703_v35, 0.0 }
 0x8b1   : > { %11015 = vst [vmem:[#allocation45_spill] sm:$0xff] %v9698_v32  ;;  %v6417_v7 = vpop.f32.mrb[80].mxu0  ;;  %v4302_v61 = vsel %vm997_vm0, %v9698_v32, 0.0 }
 0x8b2   : > { %4303 = vadd.xlane.f32.xlu1 %v4302_v61  ;;  %v4176_v17 = vpop.f32.mrb[81].mxu0  ;;  %v4185_v49 = vadd.f32 %v6417_v7, %v9565_v27 }
 0x8b3   : > { %v4177_v30 = vadd.f32 %v9565_v27, %v4176_v17  ;;  %v6418_v10 = vpop.f32.mrb[82].mxu0 }
 0x8b4   : > { %4306 = vadd.xlane.f32.xlu0 %v4305_v6  ;;  %v4179_v4 = vpop.f32.mrb[83].mxu0  ;;  %v4188_v9 = vadd.f32 %v6418_v10, %v9565_v27  ;;  %v9719_v25 = vadd.f32 %v7034_v1, %v4185_v49  ;;  %v6787_v49 = vld [vmem:[%s11025_s14] sm:$0xff]  }
 0x8b5   : > { %v9712_v31 = vadd.f32 %v7033_v28, %v4177_v30  ;;  %v4180_v29 = vadd.f32 %v9565_v27, %v4179_v4  ;;  %v6788_v30 = vld [vmem:[%s11025_s14 + $0x8] sm:$0xff]   ;;  %6423 = vmatprep.subr.bf16.mxu0 %v6787_v49 }
 0x8b6   : > { %4309 = vadd.xlane.f32.xlu1 %v4308_v5  ;;  %11018 = vst [vmem:[#allocation52_spill] sm:$0xff] %v9719_v25  ;;  %v9727_v38 = vadd.f32 %v7036_v59, %v4188_v9  ;;  %v4317_v2 = vsel %vm997_vm0, %v9719_v25, 0.0  ;;  %6424 = vmatpush3.bf16.msra.mxu0 %v6787_v49 }
 0x8b7   : > { %11017 = vst [vmem:[#allocation50_spill] sm:$0xff] %v9712_v31  ;;  %v9722_v51 = vadd.f32 %v7035_v45, %v4180_v29  ;;  %v4311_v40 = vsel %vm997_vm0, %v9712_v31, 0.0  ;;  %6425 = vmatprep.subr.bf16.mxu0 %v6788_v30 }
 0x8b8   : > { %4312 = vadd.xlane.f32.xlu0 %v4311_v40  ;;  %11020 = vst [vmem:[#allocation53_spill] sm:$0xff] %v9727_v38  ;;  %v4320_v26 = vsel %vm997_vm0, %v9727_v38, 0.0 }
 0x8b9   : > { %11019 = vst [vmem:[#allocation51_spill] sm:$0xff] %v9722_v51  ;;  %v6421_v48 = vpop.f32.mrb[84].mxu0  ;;  %v4314_v0 = vsel %vm997_vm0, %v9722_v51, 0.0 }
 0x8ba   : > { %4315 = vadd.xlane.f32.xlu1 %v4314_v0  ;;  %v4192_v55 = vpop.f32.mrb[85].mxu0  ;;  %v4201_v12 = vadd.f32 %v6421_v48, %v9565_v27  ;;  %6426 = vmatpush3.bf16.msra.mxu0 %v6788_v30 }
 0x8bb   : > { %v4193_v54 = vadd.f32 %v9565_v27, %v4192_v55  ;;  %v6422_v13 = vpop.f32.mrb[86].mxu0 }
 0x8bc   : > { %4318 = vadd.xlane.f32.xlu0 %v4317_v2  ;;  %v4195_v16 = vpop.f32.mrb[87].mxu0  ;;  %v4204_v19 = vadd.f32 %v6422_v13, %v9565_v27  ;;  %v9743_v23 = vadd.f32 %v7038_v46, %v4201_v12 }
 0x8bd   : > { %v9736_v33 = vadd.f32 %v7037_v22, %v4193_v54  ;;  %v4196_v56 = vadd.f32 %v9565_v27, %v4195_v16 }
 0x8be   : > { %4321 = vadd.xlane.f32.xlu1 %v4320_v26  ;;  %11022 = vst [vmem:[#allocation60_spill] sm:$0xff] %v9743_v23  ;;  %v9751_v7 = vadd.f32 %v7040_v58, %v4204_v19  ;;  %v4329_v61 = vsel %vm997_vm0, %v9743_v23, 0.0 }
 0x8bf   : > { %11021 = vst [vmem:[#allocation55_spill] sm:$0xff] %v9736_v33  ;;  %v9746_v39 = vadd.f32 %v7039_v11, %v4196_v56  ;;  %v4323_v50 = vsel %vm997_vm0, %v9736_v33, 0.0 }
 0x8c0   : > { %4324 = vadd.xlane.f32.xlu0 %v4323_v50  ;;  %11024 = vst [vmem:[#allocation59_spill] sm:$0xff] %v9751_v7  ;;  %v4332_v17 = vsel %vm997_vm0, %v9751_v7, 0.0 }
 0x8c1   : > { %11023 = vst [vmem:[#allocation58_spill] sm:$0xff] %v9746_v39  ;;  %v4326_v27 = vsel %vm997_vm0, %v9746_v39, 0.0 }
 0x8c2   : > { %4327 = vadd.xlane.f32.xlu1 %v4326_v27 }
 0x8c4   : > { %4330 = vadd.xlane.f32.xlu0 %v4329_v61 }
 0x8c6   : > { %4333 = vadd.xlane.f32.xlu1 %v4332_v17 }
 0x915   : > { %v4241_v10 = vpop.xlane.xlu0 %4240 }
 0x916   : > { %v4335_v6 = vmul.f32 0.03125, %v4241_v10 }
 0x917   : > { %v4244_v4 = vpop.xlane.xlu1 %4243 }
 0x918   : > { %v9766_v28 = vsub.f32 %v9570_v60, %v4335_v6  ;;  %v4336_v9 = vmul.f32 0.03125, %v4244_v4 }
 0x919   : > { %v4247_v29 = vpop.xlane.xlu0 %4246 }
 0x91a   : > { %v9769_v5 = vsub.f32 %v9578_v42, %v4336_v9  ;;  %v4337_v1 = vmul.f32 0.03125, %v4247_v29  ;;  %v4399_v45 = vmul.f32 %v9766_v28, %v9766_v28 }
 0x91b   : > { %v4250_v40 = vpop.xlane.xlu1 %4249 }
 0x91c   : > { %v9774_v59 = vsub.f32 %v9575_v53, %v4337_v1  ;;  %v4338_v48 = vmul.f32 0.03125, %v4250_v40  ;;  %v4431_v0 = vsel %vm997_vm0, %v4399_v45, 0.0  ;;  %v4400_v55 = vmul.f32 %v9769_v5, %v9769_v5 }
 0x91d   : > { %v4253_v12 = vpop.xlane.xlu0 %4252  ;;  %4432 = vadd.xlane.f32.xlu0 %v4431_v0 }
 0x91e   : > { %v9780_v54 = vsub.f32 %v9583_v44, %v4338_v48  ;;  %v4339_v13 = vmul.f32 0.03125, %v4253_v12  ;;  %v4434_v2 = vsel %vm997_vm0, %v4400_v55, 0.0  ;;  %v4401_v16 = vmul.f32 %v9774_v59, %v9774_v59 }
 0x91f   : > { %v4256_v22 = vpop.xlane.xlu1 %4255  ;;  %4435 = vadd.xlane.f32.xlu1 %v4434_v2 }
 0x920   : > { %v9786_v19 = vsub.f32 %v9592_v62, %v4339_v13  ;;  %v4340_v56 = vmul.f32 0.03125, %v4256_v22  ;;  %v4437_v26 = vsel %vm997_vm0, %v4401_v16, 0.0  ;;  %v4402_v46 = vmul.f32 %v9780_v54, %v9780_v54 }
 0x921   : > { %v4259_v11 = vpop.xlane.xlu0 %4258  ;;  %4438 = vadd.xlane.f32.xlu0 %v4437_v26 }
 0x922   : > { %v9792_v50 = vsub.f32 %v9602_v52, %v4340_v56  ;;  %v4341_v58 = vmul.f32 0.03125, %v4259_v11  ;;  %v4440_v27 = vsel %vm997_vm0, %v4402_v46, 0.0  ;;  %v4403_v61 = vmul.f32 %v9786_v19, %v9786_v19 }
 0x923   : > { %v4262_v17 = vpop.xlane.xlu1 %4261  ;;  %4441 = vadd.xlane.f32.xlu1 %v4440_v27 }
 0x924   : > { %v9798_v49 = vsub.f32 %v9599_v8, %v4341_v58  ;;  %v4342_v30 = vmul.f32 0.03125, %v4262_v17  ;;  %v4443_v10 = vsel %vm997_vm0, %v4403_v61, 0.0  ;;  %v4404_v6 = vmul.f32 %v9792_v50, %v9792_v50 }
 0x925   : > { %v4265_v4 = vpop.xlane.xlu0 %4264  ;;  %4444 = vadd.xlane.f32.xlu0 %v4443_v10 }
 0x926   : > { %v9804_v9 = vsub.f32 %v9607_v57, %v4342_v30  ;;  %v4343_v29 = vmul.f32 0.03125, %v4265_v4  ;;  %v4446_v1 = vsel %vm997_vm0, %v4404_v6, 0.0  ;;  %v4405_v45 = vmul.f32 %v9798_v49, %v9798_v49 }
 0x927   : > { %v4268_v40 = vpop.xlane.xlu1 %4267  ;;  %4447 = vadd.xlane.f32.xlu1 %v4446_v1 }
 0x928   : > { %v9810_v48 = vsub.f32 %v9616_v63, %v4343_v29  ;;  %v4344_v0 = vmul.f32 0.03125, %v4268_v40  ;;  %v4449_v55 = vsel %vm997_vm0, %v4405_v45, 0.0  ;;  %v4406_v12 = vmul.f32 %v9804_v9, %v9804_v9 }
 0x929   : > { %v4271_v13 = vpop.xlane.xlu0 %4270  ;;  %4450 = vadd.xlane.f32.xlu0 %v4449_v55 }
 0x92a   : > { %v9816_v2 = vsub.f32 %v9626_v15, %v4344_v0  ;;  %v4345_v16 = vmul.f32 0.03125, %v4271_v13  ;;  %v4452_v22 = vsel %vm997_vm0, %v4406_v12, 0.0  ;;  %v4407_v56 = vmul.f32 %v9810_v48, %v9810_v48 }
 0x92b   : > { %v4274_v26 = vpop.xlane.xlu1 %4273  ;;  %4453 = vadd.xlane.f32.xlu1 %v4452_v22 }
 0x92c   : > { %v9822_v46 = vsub.f32 %v9623_v18, %v4345_v16  ;;  %v4346_v11 = vmul.f32 0.03125, %v4274_v26  ;;  %v4455_v58 = vsel %vm997_vm0, %v4407_v56, 0.0  ;;  %v4408_v27 = vmul.f32 %v9816_v2, %v9816_v2 }
 0x92d   : > { %v4277_v61 = vpop.xlane.xlu0 %4276  ;;  %4456 = vadd.xlane.f32.xlu0 %v4455_v58 }
 0x92e   : > { %v9828_v17 = vsub.f32 %v9631_v37, %v4346_v11  ;;  %v4347_v30 = vmul.f32 0.03125, %v4277_v61  ;;  %v4458_v10 = vsel %vm997_vm0, %v4408_v27, 0.0  ;;  %v4409_v6 = vmul.f32 %v9822_v46, %v9822_v46 }
 0x92f   : > { %v4280_v4 = vpop.xlane.xlu1 %4279  ;;  %4459 = vadd.xlane.f32.xlu1 %v4458_v10 }
 0x930   : > { %v9834_v29 = vsub.f32 %v9640_v14, %v4347_v30  ;;  %v4348_v1 = vmul.f32 0.03125, %v4280_v4  ;;  %v4461_v45 = vsel %vm997_vm0, %v4409_v6, 0.0  ;;  %v4410_v40 = vmul.f32 %v9828_v17, %v9828_v17 }
 0x931   : > { %v4283_v0 = vpop.xlane.xlu0 %4282  ;;  %4462 = vadd.xlane.f32.xlu0 %v4461_v45 }
 0x932   : > { %v9840_v55 = vsub.f32 %v9650_v21, %v4348_v1  ;;  %v4349_v12 = vmul.f32 0.03125, %v4283_v0  ;;  %v4464_v13 = vsel %vm997_vm0, %v4410_v40, 0.0  ;;  %v4411_v16 = vmul.f32 %v9834_v29, %v9834_v29 }
 0x933   : > { %v4286_v22 = vpop.xlane.xlu1 %4285  ;;  %4465 = vadd.xlane.f32.xlu1 %v4464_v13 }
 0x934   : > { %v9846_v56 = vsub.f32 %v9647_v34, %v4349_v12  ;;  %v4350_v26 = vmul.f32 0.03125, %v4286_v22  ;;  %v4467_v11 = vsel %vm997_vm0, %v4411_v16, 0.0  ;;  %v4412_v58 = vmul.f32 %v9840_v55, %v9840_v55 }
 0x935   : > { %v4289_v27 = vpop.xlane.xlu0 %4288  ;;  %4468 = vadd.xlane.f32.xlu0 %v4467_v11 }
 0x936   : > { %v9852_v61 = vsub.f32 %v9655_v47, %v4350_v26  ;;  %v4351_v30 = vmul.f32 0.03125, %v4289_v27  ;;  %v4470_v10 = vsel %vm997_vm0, %v4412_v58, 0.0  ;;  %v4413_v6 = vmul.f32 %v9846_v56, %v9846_v56 }
 0x937   : > { %v4292_v4 = vpop.xlane.xlu1 %4291  ;;  %4471 = vadd.xlane.f32.xlu1 %v4470_v10 }
 0x938   : > { %v9858_v1 = vsub.f32 %v9664_v20, %v4351_v30  ;;  %v4352_v45 = vmul.f32 0.03125, %v4292_v4  ;;  %v4473_v40 = vsel %vm997_vm0, %v4413_v6, 0.0  ;;  %v4414_v0 = vmul.f32 %v9852_v61, %v9852_v61 }
 0x939   : > { %v4295_v12 = vpop.xlane.xlu0 %4294  ;;  %4474 = vadd.xlane.f32.xlu0 %v4473_v40 }
 0x93a   : > { %v9864_v13 = vsub.f32 %v9674_v43, %v4352_v45  ;;  %v4353_v16 = vmul.f32 0.03125, %v4295_v12  ;;  %v4476_v22 = vsel %vm997_vm0, %v4414_v0, 0.0  ;;  %v4415_v26 = vmul.f32 %v9858_v1, %v9858_v1 }
 0x93b   : > { %v4298_v11 = vpop.xlane.xlu1 %4297  ;;  %4477 = vadd.xlane.f32.xlu1 %v4476_v22 }
 0x93c   : > { %v9870_v58 = vsub.f32 %v9671_v3, %v4353_v16  ;;  %v4354_v27 = vmul.f32 0.03125, %v4298_v11  ;;  %v4479_v30 = vsel %vm997_vm0, %v4415_v26, 0.0  ;;  %v4416_v10 = vmul.f32 %v9864_v13, %v9864_v13 }
 0x93d   : > { %v4301_v6 = vpop.xlane.xlu0 %4300  ;;  %4480 = vadd.xlane.f32.xlu0 %v4479_v30 }
 0x93e   : > { %v9876_v4 = vsub.f32 %v9679_v41, %v4354_v27  ;;  %v4355_v45 = vmul.f32 0.03125, %v4301_v6  ;;  %v4482_v40 = vsel %vm997_vm0, %v4416_v10, 0.0  ;;  %v4417_v0 = vmul.f32 %v9870_v58, %v9870_v58 }
 0x93f   : > { %v4304_v12 = vpop.xlane.xlu1 %4303  ;;  %4483 = vadd.xlane.f32.xlu1 %v4482_v40 }
 0x940   : > { %v9882_v16 = vsub.f32 %v9688_v24, %v4355_v45  ;;  %v4356_v22 = vmul.f32 0.03125, %v4304_v12  ;;  %v4485_v26 = vsel %vm997_vm0, %v4417_v0, 0.0  ;;  %v4418_v11 = vmul.f32 %v9876_v4, %v9876_v4 }
 0x941   : > { %v4307_v30 = vpop.xlane.xlu0 %4306  ;;  %4486 = vadd.xlane.f32.xlu0 %v4485_v26 }
 0x942   : > { %v9888_v27 = vsub.f32 %v9698_v32, %v4356_v22  ;;  %v4357_v10 = vmul.f32 0.03125, %v4307_v30  ;;  %v4488_v6 = vsel %vm997_vm0, %v4418_v11, 0.0  ;;  %v4419_v40 = vmul.f32 %v9882_v16, %v9882_v16 }
 0x943   : > { %v4310_v43 = vpop.xlane.xlu1 %4309  ;;  %4489 = vadd.xlane.f32.xlu1 %v4488_v6 }
 0x944   : > { %v9894_v45 = vsub.f32 %v9695_v36, %v4357_v10  ;;  %v4358_v0 = vmul.f32 0.03125, %v4310_v43  ;;  %v4491_v12 = vsel %vm997_vm0, %v4419_v40, 0.0  ;;  %v4420_v26 = vmul.f32 %v9888_v27, %v9888_v27 }
 0x945   : > { %v4313_v24 = vpop.xlane.xlu0 %4312  ;;  %4492 = vadd.xlane.f32.xlu0 %v4491_v12 }
 0x946   : > { %v9900_v22 = vsub.f32 %v9703_v35, %v4358_v0  ;;  %v4359_v11 = vmul.f32 0.03125, %v4313_v24  ;;  %v4494_v30 = vsel %vm997_vm0, %v4420_v26, 0.0  ;;  %v4421_v6 = vmul.f32 %v9894_v45, %v9894_v45 }
 0x947   : > { %v4316_v32 = vpop.xlane.xlu1 %4315  ;;  %4495 = vadd.xlane.f32.xlu1 %v4494_v30 }
 0x948   : > { %v9906_v43 = vsub.f32 %v9712_v31, %v4359_v11  ;;  %v4360_v10 = vmul.f32 0.03125, %v4316_v32  ;;  %v4497_v40 = vsel %vm997_vm0, %v4421_v6, 0.0  ;;  %v4422_v12 = vmul.f32 %v9900_v22, %v9900_v22 }
 0x949   : > { %v4319_v36 = vpop.xlane.xlu0 %4318  ;;  %4498 = vadd.xlane.f32.xlu0 %v4497_v40 }
 0x94a   : > { %v9912_v24 = vsub.f32 %v9722_v51, %v4360_v10  ;;  %v4361_v0 = vmul.f32 0.03125, %v4319_v36  ;;  %v4500_v26 = vsel %vm997_vm0, %v4422_v12, 0.0  ;;  %v4423_v30 = vmul.f32 %v9906_v43, %v9906_v43 }
 0x94b   : > { %v4322_v35 = vpop.xlane.xlu1 %4321  ;;  %4501 = vadd.xlane.f32.xlu1 %v4500_v26 }
 0x94c   : > { %v9918_v32 = vsub.f32 %v9719_v25, %v4361_v0  ;;  %v4362_v11 = vmul.f32 0.03125, %v4322_v35  ;;  %v4503_v6 = vsel %vm997_vm0, %v4423_v30, 0.0  ;;  %v4424_v40 = vmul.f32 %v9912_v24, %v9912_v24 }
 0x94d   : > { %4504 = vadd.xlane.f32.xlu0 %v4503_v6  ;;  %v4325_v10 = vpop.xlane.xlu0 %4324 }
 0x94e   : > { %v9924_v36 = vsub.f32 %v9727_v38, %v4362_v11  ;;  %v4363_v12 = vmul.f32 0.03125, %v4325_v10  ;;  %v4506_v51 = vsel %vm997_vm0, %v4424_v40, 0.0  ;;  %v4425_v26 = vmul.f32 %v9918_v32, %v9918_v32 }
 0x94f   : > { %4507 = vadd.xlane.f32.xlu1 %v4506_v51  ;;  %v4328_v0 = vpop.xlane.xlu1 %4327 }
 0x950   : > { %v9930_v35 = vsub.f32 %v9736_v33, %v4363_v12  ;;  %v4364_v30 = vmul.f32 0.03125, %v4328_v0  ;;  %v4509_v31 = vsel %vm997_vm0, %v4425_v26, 0.0  ;;  %v4426_v6 = vmul.f32 %v9924_v36, %v9924_v36 }
 0x951   : > { %4510 = vadd.xlane.f32.xlu0 %v4509_v31  ;;  %v4331_v11 = vpop.xlane.xlu0 %4330 }
 0x952   : > { %v9936_v10 = vsub.f32 %v9746_v39, %v4364_v30  ;;  %v4365_v40 = vmul.f32 0.03125, %v4331_v11  ;;  %v4512_v38 = vsel %vm997_vm0, %v4426_v6, 0.0  ;;  %v4427_v51 = vmul.f32 %v9930_v35, %v9930_v35 }
 0x953   : > { %4513 = vadd.xlane.f32.xlu1 %v4512_v38  ;;  %v4334_v12 = vpop.xlane.xlu1 %4333 }
 0x954   : > { %v9942_v0 = vsub.f32 %v9743_v23, %v4365_v40  ;;  %v4366_v26 = vmul.f32 0.03125, %v4334_v12  ;;  %v4515_v33 = vsel %vm997_vm0, %v4427_v51, 0.0  ;;  %v4428_v31 = vmul.f32 %v9936_v10, %v9936_v10 }
 0x955   : > { %4516 = vadd.xlane.f32.xlu0 %v4515_v33  ;;  %v9960_v33 = vld [vmem:[%s11026_s15] sm:$0xff]  }
 0x956   : > { %v9948_v30 = vsub.f32 %v9751_v7, %v4366_v26  ;;  %v4518_v6 = vsel %vm997_vm0, %v4428_v31, 0.0  ;;  %v4429_v11 = vmul.f32 %v9942_v0, %v9942_v0  ;;  %6459 = vmatprep.subr.bf16.mxu0 %v9960_v33 }
 0x957   : > { %4519 = vadd.xlane.f32.xlu1 %v4518_v6 }
 0x958   : > { %v4521_v38 = vsel %vm997_vm0, %v4429_v11, 0.0  ;;  %v4430_v40 = vmul.f32 %v9948_v30, %v9948_v30 }
 0x959   : > { %4522 = vadd.xlane.f32.xlu0 %v4521_v38 }
 0x95a   : > { %v4524_v51 = vsel %vm997_vm0, %v4430_v40, 0.0 }
 0x95b   : > { %4525 = vadd.xlane.f32.xlu1 %v4524_v51 }
 0x9aa   : > { %v4433_v12 = vpop.xlane.xlu0 %4432 }
 0x9ab   : > { %v4527_v26 = vmul.f32 0.03125, %v4433_v12 }
 0x9ac   : > { %v4436_v31 = vpop.xlane.xlu1 %4435 }
 0x9ad   : > { %v4559_v6 = vadd.f32 1e-05, %v4527_v26  ;;  %v4528_v39 = vmul.f32 0.03125, %v4436_v31 }
 0x9ae   : > { %v4439_v11 = vpop.xlane.xlu0 %4438 }
 0x9af   : > { %6871 = vrsqrt.f32 %v4559_v6  ;;  %v4560_v7 = vadd.f32 1e-05, %v4528_v39  ;;  %v4529_v23 = vmul.f32 0.03125, %v4439_v11  ;;  %v9966_v39 = vld [vmem:[%s11027_s16] ss:$0 sm:$0xff]  ;;  %s5595_s16 = sshll.u32 %s10447_s3, 4  ;;  %s10571_s16 = int_to_ptr.vmem [resolvable:$true] %s5595_s16 }
 0x9b0   : > { %v4442_v38 = vpop.xlane.xlu1 %4441 }
 0x9b1   : > { %6873 = vrsqrt.f32 %v4560_v7  ;;  %v4561_v40 = vadd.f32 1e-05, %v4529_v23  ;;  %v4530_v51 = vmul.f32 0.03125, %v4442_v38 }
 0x9b2   : > { %v4445_v25 = vpop.xlane.xlu0 %4444 }
 0x9b3   : > { %6875 = vrsqrt.f32 %v4561_v40  ;;  %v4562_v41 = vadd.f32 1e-05, %v4530_v51  ;;  %v4531_v20 = vmul.f32 0.03125, %v4445_v25  ;;  %v9974_v51 = vld [vmem:[%s11028_s17] ss:$0 sm:$0xff]  ;;  %s11053_s17 = sld [smem:[#allocation119_spill]] }
 0x9b4   : > { %v4448_v3 = vpop.xlane.xlu1 %4447 }
 0x9b5   : > { %6877 = vrsqrt.f32 %v4562_v41  ;;  %v4563_v21 = vadd.f32 1e-05, %v4531_v20  ;;  %v4532_v47 = vmul.f32 0.03125, %v4448_v3 }
 0x9b6   : > { %v4451_v12 = vpop.xlane.xlu0 %4450 }
 0x9b7   : > { %6879 = vrsqrt.f32 %v4563_v21  ;;  %v4564_v26 = vadd.f32 1e-05, %v4532_v47  ;;  %v4533_v31 = vmul.f32 0.03125, %v4451_v12 }
 0x9b8   : > { %v4454_v14 = vpop.xlane.xlu1 %4453 }
 0x9b9   : > { %v6872_v6 = vpop.eup %6871  ;;  %6881 = vrsqrt.f32 %v4564_v26  ;;  %v4565_v23 = vadd.f32 1e-05, %v4533_v31  ;;  %v4534_v7 = vmul.f32 0.03125, %v4454_v14  ;;  %s10569_s24 = scalar_lea.hbm %s11053_s17, %s5944_s6  ;;  %s7299_s6 = sshll.u32 %s7393_s1, 4  ;;  %s7300_s6 = int_to_ptr.vmem [resolvable:$false] %s7299_s6 }
 0x9ba   : > { %v4623_v25 = vmul.f32 %v6872_v6, %v9766_v28  ;;  %v4457_v11 = vpop.xlane.xlu0 %4456  ;;  %s7301_s21 = scalar_lea.vmem %s7300_s6, 8192  ;;  %p7302_p2 = scmp.lt.s32.totalorder %s10571_s16, %s7300_s6 }
 0x9bb   : > { %v6874_v41 = vpop.eup %6873  ;;  %6883 = vrsqrt.f32 %v4565_v23  ;;  %v4566_v20 = vadd.f32 1e-05, %v4534_v7  ;;  %v4535_v3 = vmul.f32 0.03125, %v4457_v11 }
 0x9bc   : > { %v4624_v21 = vmul.f32 %v6874_v41, %v9769_v5  ;;  %v4460_v47 = vpop.xlane.xlu1 %4459  ;;  %v4662_v38 = vmul.f32 %v9966_v39, %v4623_v25 }
 0x9bd   : > { %v6876_v40 = vpop.eup %6875  ;;  %6885 = vrsqrt.f32 %v4566_v20  ;;  %v4567_v14 = vadd.f32 1e-05, %v4535_v3  ;;  %v4536_v12 = vmul.f32 0.03125, %v4460_v47 }
 0x9be   : > { %v4625_v28 = vmul.f32 %v6876_v40, %v9774_v59  ;;  %v4463_v26 = vpop.xlane.xlu0 %4462  ;;  %v4663_v31 = vmul.f32 %v9966_v39, %v4624_v21  ;;  %v4701_v41 = vadd.f32 %v9974_v51, %v4662_v38 }
 0x9bf   : > { %v6878_v6 = vpop.eup %6877  ;;  %6887 = vrsqrt.f32 %v4567_v14  ;;  %v4568_v5 = vadd.f32 1e-05, %v4536_v12  ;;  %v4537_v23 = vmul.f32 0.03125, %v4463_v26 }
 0x9c0   : > { %v4664_v7 = vmul.f32 %v9966_v39, %v4625_v28  ;;  %v4626_v25 = vmul.f32 %v6878_v6, %v9780_v54  ;;  %v4466_v11 = vpop.xlane.xlu1 %4465  ;;  %v4702_v20 = vadd.f32 %v9974_v51, %v4663_v31 }
 0x9c1   : > { %v6880_v3 = vpop.eup %6879  ;;  %6889 = vrsqrt.f32 %v4568_v5  ;;  %v4569_v47 = vadd.f32 1e-05, %v4537_v23  ;;  %v4538_v59 = vmul.f32 0.03125, %v4466_v11 }
 0x9c2   : > { %v4665_v40 = vmul.f32 %v9966_v39, %v4626_v25  ;;  %v4627_v21 = vmul.f32 %v6880_v3, %v9786_v19  ;;  %v4469_v14 = vpop.xlane.xlu0 %4468  ;;  %v4733_v12 = vpack.c.bf16 %v4702_v20, %v4701_v41  ;;  %v4703_v54 = vadd.f32 %v9974_v51, %v4664_v7  ;;  %v6790_v7 = vld [vmem:[%s11026_s15 + $0x8] sm:$0xff]  }
 0x9c3   : > { %v6882_v26 = vpop.eup %6881  ;;  %6891 = vrsqrt.f32 %v4569_v47  ;;  %v4570_v28 = vadd.f32 1e-05, %v4538_v59  ;;  %v4539_v34 = vmul.f32 0.03125, %v4469_v14 }
 0x9c4   : > { %v4704_v38 = vadd.f32 %v9974_v51, %v4665_v40  ;;  %v4628_v31 = vmul.f32 %v6882_v26, %v9792_v50  ;;  %v4472_v6 = vpop.xlane.xlu1 %4471  ;;  %6427 = vmatprep.mubr.msk.bf16.mxu0 %vm997_vm0, %v4733_v12  ;;  %v4666_v5 = vmul.f32 %v9966_v39, %v4627_v21 }
 0x9c5   : > { %v6884_v23 = vpop.eup %6883  ;;  %6893 = vrsqrt.f32 %v4570_v28  ;;  %v4571_v19 = vadd.f32 1e-05, %v4539_v34  ;;  %v4540_v25 = vmul.f32 0.03125, %v4472_v6  ;;  %v6791_v6 = vld [vmem:[%s11026_s15 + $0x10] sm:$0xff]  }
 0x9c6   : > { %v4629_v11 = vmul.f32 %v6884_v23, %v9798_v49  ;;  %v4475_v41 = vpop.xlane.xlu0 %4474  ;;  %v4734_v20 = vpack.c.bf16 %v4704_v38, %v4703_v54  ;;  %v4667_v3 = vmul.f32 %v9966_v39, %v4628_v31  ;;  %v4705_v34 = vadd.f32 %v9974_v51, %v4666_v5 }
 0x9c7   : > { %v6886_v50 = vpop.eup %6885  ;;  %6895 = vrsqrt.f32 %v4571_v19  ;;  %v4572_v47 = vadd.f32 1e-05, %v4540_v25  ;;  %v4541_v59 = vmul.f32 0.03125, %v4475_v41 }
 0x9c8   : > { %v4630_v40 = vmul.f32 %v6886_v50, %v9804_v9  ;;  %v4478_v21 = vpop.xlane.xlu1 %4477  ;;  %6428 = vmatmul.mubr.msk.bf16.vlgmr.msra.gmra.mrb[88].mxu0 %vm997_vm0, %v4734_v20  ;;  %v4706_v49 = vadd.f32 %v9974_v51, %v4667_v3  ;;  %v4668_v14 = vmul.f32 %v9966_v39, %v4629_v11 }
 0x9c9   : > { %v6888_v12 = vpop.eup %6887  ;;  %6897 = vrsqrt.f32 %v4572_v47  ;;  %v4573_v26 = vadd.f32 1e-05, %v4541_v59  ;;  %v4542_v28 = vmul.f32 0.03125, %v4478_v21  ;;  %6460 = vmatpush3.bf16.msra.mxu0 %v9960_v33  ;;  %v6792_v21 = vld [vmem:[%s11026_s15 + $0x18] sm:$0xff]  }
 0x9ca   : > { %v4631_v54 = vmul.f32 %v6888_v12, %v9810_v48  ;;  %v4481_v38 = vpop.xlane.xlu0 %4480  ;;  %v4735_v31 = vpack.c.bf16 %v4706_v49, %v4705_v34  ;;  %v4669_v9 = vmul.f32 %v9966_v39, %v4630_v40  ;;  %6461 = vmatprep.subr.bf16.mxu0 %v6790_v7  ;;  %v4707_v48 = vadd.f32 %v9974_v51, %v4668_v14 }
 0x9cb   : > { %v6890_v5 = vpop.eup %6889  ;;  %6899 = vrsqrt.f32 %v4573_v26  ;;  %v4574_v23 = vadd.f32 1e-05, %v4542_v28  ;;  %v4543_v19 = vmul.f32 0.03125, %v4481_v38 }
 0x9cc   : > { %v4632_v25 = vmul.f32 %v6890_v5, %v9816_v2  ;;  %v4484_v11 = vpop.xlane.xlu1 %4483  ;;  %6431 = vmatprep.mubr.msk.bf16.mxu0 %vm997_vm0, %v4735_v31  ;;  %v4708_v33 = vadd.f32 %v9974_v51, %v4669_v9  ;;  %v4670_v41 = vmul.f32 %v9966_v39, %v4631_v54 }
 0x9cd   : > { %v6892_v20 = vpop.eup %6891  ;;  %6901 = vrsqrt.f32 %v4574_v23  ;;  %v4575_v3 = vadd.f32 1e-05, %v4543_v19  ;;  %v4544_v50 = vmul.f32 0.03125, %v4484_v11  ;;  %6462 = vmatpush3.bf16.msra.mxu0 %v6790_v7 }
 0x9ce   : > { %v4633_v47 = vmul.f32 %v6892_v20, %v9822_v46  ;;  %v4487_v59 = vpop.xlane.xlu0 %4486  ;;  %v4736_v40 = vpack.c.bf16 %v4708_v33, %v4707_v48  ;;  %v4671_v2 = vmul.f32 %v9966_v39, %v4632_v25  ;;  %6463 = vmatprep.subr.bf16.mxu0 %v6791_v6  ;;  %v4709_v46 = vadd.f32 %v9974_v51, %v4670_v41 }
 0x9cf   : > { %v6894_v34 = vpop.eup %6893  ;;  %6903 = vrsqrt.f32 %v4575_v3  ;;  %v4576_v49 = vadd.f32 1e-05, %v4544_v50  ;;  %v4545_v14 = vmul.f32 0.03125, %v4487_v59 }
 0x9d0   : > { %v4634_v12 = vmul.f32 %v6894_v34, %v9828_v17  ;;  %v4490_v26 = vpop.xlane.xlu1 %4489  ;;  %6432 = vmatmul.mubr.msk.bf16.gmra.mrb[92].mxu0 %vm997_vm0, %v4736_v40  ;;  %v4710_v7 = vadd.f32 %v9974_v51, %v4671_v2  ;;  %v4672_v28 = vmul.f32 %v9966_v39, %v4633_v47 }
 0x9d1   : > { %v6896_v54 = vpop.eup %6895  ;;  %6905 = vrsqrt.f32 %v4576_v49  ;;  %v4577_v38 = vadd.f32 1e-05, %v4545_v14  ;;  %v4546_v31 = vmul.f32 0.03125, %v4490_v26  ;;  %6464 = vmatpush3.bf16.msra.mxu0 %v6791_v6 }
 0x9d2   : > { %v4635_v9 = vmul.f32 %v6896_v54, %v9834_v29  ;;  %v4493_v5 = vpop.xlane.xlu0 %4492  ;;  %v4737_v23 = vpack.c.bf16 %v4710_v7, %v4709_v46  ;;  %v4673_v17 = vmul.f32 %v9966_v39, %v4634_v12  ;;  %6465 = vmatprep.subr.bf16.mxu0 %v6792_v21  ;;  %v4711_v41 = vadd.f32 %v9974_v51, %v4672_v28 }
 0x9d3   : > { %v6898_v19 = vpop.eup %6897  ;;  %6907 = vrsqrt.f32 %v4577_v38  ;;  %v4578_v25 = vadd.f32 1e-05, %v4546_v31  ;;  %v4547_v11 = vmul.f32 0.03125, %v4493_v5 }
 0x9d4   : > { %v4636_v48 = vmul.f32 %v6898_v19, %v9840_v55  ;;  %v4496_v33 = vpop.xlane.xlu1 %4495  ;;  %6435 = vmatprep.mubr.msk.bf16.mxu0 %vm997_vm0, %v4737_v23  ;;  %v4712_v6 = vadd.f32 %v9974_v51, %v4673_v17  ;;  %v4674_v29 = vmul.f32 %v9966_v39, %v4635_v9 }
 0x9d5   : > { %v6900_v20 = vpop.eup %6899  ;;  %6909 = vrsqrt.f32 %v4578_v25  ;;  %v4579_v3 = vadd.f32 1e-05, %v4547_v11  ;;  %v4548_v50 = vmul.f32 0.03125, %v4496_v33  ;;  %6466 = vmatpush3.bf16.msra.mxu0 %v6792_v21 }
 0x9d6   : > { %v4637_v47 = vmul.f32 %v6900_v20, %v9846_v56  ;;  %v4499_v59 = vpop.xlane.xlu0 %4498  ;;  %v4738_v40 = vpack.c.bf16 %v4712_v6, %v4711_v41  ;;  %v4675_v55 = vmul.f32 %v9966_v39, %v4636_v48  ;;  %v4713_v26 = vadd.f32 %v9974_v51, %v4674_v29 }
 0x9d7   : > { %v6902_v2 = vpop.eup %6901  ;;  %6911 = vrsqrt.f32 %v4579_v3  ;;  %v4580_v34 = vadd.f32 1e-05, %v4548_v50  ;;  %v4549_v49 = vmul.f32 0.03125, %v4499_v59 }
 0x9d8   : > { %v4638_v14 = vmul.f32 %v6902_v2, %v9852_v61  ;;  %v4502_v12 = vpop.xlane.xlu1 %4501  ;;  %6436 = vmatmul.mubr.msk.bf16.gmra.mrb[96].mxu0 %vm997_vm0, %v4738_v40  ;;  %v4714_v46 = vadd.f32 %v9974_v51, %v4675_v55  ;;  %v4676_v21 = vmul.f32 %v9966_v39, %v4637_v47 }
 0x9d9   : > { %v6904_v56 = vpop.eup %6903  ;;  %6913 = vrsqrt.f32 %v4580_v34  ;;  %v4581_v7 = vadd.f32 1e-05, %v4549_v49  ;;  %v4550_v28 = vmul.f32 0.03125, %v4502_v12 }
 0x9da   : > { %v4639_v54 = vmul.f32 %v6904_v56, %v9858_v1  ;;  %v4505_v38 = vpop.xlane.xlu0 %4504  ;;  %v4739_v31 = vpack.c.bf16 %v4714_v46, %v4713_v26  ;;  %v4677_v9 = vmul.f32 %v9966_v39, %v4638_v14  ;;  %v4715_v25 = vadd.f32 %v9974_v51, %v4676_v21 }
 0x9db   : > { %v6906_v61 = vpop.eup %6905  ;;  %6915 = vrsqrt.f32 %v4581_v7  ;;  %v4582_v5 = vadd.f32 1e-05, %v4550_v28  ;;  %v4551_v23 = vmul.f32 0.03125, %v4505_v38 }
 0x9dc   : > { %v4640_v17 = vmul.f32 %v6906_v61, %v9864_v13  ;;  %v4508_v19 = vpop.xlane.xlu1 %4507  ;;  %6439 = vmatprep.mubr.msk.bf16.mxu0 %vm997_vm0, %v4739_v31  ;;  %v4716_v11 = vadd.f32 %v9974_v51, %v4677_v9  ;;  %v4678_v48 = vmul.f32 %v9966_v39, %v4639_v54 }
 0x9dd   : > { %v6908_v1 = vpop.eup %6907  ;;  %6917 = vrsqrt.f32 %v4582_v5  ;;  %v4583_v33 = vadd.f32 1e-05, %v4551_v23  ;;  %v4552_v41 = vmul.f32 0.03125, %v4508_v19 }
 0x9de   : > { %v4641_v6 = vmul.f32 %v6908_v1, %v9870_v58  ;;  %v4511_v29 = vpop.xlane.xlu0 %4510  ;;  %v4740_v20 = vpack.c.bf16 %v4716_v11, %v4715_v25  ;;  %v4679_v3 = vmul.f32 %v9966_v39, %v4640_v17  ;;  %v4717_v55 = vadd.f32 %v9974_v51, %v4678_v48 }
 0x9df   : > { %v6910_v13 = vpop.eup %6909  ;;  %6919 = vrsqrt.f32 %v4583_v33  ;;  %v4584_v50 = vadd.f32 1e-05, %v4552_v41  ;;  %v4553_v47 = vmul.f32 0.03125, %v4511_v29 }
 0x9e0   : > { %v4642_v59 = vmul.f32 %v6910_v13, %v9876_v4  ;;  %v4514_v40 = vpop.xlane.xlu1 %4513  ;;  %6440 = vmatmul.mubr.msk.bf16.gmra.mrb[100].mxu0 %vm997_vm0, %v4740_v20  ;;  %v4718_v2 = vadd.f32 %v9974_v51, %v4679_v3  ;;  %v4680_v34 = vmul.f32 %v9966_v39, %v4641_v6 }
 0x9e1   : > { %v6912_v58 = vpop.eup %6911  ;;  %6921 = vrsqrt.f32 %v4584_v50  ;;  %v4585_v49 = vadd.f32 1e-05, %v4553_v47  ;;  %v4554_v14 = vmul.f32 0.03125, %v4514_v40 }
 0x9e2   : > { %v4643_v12 = vmul.f32 %v6912_v58, %v9882_v16  ;;  %v4517_v26 = vpop.xlane.xlu0 %4516  ;;  %v4741_v46 = vpack.c.bf16 %v4718_v2, %v4717_v55  ;;  %v4681_v21 = vmul.f32 %v9966_v39, %v4642_v59  ;;  %v4719_v38 = vadd.f32 %v9974_v51, %v4680_v34 }
 0x9e3   : > { %v6914_v4 = vpop.eup %6913  ;;  %6923 = vrsqrt.f32 %v4585_v49  ;;  %v4586_v56 = vadd.f32 1e-05, %v4554_v14  ;;  %v4555_v7 = vmul.f32 0.03125, %v4517_v26 }
 0x9e4   : > { %v4644_v28 = vmul.f32 %v6914_v4, %v9888_v27  ;;  %v4520_v54 = vpop.xlane.xlu1 %4519  ;;  %6443 = vmatprep.mubr.msk.bf16.mxu0 %vm997_vm0, %v4741_v46  ;;  %v4720_v31 = vadd.f32 %v9974_v51, %v4681_v21  ;;  %v4682_v9 = vmul.f32 %v9966_v39, %v4643_v12 }
 0x9e5   : > { %v6916_v16 = vpop.eup %6915  ;;  %6925 = vrsqrt.f32 %v4586_v56  ;;  %v4587_v61 = vadd.f32 1e-05, %v4555_v7  ;;  %v4556_v5 = vmul.f32 0.03125, %v4520_v54 }
 0x9e6   : > { %v4645_v23 = vmul.f32 %v6916_v16, %v9894_v45  ;;  %v4523_v17 = vpop.xlane.xlu0 %4522  ;;  %v4742_v19 = vpack.c.bf16 %v4720_v31, %v4719_v38  ;;  %v4683_v25 = vmul.f32 %v9966_v39, %v4644_v28  ;;  %v4721_v41 = vadd.f32 %v9974_v51, %v4682_v9 }
 0x9e7   : > { %v6918_v27 = vpop.eup %6917  ;;  %6927 = vrsqrt.f32 %v4587_v61  ;;  %v4588_v11 = vadd.f32 1e-05, %v4556_v5  ;;  %v4557_v48 = vmul.f32 0.03125, %v4523_v17 }
 0x9e8   : > { %v4646_v1 = vmul.f32 %v6918_v27, %v9900_v22  ;;  %v4526_v33 = vpop.xlane.xlu1 %4525  ;;  %6444 = vmatmul.mubr.msk.bf16.gmra.mrb[104].mxu0 %vm997_vm0, %v4742_v19  ;;  %v4722_v6 = vadd.f32 %v9974_v51, %v4683_v25  ;;  %v4684_v29 = vmul.f32 %v9966_v39, %v4645_v23 }
 0x9e9   : > { %v6920_v45 = vpop.eup %6919  ;;  %6929 = vrsqrt.f32 %v4588_v11  ;;  %v4589_v20 = vadd.f32 1e-05, %v4557_v48  ;;  %v4558_v3 = vmul.f32 0.03125, %v4526_v33  ;;  %v10110_v33 = vld [vmem:[%s11029_s4] ss:$0 sm:$0xff] }
 0x9ea   : > { %v4647_v13 = vmul.f32 %v6920_v45, %v9906_v43  ;;  %v4743_v50 = vpack.c.bf16 %v4722_v6, %v4721_v41  ;;  %v4685_v47 = vmul.f32 %v9966_v39, %v4646_v1  ;;  %v4723_v55 = vadd.f32 %v9974_v51, %v4684_v29  ;;  %v6794_v1 = vld [vmem:[%s11026_s15 + $0x28] sm:$0xff]  }
 0x9eb   : > { %v6922_v59 = vpop.eup %6921  ;;  %6931 = vrsqrt.f32 %v4589_v20  ;;  %v4590_v22 = vadd.f32 1e-05, %v4558_v3 }
 0x9ec   : > { %v4648_v40 = vmul.f32 %v6922_v59, %v9912_v24  ;;  %6447 = vmatprep.mubr.msk.bf16.mxu0 %vm997_vm0, %v4743_v50  ;;  %v4724_v2 = vadd.f32 %v9974_v51, %v4685_v47  ;;  %v4686_v34 = vmul.f32 %v9966_v39, %v4647_v13 }
 0x9ed   : > { %v6924_v58 = vpop.eup %6923  ;;  %6933 = vrsqrt.f32 %v4590_v22 }
 0x9ee   : > { %v4649_v43 = vmul.f32 %v6924_v58, %v9918_v32  ;;  %v4744_v49 = vpack.c.bf16 %v4724_v2, %v4723_v55  ;;  %v4687_v14 = vmul.f32 %v9966_v39, %v4648_v40  ;;  %v4725_v24 = vadd.f32 %v9974_v51, %v4686_v34 }
 0x9ef   : > { %v6926_v12 = vpop.eup %6925 }
 0x9f0   : > { %v4650_v26 = vmul.f32 %v6926_v12, %v9924_v36  ;;  %6448 = vmatmul.mubr.msk.bf16.gmra.mrb[108].mxu0 %vm997_vm0, %v4744_v49  ;;  %v4726_v46 = vadd.f32 %v9974_v51, %v4687_v14  ;;  %v4688_v21 = vmul.f32 %v9966_v39, %v4649_v43 }
 0x9f1   : > { %v6928_v4 = vpop.eup %6927 }
 0x9f2   : > { %v4651_v56 = vmul.f32 %v6928_v4, %v9930_v35  ;;  %v4745_v7 = vpack.c.bf16 %v4726_v46, %v4725_v24  ;;  %v4689_v32 = vmul.f32 %v9966_v39, %v4650_v26  ;;  %v4727_v36 = vadd.f32 %v9974_v51, %v4688_v21 }
 0x9f3   : > { %v6930_v28 = vpop.eup %6929 }
 0x9f4   : > { %v4652_v54 = vmul.f32 %v6930_v28, %v9936_v10  ;;  %6451 = vmatprep.mubr.msk.bf16.mxu0 %vm997_vm0, %v4745_v7  ;;  %v4728_v38 = vadd.f32 %v9974_v51, %v4689_v32  ;;  %v4690_v31 = vmul.f32 %v9966_v39, %v4651_v56 }
 0x9f5   : > { %v6932_v9 = vpop.eup %6931 }
 0x9f6   : > { %v4653_v16 = vmul.f32 %v6932_v9, %v9942_v0  ;;  %v4746_v61 = vpack.c.bf16 %v4728_v38, %v4727_v36  ;;  %v4691_v35 = vmul.f32 %v9966_v39, %v4652_v54  ;;  %v4729_v10 = vadd.f32 %v9974_v51, %v4690_v31 }
 0x9f7   : > { %v6934_v5 = vpop.eup %6933 }
 0x9f8   : > { %v4654_v23 = vmul.f32 %v6934_v5, %v9948_v30  ;;  %6452 = vmatmul.mubr.msk.bf16.gmra.mrb[112].mxu0 %vm997_vm0, %v4746_v61  ;;  %v4730_v17 = vadd.f32 %v9974_v51, %v4691_v35  ;;  %v4692_v19 = vmul.f32 %v9966_v39, %v4653_v16  ;;  %v6793_v30 = vld [vmem:[%s11026_s15 + $0x20] sm:$0xff]  }
 0x9f9   : > { %6467 = vmatprep.subr.bf16.mxu0 %v6793_v30 }
 0x9fa   : > { %v4747_v25 = vpack.c.bf16 %v4730_v17, %v4729_v10  ;;  %v4693_v27 = vmul.f32 %v9966_v39, %v4654_v23  ;;  %v4731_v0 = vadd.f32 %v9974_v51, %v4692_v19  ;;  %6468 = vmatpush3.bf16.msra.mxu0 %v6793_v30  ;;  %v6795_v39 = vld [vmem:[%s11026_s15 + $0x30] sm:$0xff]  }
 0x9fb   : > { %6469 = vmatprep.subr.bf16.mxu0 %v6794_v1 }
 0x9fc   : > { %6455 = vmatprep.mubr.msk.bf16.mxu0 %vm997_vm0, %v4747_v25  ;;  %v4732_v11 = vadd.f32 %v9974_v51, %v4693_v27  ;;  %v6796_v51 = vld [vmem:[%s11026_s15 + $0x38] sm:$0xff]  }
 0x9fe   : > { %v4748_v48 = vpack.c.bf16 %v4732_v11, %v4731_v0  ;;  %6470 = vmatpush3.bf16.msra.mxu0 %v6794_v1 }
 0x9ff   : > { %6471 = vmatprep.subr.bf16.mxu0 %v6795_v39 }
 0xa00   : > { %6456 = vmatmul.mubr.msk.bf16.gmra.mrb[116].mxu0 %vm997_vm0, %v4748_v48 }
 0xa02   : > { %6472 = vmatpush3.bf16.msra.mxu0 %v6795_v39 }
 0xa03   : > { %6473 = vmatprep.subr.bf16.mxu0 %v6796_v51 }
 0xa06   : > { %6474 = vmatpush3.bf16.msra.mxu0 %v6796_v51 }
 0xa9b   : > { %v6429_v41 = vpop.f32.mrb[88].mxu0 }
 0xa9c   : > { %v10113_v6 = vadd.f32 %v6429_v41, %v10110_v33  ;;  %v4854_v29 = vpop.f32.mrb[89].mxu0 }
 0xa9d   : > { %v10116_v45 = vadd.f32 %v10110_v33, %v4854_v29  ;;  %v6430_v20 = vpop.f32.mrb[90].mxu0 }
 0xa9e   : > { %v4983_v3 = vmul.f32 %v10113_v6, %v10113_v6  ;;  %v10121_v13 = vadd.f32 %v6430_v20, %v10110_v33  ;;  %v4857_v50 = vpop.f32.mrb[91].mxu0 }
 0xa9f   : > { %v4981_v47 = vmul.f32 %v10116_v45, %v10116_v45  ;;  %v10126_v59 = vadd.f32 %v10110_v33, %v4857_v50 }
 0xaa0   : > { %v5015_v22 = vmul.f32 %v4983_v3, %v10113_v6  ;;  %v4984_v40 = vmul.f32 %v10121_v13, %v10121_v13 }
 0xaa1   : > { %v5013_v55 = vmul.f32 %v4981_v47, %v10116_v45  ;;  %v4982_v2 = vmul.f32 %v10126_v59, %v10126_v59 }
 0xaa2   : > { %v5047_v34 = vmul.f32 0.044715, %v5015_v22  ;;  %v5016_v58 = vmul.f32 %v4984_v40, %v10121_v13 }
 0xaa3   : > { %v5045_v43 = vmul.f32 0.044715, %v5013_v55  ;;  %v5014_v49 = vmul.f32 %v4982_v2, %v10126_v59  ;;  %v6433_v14 = vpop.f32.mrb[92].mxu0 }
 0xaa4   : > { %v5079_v12 = vadd.f32 %v5047_v34, %v10113_v6  ;;  %v5048_v26 = vmul.f32 0.044715, %v5016_v58  ;;  %v10138_v24 = vadd.f32 %v6433_v14, %v10110_v33  ;;  %v4870_v46 = vpop.f32.mrb[93].mxu0 }
 0xaa5   : > { %v5077_v21 = vadd.f32 %v5045_v43, %v10116_v45  ;;  %v5046_v4 = vmul.f32 0.044715, %v5014_v49  ;;  %v10142_v56 = vadd.f32 %v10110_v33, %v4870_v46  ;;  %v6434_v7 = vpop.f32.mrb[94].mxu0 }
 0xaa6   : > { %v5111_v32 = vmul.f32 0.7978846, %v5079_v12  ;;  %v5080_v28 = vadd.f32 %v5048_v26, %v10121_v13  ;;  %v4987_v54 = vmul.f32 %v10138_v24, %v10138_v24  ;;  %v10148_v36 = vadd.f32 %v6434_v7, %v10110_v33  ;;  %v4873_v38 = vpop.f32.mrb[95].mxu0 }
 0xaa7   : > { %v5109_v31 = vmul.f32 0.7978846, %v5077_v21  ;;  %v5078_v9 = vadd.f32 %v5046_v4, %v10126_v59  ;;  %v4985_v16 = vmul.f32 %v10142_v56, %v10142_v56  ;;  %v10154_v61 = vadd.f32 %v10110_v33, %v4873_v38 }
 0xaa8   : > { %6935 = vtanh.f32 %v5111_v32  ;;  %v5112_v35 = vmul.f32 0.7978846, %v5080_v28  ;;  %v5019_v5 = vmul.f32 %v4987_v54, %v10138_v24  ;;  %v4988_v23 = vmul.f32 %v10148_v36, %v10148_v36 }
 0xaa9   : > { %6937 = vtanh.f32 %v5109_v31  ;;  %v5110_v10 = vmul.f32 0.7978846, %v5078_v9  ;;  %v5017_v17 = vmul.f32 %v4985_v16, %v10142_v56  ;;  %v4986_v19 = vmul.f32 %v10154_v61, %v10154_v61 }
 0xaaa   : > { %6939 = vtanh.f32 %v5112_v35  ;;  %v5051_v25 = vmul.f32 0.044715, %v5019_v5  ;;  %v5020_v27 = vmul.f32 %v4988_v23, %v10148_v36 }
 0xaab   : > { %v5049_v0 = vmul.f32 0.044715, %v5017_v17  ;;  %v5018_v11 = vmul.f32 %v4986_v19, %v10154_v61  ;;  %v6437_v48 = vpop.f32.mrb[96].mxu0  ;;  %6941 = vtanh.f32 %v5110_v10 }
 0xaac   : > { %v5083_v30 = vadd.f32 %v5051_v25, %v10138_v24  ;;  %v5052_v1 = vmul.f32 0.044715, %v5020_v27  ;;  %v10166_v39 = vadd.f32 %v6437_v48, %v10110_v33  ;;  %v4886_v51 = vpop.f32.mrb[97].mxu0 }
 0xaad   : > { %v5081_v41 = vadd.f32 %v5049_v0, %v10142_v56  ;;  %v5050_v29 = vmul.f32 0.044715, %v5018_v11  ;;  %v10170_v20 = vadd.f32 %v10110_v33, %v4886_v51  ;;  %v6438_v3 = vpop.f32.mrb[98].mxu0 }
 0xaae   : > { %v5115_v50 = vmul.f32 0.7978846, %v5083_v30  ;;  %v5084_v47 = vadd.f32 %v5052_v1, %v10148_v36  ;;  %v4991_v22 = vmul.f32 %v10166_v39, %v10166_v39  ;;  %v10176_v40 = vadd.f32 %v6438_v3, %v10110_v33  ;;  %v4889_v55 = vpop.f32.mrb[99].mxu0 }
 0xaaf   : > { %v5113_v2 = vmul.f32 0.7978846, %v5081_v41  ;;  %v5082_v34 = vadd.f32 %v5050_v29, %v10154_v61  ;;  %v4989_v58 = vmul.f32 %v10170_v20, %v10170_v20  ;;  %v10182_v43 = vadd.f32 %v10110_v33, %v4889_v55 }
 0xab0   : > { %6943 = vtanh.f32 %v5115_v50  ;;  %v5116_v49 = vmul.f32 0.7978846, %v5084_v47  ;;  %v5023_v14 = vmul.f32 %v4991_v22, %v10166_v39  ;;  %v4992_v12 = vmul.f32 %v10176_v40, %v10176_v40 }
 0xab1   : > { %6945 = vtanh.f32 %v5113_v2  ;;  %v5114_v26 = vmul.f32 0.7978846, %v5082_v34  ;;  %v5021_v46 = vmul.f32 %v4989_v58, %v10170_v20  ;;  %v4990_v21 = vmul.f32 %v10182_v43, %v10182_v43 }
 0xab2   : > { %v6936_v4 = vpop.eup %6935  ;;  %6947 = vtanh.f32 %v5116_v49  ;;  %v5055_v7 = vmul.f32 0.044715, %v5023_v14  ;;  %v5024_v32 = vmul.f32 %v4992_v12, %v10176_v40 }
 0xab3   : > { %v6938_v28 = vpop.eup %6937  ;;  %v5175_v54 = vadd.f32 1.0, %v6936_v4  ;;  %6949 = vtanh.f32 %v5114_v26  ;;  %v5053_v38 = vmul.f32 0.044715, %v5021_v46  ;;  %v5022_v31 = vmul.f32 %v4990_v21, %v10182_v43  ;;  %v6441_v9 = vpop.f32.mrb[100].mxu0 }
 0xab4   : > { %v6940_v16 = vpop.eup %6939  ;;  %v5087_v35 = vadd.f32 %v5055_v7, %v10166_v39  ;;  %v5056_v5 = vmul.f32 0.044715, %v5024_v32  ;;  %v10194_v23 = vadd.f32 %v6441_v9, %v10110_v33  ;;  %v4902_v10 = vpop.f32.mrb[101].mxu0  ;;  %v5173_v17 = vadd.f32 1.0, %v6938_v28 }
 0xab5   : > { %v5207_v19 = vmul.f32 0.5, %v5175_v54  ;;  %v5176_v25 = vadd.f32 1.0, %v6940_v16  ;;  %v5085_v27 = vadd.f32 %v5053_v38, %v10170_v20  ;;  %v5054_v0 = vmul.f32 0.044715, %v5022_v31  ;;  %v6442_v11 = vpop.f32.mrb[102].mxu0  ;;  %v6942_v29 = vpop.eup %6941 }
 0xab6   : > { %v5119_v48 = vmul.f32 0.7978846, %v5087_v35  ;;  %v5088_v30 = vadd.f32 %v5056_v5, %v10176_v40  ;;  %v4995_v1 = vmul.f32 %v10194_v23, %v10194_v23  ;;  %v10201_v51 = vadd.f32 %v10110_v33, %v4902_v10  ;;  %v4905_v41 = vpop.f32.mrb[103].mxu0 }
 0xab7   : > { %v10204_v3 = vmul.f32 %v5207_v19, %v10113_v6  ;;  %v5208_v50 = vmul.f32 0.5, %v5176_v25  ;;  %v5117_v47 = vmul.f32 0.7978846, %v5085_v27  ;;  %v5086_v22 = vadd.f32 %v5054_v0, %v10182_v43 }
 0xab8   : > { %6951 = vtanh.f32 %v5119_v48  ;;  %v5120_v55 = vmul.f32 0.7978846, %v5088_v30  ;;  %v5027_v2 = vmul.f32 %v4995_v1, %v10194_v23  ;;  %v4993_v34 = vmul.f32 %v10201_v51, %v10201_v51 }
 0xab9   : > { %v10211_v58 = vmul.f32 %v5208_v50, %v10121_v13  ;;  %6953 = vtanh.f32 %v5117_v47  ;;  %v5118_v49 = vmul.f32 0.7978846, %v5086_v22  ;;  %v10214_v14 = vadd.f32 %v6442_v11, %v10110_v33 }
 0xaba   : > { %v10216_v6 = vpop.eup %6943  ;;  %6955 = vtanh.f32 %v5120_v55  ;;  %v5059_v12 = vmul.f32 0.044715, %v5027_v2  ;;  %v5025_v26 = vmul.f32 %v4993_v34, %v10201_v51  ;;  %v10220_v46 = vadd.f32 %v10110_v33, %v4905_v41 }
 0xabb   : > { %v10222_v21 = vpop.eup %6945  ;;  %v5270_v13 = vpack.c.bf16 %v10211_v58, %v10204_v3  ;;  %6957 = vtanh.f32 %v5118_v49  ;;  %v4996_v4 = vmul.f32 %v10214_v14, %v10214_v14  ;;  %v6445_v7 = vpop.f32.mrb[104].mxu0  ;;  %v5174_v32 = vadd.f32 1.0, %v6942_v29 }
 0xabc   : > { %v10228_v28 = vpop.eup %6947  ;;  %v5091_v54 = vadd.f32 %v5059_v12, %v10194_v23  ;;  %v5057_v38 = vmul.f32 0.044715, %v5025_v26  ;;  %v4994_v31 = vmul.f32 %v10220_v46, %v10220_v46  ;;  %v10234_v9 = vadd.f32 %v6445_v7, %v10110_v33  ;;  %v4918_v16 = vpop.f32.mrb[105].mxu0 }
 0xabd   : > { %v10236_v35 = vpop.eup %6949  ;;  %v5028_v5 = vmul.f32 %v4996_v4, %v10214_v14  ;;  %v10240_v10 = vadd.f32 %v10110_v33, %v4918_v16  ;;  %v6446_v19 = vpop.f32.mrb[106].mxu0  ;;  %v5205_v25 = vmul.f32 0.5, %v5173_v17  ;;  %v5206_v27 = vmul.f32 0.5, %v5174_v32 }
 0xabe   : > { %v5123_v0 = vmul.f32 0.7978846, %v5091_v54  ;;  %v5089_v11 = vadd.f32 %v5057_v38, %v10201_v51  ;;  %v5026_v48 = vmul.f32 %v4994_v31, %v10220_v46  ;;  %v4999_v30 = vmul.f32 %v10234_v9, %v10234_v9  ;;  %v4921_v1 = vpop.f32.mrb[107].mxu0 }
 0xabf   : > { %v5060_v41 = vmul.f32 0.044715, %v5028_v5  ;;  %v4997_v29 = vmul.f32 %v10240_v10, %v10240_v10  ;;  %v10249_v50 = vadd.f32 %v6446_v19, %v10110_v33  ;;  %v10252_v47 = vadd.f32 %v10110_v33, %v4921_v1 }
 0xac0   : > { %6959 = vtanh.f32 %v5123_v0  ;;  %v5121_v17 = vmul.f32 0.7978846, %v5089_v11  ;;  %v5058_v22 = vmul.f32 0.044715, %v5026_v48  ;;  %v5031_v55 = vmul.f32 %v4999_v30, %v10234_v9 }
 0xac1   : > { %v5092_v2 = vadd.f32 %v5060_v41, %v10214_v14  ;;  %v5029_v34 = vmul.f32 %v4997_v29, %v10240_v10  ;;  %v5000_v49 = vmul.f32 %v10249_v50, %v10249_v50  ;;  %v4998_v12 = vmul.f32 %v10252_v47, %v10252_v47 }
 0xac2   : > { %v10261_v26 = vpop.eup %6951  ;;  %6961 = vtanh.f32 %v5121_v17  ;;  %v5090_v4 = vadd.f32 %v5058_v22, %v10220_v46  ;;  %v5063_v7 = vmul.f32 0.044715, %v5031_v55  ;;  %v5237_v32 = vmul.f32 %v5205_v25, %v10116_v45 }
 0xac3   : > { %v10265_v54 = vpop.eup %6953  ;;  %v5124_v38 = vmul.f32 0.7978846, %v5092_v2  ;;  %v5061_v31 = vmul.f32 0.044715, %v5029_v34  ;;  %v5032_v16 = vmul.f32 %v5000_v49, %v10249_v50  ;;  %v5030_v5 = vmul.f32 %v4998_v12, %v10252_v47  ;;  %v6449_v19 = vpop.f32.mrb[108].mxu0 }
 0xac4   : > { %v10269_v0 = vpop.eup %6955  ;;  %v5122_v11 = vmul.f32 0.7978846, %v5090_v4  ;;  %v5095_v48 = vadd.f32 %v5063_v7, %v10234_v9  ;;  %v5238_v30 = vmul.f32 %v5206_v27, %v10126_v59  ;;  %v10274_v1 = vadd.f32 %v6449_v19, %v10110_v33  ;;  %v4934_v45 = vpop.f32.mrb[109].mxu0 }
 0xac5   : > { %v10276_v25 = vpop.eup %6957  ;;  %6963 = vtanh.f32 %v5124_v38  ;;  %v5093_v41 = vadd.f32 %v5061_v31, %v10240_v10  ;;  %v5064_v29 = vmul.f32 0.044715, %v5032_v16  ;;  %v5062_v17 = vmul.f32 0.044715, %v5030_v5  ;;  %v6450_v22 = vpop.f32.mrb[110].mxu0 }
 0xac6   : > { %6965 = vtanh.f32 %v5122_v11  ;;  %v5127_v55 = vmul.f32 0.7978846, %v5095_v48  ;;  %v5269_v2 = vpack.c.bf16 %v5238_v30, %v5237_v32  ;;  %v5003_v34 = vmul.f32 %v10274_v1, %v10274_v1  ;;  %v4937_v49 = vpop.f32.mrb[111].mxu0 }
 0xac7   : > { %v5125_v59 = vmul.f32 0.7978846, %v5093_v41  ;;  %v5096_v27 = vadd.f32 %v5064_v29, %v10249_v50  ;;  %v5094_v12 = vadd.f32 %v5062_v17, %v10252_v47  ;;  %v10284_v4 = vadd.f32 %v10110_v33, %v4934_v45 }
 0xac8   : > { %6967 = vtanh.f32 %v5127_v55  ;;  %6475 = vmatprep.mubr.bf16.mxu0 %v5269_v2  ;;  %v5035_v7 = vmul.f32 %v5003_v34, %v10274_v1  ;;  %v10288_v38 = vadd.f32 %v6450_v22, %v10110_v33  ;;  %v10291_v32 = vadd.f32 %v10110_v33, %v4937_v49 }
 0xac9   : > { %6969 = vtanh.f32 %v5125_v59  ;;  %v5128_v31 = vmul.f32 0.7978846, %v5096_v27  ;;  %v5126_v16 = vmul.f32 0.7978846, %v5094_v12  ;;  %6476 = vmatmul.mubr.bf16.vlgmr.msra.gmra.mrb[120].mxu0 %v5270_v13  ;;  %v5001_v5 = vmul.f32 %v10284_v4, %v10284_v4 }
 0xaca   : > { %v10298_v19 = vpop.eup %6959  ;;  %v5067_v11 = vmul.f32 0.044715, %v5035_v7  ;;  %v5004_v48 = vmul.f32 %v10288_v38, %v10288_v38  ;;  %v5002_v30 = vmul.f32 %v10291_v32, %v10291_v32  ;;  %v5177_v45 = vadd.f32 1.0, %v10222_v21 }
 0xacb   : > { %6971 = vtanh.f32 %v5128_v31  ;;  %v5033_v41 = vmul.f32 %v5001_v5, %v10284_v4  ;;  %v5178_v3 = vadd.f32 1.0, %v10236_v35  ;;  %v5179_v58 = vadd.f32 1.0, %v10216_v6  ;;  %v6453_v13 = vpop.f32.mrb[112].mxu0 }
 0xacc   : > { %v10308_v29 = vpop.eup %6961  ;;  %6973 = vtanh.f32 %v5126_v16  ;;  %v5099_v17 = vadd.f32 %v5067_v11, %v10274_v1  ;;  %v5036_v22 = vmul.f32 %v5004_v48, %v10288_v38  ;;  %v5034_v55 = vmul.f32 %v5002_v30, %v10291_v32  ;;  %v4950_v2 = vpop.f32.mrb[113].mxu0 }
 0xacd   : > { %v5065_v34 = vmul.f32 0.044715, %v5033_v41  ;;  %v5209_v21 = vmul.f32 0.5, %v5177_v45  ;;  %v5210_v49 = vmul.f32 0.5, %v5178_v3  ;;  %v5180_v59 = vadd.f32 1.0, %v10228_v28  ;;  %v6454_v27 = vpop.f32.mrb[114].mxu0 }
 0xace   : > { %v5131_v35 = vmul.f32 0.7978846, %v5099_v17  ;;  %v5068_v12 = vmul.f32 0.044715, %v5036_v22  ;;  %v5066_v6 = vmul.f32 0.044715, %v5034_v55  ;;  %v10315_v7 = vadd.f32 %v6453_v13, %v10110_v33 }
 0xacf   : > { %v10317_v31 = vpop.eup %6963  ;;  %v5097_v16 = vadd.f32 %v5065_v34, %v10284_v4  ;;  %v5241_v5 = vmul.f32 %v5209_v21, %v10142_v56  ;;  %v5242_v11 = vmul.f32 %v5210_v49, %v10154_v61  ;;  %v5211_v48 = vmul.f32 0.5, %v5179_v58  ;;  %v4953_v30 = vpop.f32.mrb[115].mxu0 }
 0xad0   : > { %v10322_v45 = vpop.eup %6965  ;;  %6975 = vtanh.f32 %v5131_v35  ;;  %v5100_v28 = vadd.f32 %v5068_v12, %v10288_v38  ;;  %v5098_v41 = vadd.f32 %v5066_v6, %v10291_v32  ;;  %v5212_v3 = vmul.f32 0.5, %v5180_v59 }
 0xad1   : > { %v5129_v13 = vmul.f32 0.7978846, %v5097_v16  ;;  %v5271_v17 = vpack.c.bf16 %v5242_v11, %v5241_v5  ;;  %v5243_v22 = vmul.f32 %v5211_v48, %v10138_v24  ;;  %v5007_v55 = vmul.f32 %v10315_v7, %v10315_v7 }
 0xad2   : > { %v10329_v56 = vpop.eup %6967  ;;  %v5132_v61 = vmul.f32 0.7978846, %v5100_v28  ;;  %v5130_v58 = vmul.f32 0.7978846, %v5098_v41  ;;  %v5244_v34 = vmul.f32 %v5212_v3, %v10148_v36  ;;  %v10333_v21 = vadd.f32 %v10110_v33, %v4950_v2 }
 0xad3   : > { %v10335_v49 = vpop.eup %6969  ;;  %6977 = vtanh.f32 %v5129_v13  ;;  %6479 = vmatprep.mubr.bf16.mxu0 %v5271_v17  ;;  %v5039_v59 = vmul.f32 %v5007_v55, %v10315_v7  ;;  %v10339_v24 = vadd.f32 %v6454_v27, %v10110_v33  ;;  %v10342_v35 = vadd.f32 %v10110_v33, %v4953_v30  ;;  %v6457_v12 = vpop.f32.mrb[116].mxu0 }
 0xad4   : > { %6979 = vtanh.f32 %v5132_v61  ;;  %v5272_v6 = vpack.c.bf16 %v5244_v34, %v5243_v22  ;;  %v5005_v36 = vmul.f32 %v10333_v21, %v10333_v21  ;;  %v5181_v2 = vadd.f32 1.0, %v10265_v54  ;;  %v4966_v16 = vpop.f32.mrb[117].mxu0 }
 0xad5   : > { %v10347_v5 = vpop.eup %6971  ;;  %6981 = vtanh.f32 %v5130_v58  ;;  %v5071_v11 = vmul.f32 0.044715, %v5039_v59  ;;  %v5008_v27 = vmul.f32 %v10339_v24, %v10339_v24  ;;  %v5006_v48 = vmul.f32 %v10342_v35, %v10342_v35  ;;  %v6458_v30 = vpop.f32.mrb[118].mxu0 }
 0xad6   : > { %v10353_v28 = vpop.eup %6973  ;;  %6480 = vmatmul.mubr.bf16.gmra.mrb[124].mxu0 %v5272_v6  ;;  %v5037_v41 = vmul.f32 %v5005_v36, %v10333_v21  ;;  %v5182_v3 = vadd.f32 1.0, %v10276_v25  ;;  %v5213_v54 = vmul.f32 0.5, %v5181_v2  ;;  %v5183_v13 = vadd.f32 1.0, %v10261_v26  ;;  %v4969_v17 = vpop.f32.mrb[119].mxu0 }
 0xad7   : > { %v5103_v22 = vadd.f32 %v5071_v11, %v10315_v7  ;;  %v5040_v55 = vmul.f32 %v5008_v27, %v10339_v24  ;;  %v5038_v61 = vmul.f32 %v5006_v48, %v10342_v35  ;;  %v5184_v58 = vadd.f32 1.0, %v10269_v0 }
 0xad8   : > { %v5069_v34 = vmul.f32 0.044715, %v5037_v41  ;;  %v5214_v59 = vmul.f32 0.5, %v5182_v3  ;;  %v5245_v6 = vmul.f32 %v5213_v54, %v10170_v20  ;;  %v5215_v15 = vmul.f32 0.5, %v5183_v13 }
 0xad9   : > { %v5135_v36 = vmul.f32 0.7978846, %v5103_v22  ;;  %v5072_v37 = vmul.f32 0.044715, %v5040_v55  ;;  %v5070_v25 = vmul.f32 0.044715, %v5038_v61  ;;  %v10364_v2 = vadd.f32 %v6457_v12, %v10110_v33 }
 0xada   : > { %v10366_v26 = vpop.eup %6975  ;;  %v5101_v11 = vadd.f32 %v5069_v34, %v10333_v21  ;;  %v5246_v27 = vmul.f32 %v5214_v59, %v10182_v43  ;;  %v5216_v48 = vmul.f32 0.5, %v5184_v58  ;;  %v5247_v0 = vmul.f32 %v5215_v15, %v10166_v39 }
 0xadb   : > { %6983 = vtanh.f32 %v5135_v36  ;;  %v5104_v41 = vadd.f32 %v5072_v37, %v10339_v24  ;;  %v5102_v20 = vadd.f32 %v5070_v25, %v10342_v35  ;;  %v5011_v3 = vmul.f32 %v10364_v2, %v10364_v2 }
 0xadc   : > { %v5133_v54 = vmul.f32 0.7978846, %v5101_v11  ;;  %v5273_v12 = vpack.c.bf16 %v5246_v27, %v5245_v6  ;;  %v5248_v13 = vmul.f32 %v5216_v48, %v10176_v40  ;;  %v10377_v22 = vadd.f32 %v10110_v33, %v4966_v16 }
 0xadd   : > { %v10379_v55 = vpop.eup %6977  ;;  %v5136_v43 = vmul.f32 0.7978846, %v5104_v41  ;;  %v5134_v61 = vmul.f32 0.7978846, %v5102_v20  ;;  %v5043_v15 = vmul.f32 %v5011_v3, %v10364_v2  ;;  %v10383_v37 = vadd.f32 %v6458_v30, %v10110_v33 }
 0xade   : > { %v10385_v39 = vpop.eup %6979  ;;  %6985 = vtanh.f32 %v5133_v54  ;;  %6483 = vmatprep.mubr.bf16.mxu0 %v5273_v12  ;;  %v5274_v58 = vpack.c.bf16 %v5248_v13, %v5247_v0  ;;  %v5009_v40 = vmul.f32 %v10377_v22, %v10377_v22  ;;  %v10390_v16 = vadd.f32 %v10110_v33, %v4969_v17 }
 0xadf   : > { %v6982_v34 = vpop.eup %6981  ;;  %6987 = vtanh.f32 %v5136_v43  ;;  %v5075_v59 = vmul.f32 0.044715, %v5043_v15  ;;  %v5012_v6 = vmul.f32 %v10383_v37, %v10383_v37  ;;  %v5185_v30 = vadd.f32 1.0, %v10308_v29 }
 0xae0   : > { %6989 = vtanh.f32 %v5134_v61  ;;  %6484 = vmatmul.mubr.bf16.gmra.mrb[128].mxu0 %v5274_v58  ;;  %v5041_v36 = vmul.f32 %v5009_v40, %v10377_v22  ;;  %v5010_v25 = vmul.f32 %v10390_v16, %v10390_v16  ;;  %v5186_v11 = vadd.f32 1.0, %v10322_v45 }
 0xae1   : > { %v5107_v33 = vadd.f32 %v5075_v59, %v10364_v2  ;;  %v5044_v17 = vmul.f32 %v5012_v6, %v10383_v37  ;;  %v5217_v27 = vmul.f32 0.5, %v5185_v30  ;;  %v5187_v48 = vadd.f32 1.0, %v10298_v19 }
 0xae2   : > { %v5073_v0 = vmul.f32 0.044715, %v5041_v36  ;;  %v5042_v41 = vmul.f32 %v5010_v25, %v10390_v16  ;;  %v5218_v29 = vmul.f32 0.5, %v5186_v11  ;;  %v5188_v20 = vadd.f32 1.0, %v10317_v31 }
 0xae3   : > { %v5139_v3 = vmul.f32 0.7978846, %v5107_v33  ;;  %v5076_v54 = vmul.f32 0.044715, %v5044_v17  ;;  %v5249_v12 = vmul.f32 %v5217_v27, %v10201_v51  ;;  %v5219_v13 = vmul.f32 0.5, %v5187_v48 }
 0xae4   : > { %v5105_v45 = vadd.f32 %v5073_v0, %v10377_v22  ;;  %v5074_v43 = vmul.f32 0.044715, %v5042_v41  ;;  %v5250_v61 = vmul.f32 %v5218_v29, %v10220_v46  ;;  %v5220_v15 = vmul.f32 0.5, %v5188_v20 }
 0xae5   : > { %v6984_v58 = vpop.eup %6983  ;;  %6991 = vtanh.f32 %v5139_v3  ;;  %v5108_v19 = vadd.f32 %v5076_v54, %v10383_v37  ;;  %v5251_v40 = vmul.f32 %v5219_v13, %v10194_v23  ;;  %v5189_v59 = vadd.f32 1.0, %v10335_v49 }
 0xae6   : > { %v5137_v31 = vmul.f32 0.7978846, %v5105_v45  ;;  %v5106_v6 = vadd.f32 %v5074_v43, %v10390_v16  ;;  %v5275_v30 = vpack.c.bf16 %v5250_v61, %v5249_v12  ;;  %v5252_v51 = vmul.f32 %v5220_v15, %v10214_v14 }
 0xae7   : > { %v5140_v36 = vmul.f32 0.7978846, %v5108_v19  ;;  %v5190_v25 = vadd.f32 1.0, %v10353_v28  ;;  %v5221_v11 = vmul.f32 0.5, %v5189_v59  ;;  %v5191_v46 = vadd.f32 1.0, %v10329_v56 }
 0xae8   : > { %v6986_v33 = vpop.eup %6985  ;;  %6993 = vtanh.f32 %v5137_v31  ;;  %v5138_v17 = vmul.f32 0.7978846, %v5106_v6  ;;  %6487 = vmatprep.mubr.bf16.mxu0 %v5275_v30  ;;  %v5276_v27 = vpack.c.bf16 %v5252_v51, %v5251_v40  ;;  %v5192_v23 = vadd.f32 1.0, %v10347_v5 }
 0xae9   : > { %v6988_v49 = vpop.eup %6987  ;;  %6995 = vtanh.f32 %v5140_v36  ;;  %v5222_v48 = vmul.f32 0.5, %v5190_v25  ;;  %v5253_v0 = vmul.f32 %v5221_v11, %v10240_v10  ;;  %v5223_v41 = vmul.f32 0.5, %v5191_v46 }
 0xaea   : > { %v6990_v14 = vpop.eup %6989  ;;  %6997 = vtanh.f32 %v5138_v17  ;;  %6488 = vmatmul.mubr.bf16.gmra.mrb[132].mxu0 %v5276_v27  ;;  %v5224_v28 = vmul.f32 0.5, %v5192_v23  ;;  %v5193_v29 = vadd.f32 1.0, %v10379_v55  ;;  %v5194_v56 = vadd.f32 1.0, %v6982_v34 }
 0xaeb   : > { %v5254_v20 = vmul.f32 %v5222_v48, %v10252_v47  ;;  %v5255_v3 = vmul.f32 %v5223_v41, %v10234_v9  ;;  %v5195_v54 = vadd.f32 1.0, %v10366_v26  ;;  %v5196_v5 = vadd.f32 1.0, %v10385_v39 }
 0xaec   : > { %v5256_v12 = vmul.f32 %v5224_v28, %v10249_v50  ;;  %v5225_v13 = vmul.f32 0.5, %v5193_v29  ;;  %v5226_v10 = vmul.f32 0.5, %v5194_v56  ;;  %v5197_v45 = vadd.f32 1.0, %v6986_v33 }
 0xaed   : > { %v5277_v43 = vpack.c.bf16 %v5254_v20, %v5253_v0  ;;  %v5227_v61 = vmul.f32 0.5, %v5195_v54  ;;  %v5228_v15 = vmul.f32 0.5, %v5196_v5  ;;  %v5198_v19 = vadd.f32 1.0, %v6990_v14 }
 0xaee   : > { %v5278_v40 = vpack.c.bf16 %v5256_v12, %v5255_v3  ;;  %v5257_v55 = vmul.f32 %v5225_v13, %v10284_v4  ;;  %v5258_v47 = vmul.f32 %v5226_v10, %v10291_v32  ;;  %v5229_v34 = vmul.f32 0.5, %v5197_v45 }
 0xaef   : > { %v6992_v9 = vpop.eup %6991  ;;  %6491 = vmatprep.mubr.bf16.mxu0 %v5277_v43  ;;  %v5259_v26 = vmul.f32 %v5227_v61, %v10274_v1  ;;  %v5260_v39 = vmul.f32 %v5228_v15, %v10288_v38  ;;  %v5230_v50 = vmul.f32 0.5, %v5198_v19  ;;  %v5199_v59 = vadd.f32 1.0, %v6984_v58 }
 0xaf0   : > { %v5279_v31 = vpack.c.bf16 %v5258_v47, %v5257_v55  ;;  %v5200_v6 = vadd.f32 1.0, %v6988_v49  ;;  %v5203_v30 = vadd.f32 1.0, %v6992_v9  ;;  %v5261_v36 = vmul.f32 %v5229_v34, %v10333_v21 }
 0xaf1   : > { %v5280_v51 = vpack.c.bf16 %v5260_v39, %v5259_v26  ;;  %v5262_v25 = vmul.f32 %v5230_v50, %v10342_v35  ;;  %v5231_v4 = vmul.f32 0.5, %v5199_v59 }
 0xaf2   : > { %v6994_v11 = vpop.eup %6993  ;;  %6492 = vmatmul.mubr.bf16.gmra.mrb[136].mxu0 %v5278_v40  ;;  %v5232_v32 = vmul.f32 0.5, %v5200_v6  ;;  %v5235_v23 = vmul.f32 0.5, %v5203_v30  ;;  %v11032_v6 = vld [vmem:[#allocation30_spill] sm:$0xff] }
 0xaf3   : > { %v6996_v46 = vpop.eup %6995  ;;  %6495 = vmatprep.mubr.bf16.mxu0 %v5279_v31  ;;  %v5281_v33 = vpack.c.bf16 %v5262_v25, %v5261_v36  ;;  %v5201_v1 = vadd.f32 1.0, %v6994_v11  ;;  %v5263_v38 = vmul.f32 %v5231_v4, %v10315_v7 }
 0xaf4   : > { %v6998_v17 = vpop.eup %6997  ;;  %v5264_v58 = vmul.f32 %v5232_v32, %v10339_v24  ;;  %v5204_v27 = vadd.f32 1.0, %v6996_v46  ;;  %v5267_v41 = vmul.f32 %v5235_v23, %v10364_v2  ;;  %v10437_v24 = vld [vmem:[%s11030_s0] ss:$0 sm:$0xff]  ;;  %v11034_v32 = vld [vmem:[#allocation35_spill] sm:$0xff]  ;;  %s7295_s0 = scalar_lea.vmem %s10571_s16, 4096 }
 0xaf5   : > { %v5202_v49 = vadd.f32 1.0, %v6998_v17  ;;  %v5233_v48 = vmul.f32 0.5, %v5201_v1  ;;  %v11035_v17 = vld [vmem:[#allocation32_spill] sm:$0xff]  ;;  %p7296_p4 = scmp.ne.s32.totalorder %s10571_s16, %s7295_s0  ;;  %p7303_p8 = scmp.lt.s32.totalorder %s7301_s21, %s7295_s0 }
 0xaf6   : > { %v5282_v21 = vpack.c.bf16 %v5264_v58, %v5263_v38  ;;  %v5236_v0 = vmul.f32 0.5, %v5204_v27  ;;  %v11036_v27 = vld [vmem:[#allocation34_spill] sm:$0xff] }
 0xaf7   : > { %v5234_v35 = vmul.f32 0.5, %v5202_v49  ;;  %v5265_v28 = vmul.f32 %v5233_v48, %v10377_v22  ;;  %v11037_v49 = vld [vmem:[#allocation33_spill] sm:$0xff]  ;;  %p7297_p1 = pnand %p7296_p4, %p11055_p13  ;;  %p7304_p10 = por %p7303_p8, %p7302_p2 }
 0xaf8   : > { %v5268_v14 = vmul.f32 %v5236_v0, %v10383_v37 }
 0xaf9   : > { %v5266_v29 = vmul.f32 %v5234_v35, %v10390_v16  ;;  %p7298_p3 = pneg %p7297_p1 }
 0xafa   : > { %6496 = vmatmul.mubr.bf16.gmra.mrb[140].mxu0 %v5280_v51  ;;  %v5284_v56 = vpack.c.bf16 %v5268_v14, %v5267_v41  ;;  %v11033_v51 = vld [vmem:[#allocation25_spill] sm:$0xff] }
 0xafb   : > { %6499 = vmatprep.mubr.bf16.mxu0 %v5281_v33  ;;  %v5283_v7 = vpack.c.bf16 %v5266_v29, %v5265_v28  ;;  %v11038_v28 = vld [vmem:[#allocation41_spill] sm:$0xff]  ;;  %p7305_p11 = pnand %p7304_p10, %p7298_p3 }
 0xb02   : > { %6500 = vmatmul.mubr.bf16.gmra.mrb[144].mxu0 %v5282_v21 }
 0xb03   : > { %6503 = vmatprep.mubr.bf16.mxu0 %v5283_v7 }
 0xb0a   : > { %6504 = vmatmul.mubr.bf16.gmra.mrb[148].mxu0 %v5284_v56 }
 0xb9c   : > { %v6477_v2 = vpop.f32.mrb[120].mxu0 }
 0xb9d   : > { %v5399_v37 = vadd.f32 %v6477_v2, %v10437_v24  ;;  %v5390_v20 = vpop.f32.mrb[121].mxu0  ;;  %v11039_v2 = vld [vmem:[#allocation38_spill] sm:$0xff] }
 0xb9e   : > { %v5391_v22 = vadd.f32 %v10437_v24, %v5390_v20  ;;  %v6478_v16 = vpop.f32.mrb[122].mxu0 }
 0xb9f   : > { %v5519_v3 = vadd.f32 %v5399_v37, %v9575_v53  ;;  %v5402_v54 = vadd.f32 %v6478_v16, %v10437_v24  ;;  %v5393_v5 = vpop.f32.mrb[123].mxu0 }
 0xba0   : > { %v5517_v12 = vadd.f32 %v5391_v22, %v9570_v60  ;;  %v5394_v13 = vadd.f32 %v10437_v24, %v5393_v5  ;;  %v11040_v22 = vld [vmem:[#allocation40_spill] sm:$0xff] }
 0xba1   : > { %5551 = vst.msk [vmem:[%s10447_s3 + $0x10] sm:$0xff] %vm997_vm0, %v5519_v3  ;;  %v5520_v10 = vadd.f32 %v5402_v54, %v9583_v44  ;;  %v11041_v3 = vld [vmem:[#allocation39_spill] sm:$0xff] }
 0xba2   : > { %5549 = vst.msk [vmem:[%s10447_s3] sm:$0xff] %vm997_vm0, %v5517_v12  ;;  %v5518_v53 = vadd.f32 %v5394_v13, %v9578_v42 }
 0xba3   : > { %5552 = vst.msk [vmem:[%s10447_s3 + $0x18] sm:$0xff] %vm997_vm0, %v5520_v10 }
 0xba4   : > { %5550 = vst.msk [vmem:[%s10447_s3 + $0x8] sm:$0xff] %vm997_vm0, %v5518_v53 }
 0xba9   : > { %v6481_v60 = vpop.f32.mrb[124].mxu0 }
 0xbaa   : > { %v5415_v45 = vadd.f32 %v6481_v60, %v10437_v24  ;;  %v5406_v43 = vpop.f32.mrb[125].mxu0  ;;  %v11042_v60 = vld [vmem:[#allocation47_spill] sm:$0xff] }
 0xbab   : > { %v5407_v61 = vadd.f32 %v10437_v24, %v5406_v43  ;;  %v6482_v15 = vpop.f32.mrb[126].mxu0 }
 0xbac   : > { %v5523_v44 = vadd.f32 %v5415_v45, %v9599_v8  ;;  %v5418_v19 = vadd.f32 %v6482_v15, %v10437_v24  ;;  %v5409_v40 = vpop.f32.mrb[127].mxu0  ;;  %v11043_v15 = vld [vmem:[#allocation44_spill] sm:$0xff] }
 0xbad   : > { %v5521_v42 = vadd.f32 %v5407_v61, %v9592_v62  ;;  %v5410_v55 = vadd.f32 %v10437_v24, %v5409_v40  ;;  %v11044_v40 = vld [vmem:[#allocation46_spill] sm:$0xff] }
 0xbae   : > { %5555 = vst.msk [vmem:[%s10447_s3 + $0x30] sm:$0xff] %vm997_vm0, %v5523_v44  ;;  %v5524_v47 = vadd.f32 %v5418_v19, %v9607_v57 }
 0xbaf   : > { %5553 = vst.msk [vmem:[%s10447_s3 + $0x20] sm:$0xff] %vm997_vm0, %v5521_v42  ;;  %v5522_v34 = vadd.f32 %v5410_v55, %v9602_v52  ;;  %v11045_v55 = vld [vmem:[#allocation45_spill] sm:$0xff] }
 0xbb0   : > { %5556 = vst.msk [vmem:[%s10447_s3 + $0x38] sm:$0xff] %vm997_vm0, %v5524_v47 }
 0xbb1   : > { %5554 = vst.msk [vmem:[%s10447_s3 + $0x28] sm:$0xff] %vm997_vm0, %v5522_v34 }
 0xbb3   : > { %v6485_v8 = vpop.f32.mrb[128].mxu0 }
 0xbb4   : > { %v5431_v62 = vadd.f32 %v6485_v8, %v10437_v24  ;;  %v5422_v9 = vpop.f32.mrb[129].mxu0 }
 0xbb5   : > { %v5423_v26 = vadd.f32 %v10437_v24, %v5422_v9  ;;  %v6486_v39 = vpop.f32.mrb[130].mxu0 }
 0xbb6   : > { %v5527_v57 = vadd.f32 %v5431_v62, %v9623_v18  ;;  %v5434_v50 = vadd.f32 %v6486_v39, %v10437_v24  ;;  %v5425_v59 = vpop.f32.mrb[131].mxu0  ;;  %v11046_v39 = vld [vmem:[#allocation52_spill] sm:$0xff] }
 0xbb7   : > { %v5525_v52 = vadd.f32 %v5423_v26, %v9616_v63  ;;  %v5426_v31 = vadd.f32 %v10437_v24, %v5425_v59 }
 0xbb8   : > { %5559 = vst.msk [vmem:[%s10447_s3 + $0x50] sm:$0xff] %vm997_vm0, %v5527_v57  ;;  %v5528_v30 = vadd.f32 %v5434_v50, %v11032_v6 }
 0xbb9   : > { %5557 = vst.msk [vmem:[%s10447_s3 + $0x40] sm:$0xff] %vm997_vm0, %v5525_v52  ;;  %v5526_v36 = vadd.f32 %v5426_v31, %v11033_v51  ;;  %v11047_v52 = vld [vmem:[#allocation50_spill] sm:$0xff] }
 0xbba   : > { %5560 = vst.msk [vmem:[%s10447_s3 + $0x58] sm:$0xff] %vm997_vm0, %v5528_v30  ;;  %v11048_v30 = vld [vmem:[#allocation53_spill] sm:$0xff] }
 0xbbb   : > { %5558 = vst.msk [vmem:[%s10447_s3 + $0x48] sm:$0xff] %vm997_vm0, %v5526_v36  ;;  %v11049_v36 = vld [vmem:[#allocation51_spill] sm:$0xff] }
 0xbbd   : > { %v6489_v18 = vpop.f32.mrb[132].mxu0 }
 0xbbe   : > { %v5447_v63 = vadd.f32 %v6489_v18, %v10437_v24  ;;  %v5438_v25 = vpop.f32.mrb[133].mxu0 }
 0xbbf   : > { %v5439_v4 = vadd.f32 %v10437_v24, %v5438_v25  ;;  %v6490_v11 = vpop.f32.mrb[134].mxu0 }
 0xbc0   : > { %v5531_v46 = vadd.f32 %v5447_v63, %v11034_v32  ;;  %v5450_v33 = vadd.f32 %v6490_v11, %v10437_v24  ;;  %v5441_v1 = vpop.f32.mrb[135].mxu0 }
 0xbc1   : > { %v5529_v38 = vadd.f32 %v5439_v4, %v11035_v17  ;;  %v5442_v58 = vadd.f32 %v10437_v24, %v5441_v1 }
 0xbc2   : > { %5563 = vst.msk [vmem:[%s10447_s3 + $0x70] sm:$0xff] %vm997_vm0, %v5531_v46  ;;  %v5532_v23 = vadd.f32 %v5450_v33, %v11036_v27  ;;  %v11050_v46 = vld [vmem:[#allocation60_spill] sm:$0xff] }
 0xbc3   : > { %5561 = vst.msk [vmem:[%s10447_s3 + $0x60] sm:$0xff] %vm997_vm0, %v5529_v38  ;;  %v5530_v48 = vadd.f32 %v5442_v58, %v11037_v49  ;;  %v11051_v38 = vld [vmem:[#allocation55_spill] sm:$0xff] }
 0xbc4   : > { %5564 = vst.msk [vmem:[%s10447_s3 + $0x78] sm:$0xff] %vm997_vm0, %v5532_v23  ;;  %v11052_v23 = vld [vmem:[#allocation59_spill] sm:$0xff] }
 0xbc5   : > { %5562 = vst.msk [vmem:[%s10447_s3 + $0x68] sm:$0xff] %vm997_vm0, %v5530_v48  ;;  %v6493_v21 = vpop.f32.mrb[136].mxu0  ;;  %v11054_v48 = vld [vmem:[#allocation58_spill] sm:$0xff] }
 0xbc6   : > { %v5463_v0 = vadd.f32 %v6493_v21, %v10437_v24  ;;  %v5454_v35 = vpop.f32.mrb[137].mxu0 }
 0xbc7   : > { %v5455_v41 = vadd.f32 %v10437_v24, %v5454_v35  ;;  %v6494_v14 = vpop.f32.mrb[138].mxu0 }
 0xbc8   : > { %v5535_v29 = vadd.f32 %v5463_v0, %v11038_v28  ;;  %v5466_v56 = vadd.f32 %v6494_v14, %v10437_v24  ;;  %v5457_v7 = vpop.f32.mrb[139].mxu0 }
 0xbc9   : > { %v5533_v37 = vadd.f32 %v5455_v41, %v11039_v2  ;;  %v5458_v20 = vadd.f32 %v10437_v24, %v5457_v7 }
 0xbca   : > { %5567 = vst.msk [vmem:[%s10447_s3 + $0x90] sm:$0xff] %vm997_vm0, %v5535_v29  ;;  %v5536_v16 = vadd.f32 %v5466_v56, %v11040_v22 }
 0xbcb   : > { %5565 = vst.msk [vmem:[%s10447_s3 + $0x80] sm:$0xff] %vm997_vm0, %v5533_v37  ;;  %v5534_v54 = vadd.f32 %v5458_v20, %v11041_v3 }
 0xbcc   : > { %5568 = vst.msk [vmem:[%s10447_s3 + $0x98] sm:$0xff] %vm997_vm0, %v5536_v16 }
 0xbcd   : > { %5566 = vst.msk [vmem:[%s10447_s3 + $0x88] sm:$0xff] %vm997_vm0, %v5534_v54  ;;  %v6497_v5 = vpop.f32.mrb[140].mxu0 }
 0xbce   : > { %v5479_v12 = vadd.f32 %v6497_v5, %v10437_v24  ;;  %v5470_v13 = vpop.f32.mrb[141].mxu0 }
 0xbcf   : > { %v5471_v10 = vadd.f32 %v10437_v24, %v5470_v13  ;;  %v6498_v53 = vpop.f32.mrb[142].mxu0 }
 0xbd0   : > { %v5539_v45 = vadd.f32 %v5479_v12, %v11042_v60  ;;  %v5482_v43 = vadd.f32 %v6498_v53, %v10437_v24  ;;  %v5473_v61 = vpop.f32.mrb[143].mxu0 }
 0xbd1   : > { %v5537_v44 = vadd.f32 %v5471_v10, %v11043_v15  ;;  %v5474_v19 = vadd.f32 %v10437_v24, %v5473_v61 }
 0xbd2   : > { %5571 = vst.msk [vmem:[%s10447_s3 + $0xb0] sm:$0xff] %vm997_vm0, %v5539_v45  ;;  %v5540_v42 = vadd.f32 %v5482_v43, %v11044_v40 }
 0xbd3   : > { %5569 = vst.msk [vmem:[%s10447_s3 + $0xa0] sm:$0xff] %vm997_vm0, %v5537_v44  ;;  %v5538_v47 = vadd.f32 %v5474_v19, %v11045_v55 }
 0xbd4   : > { %5572 = vst.msk [vmem:[%s10447_s3 + $0xb8] sm:$0xff] %vm997_vm0, %v5540_v42 }
 0xbd5   : > { %5570 = vst.msk [vmem:[%s10447_s3 + $0xa8] sm:$0xff] %vm997_vm0, %v5538_v47  ;;  %v6501_v34 = vpop.f32.mrb[144].mxu0 }
 0xbd6   : > { %v5495_v8 = vadd.f32 %v6501_v34, %v10437_v24  ;;  %v5486_v62 = vpop.f32.mrb[145].mxu0 }
 0xbd7   : > { %v5487_v9 = vadd.f32 %v10437_v24, %v5486_v62  ;;  %v6502_v26 = vpop.f32.mrb[146].mxu0 }
 0xbd8   : > { %v5543_v57 = vadd.f32 %v5495_v8, %v11046_v39  ;;  %v5498_v50 = vadd.f32 %v6502_v26, %v10437_v24  ;;  %v5489_v59 = vpop.f32.mrb[147].mxu0 }
 0xbd9   : > { %v5541_v31 = vadd.f32 %v5487_v9, %v11047_v52  ;;  %v5490_v6 = vadd.f32 %v10437_v24, %v5489_v59 }
 0xbda   : > { %5575 = vst.msk [vmem:[%s10447_s3 + $0xd0] sm:$0xff] %vm997_vm0, %v5543_v57  ;;  %v5544_v51 = vadd.f32 %v5498_v50, %v11048_v30 }
 0xbdb   : > { %5573 = vst.msk [vmem:[%s10447_s3 + $0xc0] sm:$0xff] %vm997_vm0, %v5541_v31  ;;  %v5542_v18 = vadd.f32 %v5490_v6, %v11049_v36 }
 0xbdc   : > { %5576 = vst.msk [vmem:[%s10447_s3 + $0xd8] sm:$0xff] %vm997_vm0, %v5544_v51 }
 0xbdd   : > { %5574 = vst.msk [vmem:[%s10447_s3 + $0xc8] sm:$0xff] %vm997_vm0, %v5542_v18  ;;  %v6505_v63 = vpop.f32.mrb[148].mxu0 }
 0xbde   : > { %v5511_v25 = vadd.f32 %v6505_v63, %v10437_v24  ;;  %v5502_v4 = vpop.f32.mrb[149].mxu0 }
 0xbdf   : > { %v5503_v11 = vadd.f32 %v10437_v24, %v5502_v4  ;;  %v6506_v32 = vpop.f32.mrb[150].mxu0 }
 0xbe0   : > { %v5547_v33 = vadd.f32 %v5511_v25, %v11050_v46  ;;  %v5514_v1 = vadd.f32 %v6506_v32, %v10437_v24  ;;  %v5505_v17 = vpop.f32.mrb[151].mxu0 }
 0xbe1   : > { %v5545_v58 = vadd.f32 %v5503_v11, %v11051_v38  ;;  %v5506_v27 = vadd.f32 %v10437_v24, %v5505_v17 }
 0xbe2   : > { %5579 = vst.msk [vmem:[%s10447_s3 + $0xf0] sm:$0xff] %vm997_vm0, %v5547_v33  ;;  %v5548_v49 = vadd.f32 %v5514_v1, %v11052_v23 }
 0xbe3   : > { %5577 = vst.msk [vmem:[%s10447_s3 + $0xe0] sm:$0xff] %vm997_vm0, %v5545_v58  ;;  %v5546_v21 = vadd.f32 %v5506_v27, %v11054_v48 }
 0xbe4   : > { %5580 = vst.msk [vmem:[%s10447_s3 + $0xf8] sm:$0xff] %vm997_vm0, %v5548_v49 }
 0xbe5   : > { %5578 = vst.msk [vmem:[%s10447_s3 + $0xe8] sm:$0xff] %vm997_vm0, %v5546_v21 }
 0xbe6   : > { %7308 = shalt.err (!%p7305_p11)
}
 0xbe7   : > { %s7309_s3 = scalar_lea.hbm %s10569_s24, 4096  ;;  %s7313_s1 = scalar_lea.hbm %s11053_s17, 8192 }
 0xbe8   : > { %p7310_p12 = scmp.ne.s32.totalorder %s10569_s24, %s7309_s3  ;;  %p7314_p7 = scmp.lt.u32.totalorder %s10569_s24, %s11053_s17 }
 0xbe9   : > { %p7315_p6 = scmp.lt.u32.totalorder %s7313_s1, %s7309_s3  ;;  %p7317_p4 = scmp.lt.u32.totalorder %s7309_s3, %s10569_s24 }
 0xbea   : > { %p7311_p0 = pnand %p7310_p12, %p11055_p13 }
 0xbeb   : > { %p7316_p9 = por %p7315_p6, %p7314_p7 }
 0xbec   : > { %p7312_p5 = pneg %p7311_p0 }
 0xbed   : > { %p7318_p1 = por %p7317_p4, %p7316_p9 }
 0xbef   : > { %p7319_p3 = pnand %p7318_p1, %p7312_p5 }
 0xbf1   : > { %7322 = shalt.err (!%p7319_p3)
}
 0xbf2   : > { %s7394_s0 = smov 128   ;;  %s7395_s21 = smov 8  }
 0xbf3   : > { %s11056_s14 = scalar_lea.sflag [#allocation4], %s7838_s2 }
 0xbf4   : > { %6669 = dma.vmem_to_hbm [thread:$0]  (%p11055_p13), %s10571_s16, 4096, %s10569_s24, %s11056_s14, %s7394_s0, %s7394_s0, %s7395_s21  }
 0xbf5 PF: > { %s5610_s11 = sand.u32 1, %s7365_s8   ;;  %p11057_p2 = scmp.ne.s32.totalorder %s10817_s7, 0 }
 0xbf6   : > { %p11058_p8 = scmp.ge.s32.totalorder %s7377_s30, 2  ;;  %s5611_s10 = scalar_lea.sflag [#allocation4], %s5610_s11 }
 0xbf8   : > { %p6701_p10 = pnand %p11058_p8, %p11057_p2 }
 0xbfa   : > { %7360 = dma.done.wait (!%p6701_p10), %s5611_s10, 4096  }
 0xbfb   : > { %7362 = vsyncadd (!%p6701_p10), %s5611_s10, 4294963200  ;;  %p45_p11 = scmp.ge.s32.totalorder %s7759_s12, 4   ;;  %s11059_s8 = smov %s7369_s5 }
 0xbfc   : > { %s11060_s5 = smov %s7373_s9  ;;  %s11061_s9 = smov %s7770_s13 }
 0xbfd   : > { %s11062_s30 = smov %s7759_s12  ;;  %47 = sbr.rel (!%p45_p11) target bundleno = 36 (0x24), region = 209 }
 0xc04   :  { %5616 = vsyncpa [#allocation3], 1 }
 0xc05   :  { %5618 = vsyncpa [#allocation3 + $0x1], 1 }
 0xc06   :  { %5619 = vsyncpa [#allocation6], 1 }
 0xc07   :  { %5620 = vsyncpa [#allocation9], 1 }
 0xc08   :  { %5621 = vsyncpa [#allocation12], 1 }
 0xc09   :  { %5622 = vsyncpa [#allocation15], 1 }
 0xc0a   :  { %5623 = vsyncpa [#allocation4], 1 }
 0xc0b   :  { %5625 = vsyncpa [#allocation4 + $0x1], 1 }

</bundles_post_ra>
